<compile_context>
chip_gen: v6e
topology: v6e:2x2x1
jax: 0.10.0
libtpu: 0.0.40
codegen_flags: <defaults>
</compile_context>

<pallas_src>
import functools

import jax
import jax.numpy as jnp
from jax import lax
from jax.experimental import pallas as pl
from jax.experimental.pallas import tpu as pltpu

EXPANSION = 4


def _round_up(a, b):
    return (a + b - 1) // b * b


# ------------------------------ fused kernel -------------------------------

def _gn2_scale_shift(x, ga, gb, b, eps):
    """GroupNorm(num_groups=2) folded to a per-channel (1, C) scale/shift.

    ga / gb are gamma with the other group's channels zeroed (prepared once),
    so GN(x) * gamma + beta == x * scale + shift.  Sum and sum-of-squares are
    taken in one pass as per-channel axis-0 partial sums + a tiny lane reduce.
    """
    M, C = x.shape
    cg = C // 2
    inv_n = 1.0 / float(M * cg)
    cs = jnp.sum(x, axis=0, keepdims=True)          # (1, C)
    css = jnp.sum(x * x, axis=0, keepdims=True)     # (1, C)
    m0 = jnp.sum(cs[:, :cg]) * inv_n
    m1 = jnp.sum(cs[:, cg:]) * inv_n
    v0 = jnp.maximum(jnp.sum(css[:, :cg]) * inv_n - m0 * m0, 0.0)
    v1 = jnp.maximum(jnp.sum(css[:, cg:]) * inv_n - m1 * m1, 0.0)
    r0 = lax.rsqrt(v0 + eps)
    r1 = lax.rsqrt(v1 + eps)
    scale = r0 * ga + r1 * gb
    shift = b - (m0 * r0) * ga - (m1 * r1) * gb
    return scale, shift


def _bottleneck_kernel(*refs, H, W, stride, eps, has_ds, base):
    n_in = 17 if has_ds else 13
    (x_ref, w1_ref, g1a_ref, g1b_ref, b1_ref,
     w2_ref, g2a_ref, g2b_ref, b2_ref,
     w3_ref, g3a_ref, g3b_ref, b3_ref) = refs[:13]
    if has_ds:
        wd_ref, gda_ref, gdb_ref, bd_ref = refs[13:17]
    o_ref = refs[n_in]
    pad_ref = refs[n_in + 1]
    if stride > 1:
        sa_ref = refs[n_in + 2]
        sb_ref = refs[n_in + 3]

    HW = H * W
    Ho = (H - 1) // stride + 1
    Wo = (W - 1) // stride + 1
    HWo = Ho * Wo
    cmid = w1_ref.shape[1]
    cout = w3_ref.shape[1]
    bf16 = jnp.bfloat16
    top = base

    x = x_ref[0]                                      # (HW, Cin) f32

    # ---- conv1 (1x1) + GN1 + ReLU (bf16 MXU operands, f32 accumulate) ----
    h1 = jnp.dot(x.astype(bf16), w1_ref[...], preferred_element_type=jnp.float32)
    s1, t1 = _gn2_scale_shift(h1, g1a_ref[...], g1b_ref[...], b1_ref[...], eps)
    y1 = jnp.maximum(h1 * s1 + t1, 0.0)               # (HW, cmid) f32

    # ---- conv2 (3x3, pad=1): wide [left | center | right] tap buffer ----
    # Zero only the halo row bands every step (interior fully overwritten).
    pad_ref[0:top, :] = jnp.zeros((top, 3 * cmid), jnp.float32)
    pad_ref[top + HW:top + HW + base, :] = jnp.zeros((base, 3 * cmid), jnp.float32)
    # center block
    pad_ref[top:top + HW, cmid:2 * cmid] = y1
    # W-boundary masks from an in-kernel iota (no (HW,1) inputs).
    wpos = lax.rem(lax.broadcasted_iota(jnp.int32, (HW, cmid), 0), W)
    c_lo = pad_ref[top - 1:top - 1 + HW, cmid:2 * cmid]   # y1[r-1] (halo 0 at r=0)
    c_hi = pad_ref[top + 1:top + 1 + HW, cmid:2 * cmid]   # y1[r+1] (halo 0 at r=HW-1)
    pad_ref[top:top + HW, 0:cmid] = jnp.where(wpos != 0, c_lo, 0.0)
    pad_ref[top:top + HW, 2 * cmid:3 * cmid] = jnp.where(wpos != W - 1, c_hi, 0.0)

    # Three deep-K matmuls (K = 3*cmid), one per kernel row; f32 accumulate.
    acc = jnp.zeros((HW, cmid), jnp.float32)
    for i in range(3):                                 # input row h + (i - 1)
        start = top + (i - 1) * W
        tap = pad_ref[start:start + HW, :]
        acc = acc + jnp.dot(tap.astype(bf16), w2_ref[i],
                            preferred_element_type=jnp.float32)

    # ---- stride: subsample via strided VMEM reads (no one-hot matmul) ----
    if stride > 1:
        sa_ref[...] = acc.reshape(H, W, cmid)
        acc = sa_ref[pl.ds(0, Ho, stride), pl.ds(0, Wo, stride), :]
        acc = acc.reshape(HWo, cmid)

    # ---- GN2 + ReLU ----
    s2, t2 = _gn2_scale_shift(acc, g2a_ref[...], g2b_ref[...], b2_ref[...], eps)
    y2 = jnp.maximum(acc * s2 + t2, 0.0)

    # ---- conv3 (1x1) + GN3 ----
    h3 = jnp.dot(y2.astype(bf16), w3_ref[...], preferred_element_type=jnp.float32)
    s3, t3 = _gn2_scale_shift(h3, g3a_ref[...], g3b_ref[...], b3_ref[...], eps)
    y3 = h3 * s3 + t3

    # ---- shortcut ----
    if has_ds:
        hs = jnp.dot(x.astype(bf16), wd_ref[...], preferred_element_type=jnp.float32)
        if stride > 1:
            sb_ref[...] = hs.reshape(H, W, cout)
            hs = sb_ref[pl.ds(0, Ho, stride), pl.ds(0, Wo, stride), :]
            hs = hs.reshape(HWo, cout)
        sd, td = _gn2_scale_shift(hs, gda_ref[...], gdb_ref[...], bd_ref[...], eps)
        sc = hs * sd + td
    else:
        sc = x                                         # stride==1 and Cin==cout

    # ---- residual add + ReLU ----
    o_ref[0] = jnp.maximum(y3 + sc, 0.0).astype(o_ref.dtype)


# ------------------------------ host wrapper -------------------------------

def _full_block(a):
    """BlockSpec covering the whole (small) array, same block every step."""
    return pl.BlockSpec(a.shape, lambda *_, nd=a.ndim: (0,) * nd)


def prepare_params(raw):
    """One-time weight re-layout: conv weights to (bf16) matmul form, conv2
    taps stacked along K, gamma split per group so GN folds to scale/shift."""
    def split_gn(g, b):
        C = g.shape[0]
        cg = C // 2
        sel0 = (jnp.arange(C) < cg).astype(jnp.float32)
        g = g.astype(jnp.float32)
        return ((g * sel0).reshape(1, C),
                (g * (1.0 - sel0)).reshape(1, C),
                b.astype(jnp.float32).reshape(1, C))

    cmid = raw["conv1_w"].shape[0]
    cin = raw["conv1_w"].shape[1]
    cout = raw["conv3_w"].shape[0]
    # (cout,cin,3,3) -> (kh,kw,cin,cout) -> (3, 3*cin, cout): kw stacked on K
    # in the same [w-1 | w | w+1] order as the wide tap buffer's column blocks.
    w2s = jnp.transpose(raw["conv2_w"], (2, 3, 1, 0)).reshape(3, 3 * cmid, cmid)
    p = {
        "w1": raw["conv1_w"].reshape(cmid, cin).T.astype(jnp.bfloat16),
        "w2s": w2s.astype(jnp.bfloat16),
        "w3": raw["conv3_w"].reshape(cout, cmid).T.astype(jnp.bfloat16),
    }
    p["g1a"], p["g1b"], p["b1"] = split_gn(raw["gn1_g"], raw["gn1_b"])
    p["g2a"], p["g2b"], p["b2"] = split_gn(raw["gn2_g"], raw["gn2_b"])
    p["g3a"], p["g3b"], p["b3"] = split_gn(raw["gn3_g"], raw["gn3_b"])
    if "ds_conv_w" in raw:
        p["wd"] = raw["ds_conv_w"].reshape(cout, cin).T.astype(jnp.bfloat16)
        p["gda"], p["gdb"], p["bd"] = split_gn(raw["ds_gn_g"], raw["ds_gn_b"])
    return p


def bottleneck_forward(prepared, x_nchw, stride, eps=1e-5):
    N, Cin, H, W = x_nchw.shape
    cmid = prepared["w1"].shape[1]
    cout = prepared["w3"].shape[1]
    has_ds = "wd" in prepared
    assert has_ds or (stride == 1 and Cin == cout), \
        "identity shortcut requires stride==1 and Cin == expansion*planes"
    HW = H * W
    Ho = (H - 1) // stride + 1
    Wo = (W - 1) // stride + 1
    HWo = Ho * Wo
    base = max(_round_up(W, 8), 8)      # 8-aligned halo band (>= W rows)

    # TODO(synk): keep NHWC end-to-end to avoid this extra HBM pass.
    x = jnp.transpose(x_nchw, (0, 2, 3, 1)).reshape(N, HW, Cin)

    inputs = [x,
              prepared["w1"], prepared["g1a"], prepared["g1b"], prepared["b1"],
              prepared["w2s"], prepared["g2a"], prepared["g2b"], prepared["b2"],
              prepared["w3"], prepared["g3a"], prepared["g3b"], prepared["b3"]]
    in_specs = [pl.BlockSpec((1, HW, Cin), lambda n: (n, 0, 0))]
    in_specs += [_full_block(a) for a in inputs[1:]]
    if has_ds:
        extra = [prepared["wd"], prepared["gda"], prepared["gdb"], prepared["bd"]]
        inputs += extra
        in_specs += [_full_block(a) for a in extra]

    scratch = [pltpu.VMEM((base + HW + base, 3 * cmid), jnp.float32)]
    if stride > 1:
        scratch += [pltpu.VMEM((H, W, cmid), jnp.float32),
                    pltpu.VMEM((H, W, cout), jnp.float32)]

    kernel = functools.partial(_bottleneck_kernel, H=H, W=W, stride=stride,
                               eps=eps, has_ds=has_ds, base=base)
    out = pl.pallas_call(
        kernel,
        out_shape=jax.ShapeDtypeStruct((N, HWo, cout), jnp.float32),
        grid=(N,),
        in_specs=in_specs,
        out_specs=pl.BlockSpec((1, HWo, cout), lambda n: (n, 0, 0)),
        scratch_shapes=scratch,
        compiler_params=pltpu.CompilerParams(
            dimension_semantics=("parallel",),
            vmem_limit_bytes=64 * 1024 * 1024),
    )(*inputs)

    return jnp.transpose(out.reshape(N, Ho, Wo, cout), (0, 3, 1, 2))


# ------------------------------- init helpers -------------------------------

def init_bottleneck_params(key, in_planes, planes, stride):
    ks = jax.random.split(key, 12)

    def conv_w(k, co, ci, kh, kw):
        fan_in = ci * kh * kw
        return (jax.random.normal(k, (co, ci, kh, kw), jnp.float32)
                / jnp.sqrt(jnp.float32(fan_in)))

    out_planes = EXPANSION * planes
    p = {
        "conv1_w": conv_w(ks[0], planes, in_planes, 1, 1),
        "gn1_g": 1.0 + 0.1 * jax.random.normal(ks[1], (planes,), jnp.float32),
        "gn1_b": 0.1 * jax.random.normal(ks[2], (planes,), jnp.float32),
        "conv2_w": conv_w(ks[3], planes, planes, 3, 3),
        "gn2_g": 1.0 + 0.1 * jax.random.normal(ks[4], (planes,), jnp.float32),
        "gn2_b": 0.1 * jax.random.normal(ks[5], (planes,), jnp.float32),
        "conv3_w": conv_w(ks[6], out_planes, planes, 1, 1),
        "gn3_g": 1.0 + 0.1 * jax.random.normal(ks[7], (out_planes,), jnp.float32),
        "gn3_b": 0.1 * jax.random.normal(ks[8], (out_planes,), jnp.float32),
    }
    if stride != 1 or in_planes != out_planes:
        p["ds_conv_w"] = conv_w(ks[9], out_planes, in_planes, 1, 1)
        p["ds_gn_g"] = 1.0 + 0.1 * jax.random.normal(ks[10], (out_planes,), jnp.float32)
        p["ds_gn_b"] = 0.1 * jax.random.normal(ks[11], (out_planes,), jnp.float32)
    return p


# --------------------------- pure-JAX reference ---------------------------

def _ref_forward(params, x_nchw, stride, eps=1e-5, matmul_dtype=jnp.float32):
    """Reference Bottleneck; matmul_dtype=bfloat16 mirrors the kernel's bf16
    MXU operands (f32 accumulation) for a tight correctness comparison."""
    x = jnp.transpose(x_nchw, (0, 2, 3, 1)).astype(jnp.float32)

    def conv(xi, w, s, pad):
        return lax.conv_general_dilated(
            xi.astype(matmul_dtype),
            jnp.transpose(w, (2, 3, 1, 0)).astype(matmul_dtype),
            (s, s), pad,
            dimension_numbers=("NHWC", "HWIO", "NHWC"),
            preferred_element_type=jnp.float32)

    def gn(xi, g, b, relu):
        N, H, W, C = xi.shape
        xg = xi.reshape(N, H, W, 2, C // 2)
        m = jnp.mean(xg, axis=(1, 2, 4), keepdims=True)
        v = jnp.mean(jnp.square(xg - m), axis=(1, 2, 4), keepdims=True)
        y = ((xg - m) / jnp.sqrt(v + eps)).reshape(N, H, W, C) * g + b
        return jnp.maximum(y, 0.0) if relu else y

    out = gn(conv(x, params["conv1_w"], 1, "VALID"),
             params["gn1_g"], params["gn1_b"], True)
    out = gn(conv(out, params["conv2_w"], stride, [(1, 1), (1, 1)]),
             params["gn2_g"], params["gn2_b"], True)
    out = gn(conv(out, params["conv3_w"], 1, "VALID"),
             params["gn3_g"], params["gn3_b"], False)
    if "ds_conv_w" in params:
        sc = gn(conv(x, params["ds_conv_w"], stride, "VALID"),
                params["ds_gn_g"], params["ds_gn_b"], False)
    else:
        sc = x
    return jnp.transpose(jnp.maximum(out + sc, 0.0), (0, 3, 1, 2))


# ---------------------------------- main ----------------------------------

if __name__ == "__main__":
    key = jax.random.PRNGKey(0)

    def run_case(k, in_planes, planes, stride, N=2, H=16, W=16):
        k_x, k_p = jax.random.split(k)
        x = jax.random.normal(k_x, (N, in_planes, H, W), jnp.float32)   # NCHW
        raw = init_bottleneck_params(k_p, in_planes, planes, stride)
        prepared = prepare_params(raw)
        fwd = jax.jit(functools.partial(bottleneck_forward, stride=stride))
        y = jax.block_until_ready(fwd(prepared, x))
        y_ref = jax.block_until_ready(
            _ref_forward(raw, x, stride, matmul_dtype=jnp.bfloat16))
        Ho = (H - 1) // stride + 1
        Wo = (W - 1) // stride + 1
        assert y.shape == (N, EXPANSION * planes, Ho, Wo), y.shape
        err = float(jnp.max(jnp.abs(y - y_ref)))
        assert jnp.allclose(y, y_ref, atol=2e-2, rtol=2e-2), f"max abs diff {err}"

    k1, k2, k3 = jax.random.split(key, 3)
    run_case(k1, in_planes=4, planes=4, stride=1)    # projection shortcut
    run_case(k2, in_planes=16, planes=4, stride=1)   # identity shortcut
    run_case(k3, in_planes=4, planes=4, stride=2)    # strided + projection
    print("KERNEL_OK")
</pallas_src>

<mosaic_0001>
module attributes {stable_mosaic.version = 11 : i64} {
  func.func @_bottleneck_kernel(%arg0: i32, %arg1: memref<1x256x4xf32, #tpu.memory_space<vmem>>, %arg2: memref<4x4xbf16, #tpu.memory_space<vmem>>, %arg3: memref<1x4xf32, #tpu.memory_space<vmem>>, %arg4: memref<1x4xf32, #tpu.memory_space<vmem>>, %arg5: memref<1x4xf32, #tpu.memory_space<vmem>>, %arg6: memref<3x12x4xbf16, #tpu.memory_space<vmem>>, %arg7: memref<1x4xf32, #tpu.memory_space<vmem>>, %arg8: memref<1x4xf32, #tpu.memory_space<vmem>>, %arg9: memref<1x4xf32, #tpu.memory_space<vmem>>, %arg10: memref<4x16xbf16, #tpu.memory_space<vmem>>, %arg11: memref<1x16xf32, #tpu.memory_space<vmem>>, %arg12: memref<1x16xf32, #tpu.memory_space<vmem>>, %arg13: memref<1x16xf32, #tpu.memory_space<vmem>>, %arg14: memref<4x16xbf16, #tpu.memory_space<vmem>>, %arg15: memref<1x16xf32, #tpu.memory_space<vmem>>, %arg16: memref<1x16xf32, #tpu.memory_space<vmem>>, %arg17: memref<1x16xf32, #tpu.memory_space<vmem>>, %arg18: memref<1x256x16xf32, #tpu.memory_space<vmem>>, %arg19: memref<288x12xf32, #tpu.memory_space<vmem>>) attributes {dimension_semantics = [#tpu.dimension_semantics<parallel>], iteration_bounds = array<i64: 2>, scalar_prefetch = 0 : i64, scratch_operands = 1 : i64, tpu.core_type = #tpu.core_type<tc>, window_params = [{transform_indices = @transform_0, window_bounds = array<i64: 1, 256, 4>}, {pipeline_mode = #tpu.pipeline_mode<synchronous>, transform_indices = @transform_1, window_bounds = array<i64: 4, 4>}, {pipeline_mode = #tpu.pipeline_mode<synchronous>, transform_indices = @transform_2, window_bounds = array<i64: 1, 4>}, {pipeline_mode = #tpu.pipeline_mode<synchronous>, transform_indices = @transform_3, window_bounds = array<i64: 1, 4>}, {pipeline_mode = #tpu.pipeline_mode<synchronous>, transform_indices = @transform_4, window_bounds = array<i64: 1, 4>}, {pipeline_mode = #tpu.pipeline_mode<synchronous>, transform_indices = @transform_5, window_bounds = array<i64: 3, 12, 4>}, {pipeline_mode = #tpu.pipeline_mode<synchronous>, transform_indices = @transform_6, window_bounds = array<i64: 1, 4>}, {pipeline_mode = #tpu.pipeline_mode<synchronous>, transform_indices = @transform_7, window_bounds = array<i64: 1, 4>}, {pipeline_mode = #tpu.pipeline_mode<synchronous>, transform_indices = @transform_8, window_bounds = array<i64: 1, 4>}, {pipeline_mode = #tpu.pipeline_mode<synchronous>, transform_indices = @transform_9, window_bounds = array<i64: 4, 16>}, {pipeline_mode = #tpu.pipeline_mode<synchronous>, transform_indices = @transform_10, window_bounds = array<i64: 1, 16>}, {pipeline_mode = #tpu.pipeline_mode<synchronous>, transform_indices = @transform_11, window_bounds = array<i64: 1, 16>}, {pipeline_mode = #tpu.pipeline_mode<synchronous>, transform_indices = @transform_12, window_bounds = array<i64: 1, 16>}, {pipeline_mode = #tpu.pipeline_mode<synchronous>, transform_indices = @transform_13, window_bounds = array<i64: 4, 16>}, {pipeline_mode = #tpu.pipeline_mode<synchronous>, transform_indices = @transform_14, window_bounds = array<i64: 1, 16>}, {pipeline_mode = #tpu.pipeline_mode<synchronous>, transform_indices = @transform_15, window_bounds = array<i64: 1, 16>}, {pipeline_mode = #tpu.pipeline_mode<synchronous>, transform_indices = @transform_16, window_bounds = array<i64: 1, 16>}, {transform_indices = @transform_17, window_bounds = array<i64: 1, 256, 16>}]} {
    %c0 = arith.constant 0 : index
    %c0_0 = arith.constant 0 : index
    %c0_1 = arith.constant 0 : index
    %0 = vector.load %arg1[%c0, %c0_0, %c0_1] : memref<1x256x4xf32, #tpu.memory_space<vmem>>, vector<1x256x4xf32>
    %1 = vector.shape_cast %0 : vector<1x256x4xf32> to vector<256x4xf32>
    %2 = arith.truncf %1 : vector<256x4xf32> to vector<256x4xbf16>
    %c0_2 = arith.constant 0 : index
    %c0_3 = arith.constant 0 : index
    %3 = vector.load %arg2[%c0_2, %c0_3] : memref<4x4xbf16, #tpu.memory_space<vmem>>, vector<4x4xbf16>
    %cst = arith.constant dense<0.000000e+00> : vector<256x4xf32>
    %4 = tpu.matmul %2, %3, %cst {dimension_numbers = #tpu.dot_dimension_numbers<[1], [0], [0], [1], [0, 0, 1, 1], [], []>} : vector<256x4xbf16>, vector<4x4xbf16>, vector<256x4xf32> -> vector<256x4xf32>
    %c0_4 = arith.constant 0 : index
    %c0_5 = arith.constant 0 : index
    %5 = vector.load %arg3[%c0_4, %c0_5] : memref<1x4xf32, #tpu.memory_space<vmem>>, vector<1x4xf32>
    %c0_6 = arith.constant 0 : index
    %c0_7 = arith.constant 0 : index
    %6 = vector.load %arg4[%c0_6, %c0_7] : memref<1x4xf32, #tpu.memory_space<vmem>>, vector<1x4xf32>
    %c0_8 = arith.constant 0 : index
    %c0_9 = arith.constant 0 : index
    %7 = vector.load %arg5[%c0_8, %c0_9] : memref<1x4xf32, #tpu.memory_space<vmem>>, vector<1x4xf32>
    %cst_10 = arith.constant dense<0.000000e+00> : vector<4xf32>
    %8 = vector.multi_reduction <add>, %4, %cst_10 [0] : vector<256x4xf32> to vector<4xf32>
    %9 = vector.shape_cast %8 : vector<4xf32> to vector<1x4xf32>
    %10 = arith.mulf %4, %4 : vector<256x4xf32>
    %cst_11 = arith.constant dense<0.000000e+00> : vector<4xf32>
    %11 = vector.multi_reduction <add>, %10, %cst_11 [0] : vector<256x4xf32> to vector<4xf32>
    %12 = vector.shape_cast %11 : vector<4xf32> to vector<1x4xf32>
    %13 = vector.extract_strided_slice %9 {offsets = [0, 0], sizes = [1, 2], strides = [1, 1]} : vector<1x4xf32> to vector<1x2xf32>
    %14 = vector.shape_cast %13 : vector<1x2xf32> to vector<1x1x2xf32>
    %cst_12 = arith.constant dense<0.000000e+00> : vector<1xf32>
    %15 = vector.multi_reduction <add>, %14, %cst_12 [1, 2] : vector<1x1x2xf32> to vector<1xf32>
    %16 = vector.shape_cast %15 : vector<1xf32> to vector<1x1x1xf32>
    %17 = vector.extract %16[0, 0, 0] : f32 from vector<1x1x1xf32>
    %cst_13 = arith.constant 0.001953125 : f32
    %18 = arith.mulf %17, %cst_13 : f32
    %19 = vector.extract_strided_slice %9 {offsets = [0, 2], sizes = [1, 2], strides = [1, 1]} : vector<1x4xf32> to vector<1x2xf32>
    %20 = vector.shape_cast %19 : vector<1x2xf32> to vector<1x1x2xf32>
    %cst_14 = arith.constant dense<0.000000e+00> : vector<1xf32>
    %21 = vector.multi_reduction <add>, %20, %cst_14 [1, 2] : vector<1x1x2xf32> to vector<1xf32>
    %22 = vector.shape_cast %21 : vector<1xf32> to vector<1x1x1xf32>
    %23 = vector.extract %22[0, 0, 0] : f32 from vector<1x1x1xf32>
    %cst_15 = arith.constant 0.001953125 : f32
    %24 = arith.mulf %23, %cst_15 : f32
    %25 = vector.extract_strided_slice %12 {offsets = [0, 0], sizes = [1, 2], strides = [1, 1]} : vector<1x4xf32> to vector<1x2xf32>
    %26 = vector.shape_cast %25 : vector<1x2xf32> to vector<1x1x2xf32>
    %cst_16 = arith.constant dense<0.000000e+00> : vector<1xf32>
    %27 = vector.multi_reduction <add>, %26, %cst_16 [1, 2] : vector<1x1x2xf32> to vector<1xf32>
    %28 = vector.shape_cast %27 : vector<1xf32> to vector<1x1x1xf32>
    %29 = vector.extract %28[0, 0, 0] : f32 from vector<1x1x1xf32>
    %cst_17 = arith.constant 0.001953125 : f32
    %30 = arith.mulf %29, %cst_17 : f32
    %31 = arith.mulf %18, %18 : f32
    %32 = arith.subf %30, %31 : f32
    %cst_18 = arith.constant 0.000000e+00 : f32
    %33 = arith.maximumf %32, %cst_18 : f32
    %34 = vector.extract_strided_slice %12 {offsets = [0, 2], sizes = [1, 2], strides = [1, 1]} : vector<1x4xf32> to vector<1x2xf32>
    %35 = vector.shape_cast %34 : vector<1x2xf32> to vector<1x1x2xf32>
    %cst_19 = arith.constant dense<0.000000e+00> : vector<1xf32>
    %36 = vector.multi_reduction <add>, %35, %cst_19 [1, 2] : vector<1x1x2xf32> to vector<1xf32>
    %37 = vector.shape_cast %36 : vector<1xf32> to vector<1x1x1xf32>
    %38 = vector.extract %37[0, 0, 0] : f32 from vector<1x1x1xf32>
    %cst_20 = arith.constant 0.001953125 : f32
    %39 = arith.mulf %38, %cst_20 : f32
    %40 = arith.mulf %24, %24 : f32
    %41 = arith.subf %39, %40 : f32
    %cst_21 = arith.constant 0.000000e+00 : f32
    %42 = arith.maximumf %41, %cst_21 : f32
    %cst_22 = arith.constant 9.99999974E-6 : f32
    %43 = arith.addf %33, %cst_22 : f32
    %44 = math.rsqrt %43 : f32
    %cst_23 = arith.constant 9.99999974E-6 : f32
    %45 = arith.addf %42, %cst_23 : f32
    %46 = math.rsqrt %45 : f32
    %47 = vector.broadcast %44 : f32 to vector<1x4xf32>
    %48 = arith.mulf %47, %5 : vector<1x4xf32>
    %49 = vector.broadcast %46 : f32 to vector<1x4xf32>
    %50 = arith.mulf %49, %6 : vector<1x4xf32>
    %51 = arith.addf %48, %50 : vector<1x4xf32>
    %52 = arith.mulf %18, %44 : f32
    %53 = vector.broadcast %52 : f32 to vector<1x4xf32>
    %54 = arith.mulf %53, %5 : vector<1x4xf32>
    %55 = arith.subf %7, %54 : vector<1x4xf32>
    %56 = arith.mulf %24, %46 : f32
    %57 = vector.broadcast %56 : f32 to vector<1x4xf32>
    %58 = arith.mulf %57, %6 : vector<1x4xf32>
    %59 = arith.subf %55, %58 : vector<1x4xf32>
    %60 = vector.broadcast %51 : vector<1x4xf32> to vector<256x4xf32>
    %61 = arith.mulf %4, %60 : vector<256x4xf32>
    %62 = vector.broadcast %59 : vector<1x4xf32> to vector<256x4xf32>
    %63 = arith.addf %61, %62 : vector<256x4xf32>
    %cst_24 = arith.constant 0.000000e+00 : f32
    %64 = vector.broadcast %cst_24 : f32 to vector<256x4xf32>
    %65 = arith.maximumf %63, %64 : vector<256x4xf32>
    %cst_25 = arith.constant 0.000000e+00 : f32
    %66 = vector.broadcast %cst_25 : f32 to vector<16x12xf32>
    %c0_26 = arith.constant 0 : index
    %c0_27 = arith.constant 0 : index
    %67 = vector.load %arg19[%c0_26, %c0_27] : memref<288x12xf32, #tpu.memory_space<vmem>>, vector<16x12xf32>
    tpu.vector_store %arg19[%c0_26, %c0_27], %66 {strides = array<i32>} : memref<288x12xf32, #tpu.memory_space<vmem>>, vector<16x12xf32>,
    %cst_28 = arith.constant 0.000000e+00 : f32
    %68 = vector.broadcast %cst_28 : f32 to vector<16x12xf32>
    %c272 = arith.constant 272 : index
    %c0_29 = arith.constant 0 : index
    %69 = vector.load %arg19[%c272, %c0_29] : memref<288x12xf32, #tpu.memory_space<vmem>>, vector<16x12xf32>
    tpu.vector_store %arg19[%c272, %c0_29], %68 {strides = array<i32>} : memref<288x12xf32, #tpu.memory_space<vmem>>, vector<16x12xf32>,
    %c16 = arith.constant 16 : index
    %c4 = arith.constant 4 : index
    %70 = vector.load %arg19[%c16, %c4] : memref<288x12xf32, #tpu.memory_space<vmem>>, vector<256x4xf32>
    tpu.vector_store %arg19[%c16, %c4], %65 {strides = array<i32>} : memref<288x12xf32, #tpu.memory_space<vmem>>, vector<256x4xf32>,
    %71 = tpu.iota {dimensions = array<i32: 0>} : vector<256x4xi32>
    %c16_i32 = arith.constant 16 : i32
    %72 = vector.broadcast %c16_i32 : i32 to vector<256x4xi32>
    %73 = arith.remsi %71, %72 : vector<256x4xi32>
    %c15 = arith.constant 15 : index
    %c4_30 = arith.constant 4 : index
    %74 = vector.load %arg19[%c15, %c4_30] : memref<288x12xf32, #tpu.memory_space<vmem>>, vector<256x4xf32>
    %c17 = arith.constant 17 : index
    %c4_31 = arith.constant 4 : index
    %75 = vector.load %arg19[%c17, %c4_31] : memref<288x12xf32, #tpu.memory_space<vmem>>, vector<256x4xf32>
    %c0_i32 = arith.constant 0 : i32
    %76 = vector.broadcast %c0_i32 : i32 to vector<256x4xi32>
    %77 = arith.cmpi ne, %73, %76 : vector<256x4xi32>
    %cst_32 = arith.constant 0.000000e+00 : f32
    %78 = vector.broadcast %cst_32 : f32 to vector<256x4xf32>
    %79 = arith.select %77, %74, %78 : vector<256x4xi1>, vector<256x4xf32>
    %c16_33 = arith.constant 16 : index
    %c0_34 = arith.constant 0 : index
    %80 = vector.load %arg19[%c16_33, %c0_34] : memref<288x12xf32, #tpu.memory_space<vmem>>, vector<256x4xf32>
    tpu.vector_store %arg19[%c16_33, %c0_34], %79 {strides = array<i32>} : memref<288x12xf32, #tpu.memory_space<vmem>>, vector<256x4xf32>,
    %c15_i32 = arith.constant 15 : i32
    %81 = vector.broadcast %c15_i32 : i32 to vector<256x4xi32>
    %82 = arith.cmpi ne, %73, %81 : vector<256x4xi32>
    %cst_35 = arith.constant 0.000000e+00 : f32
    %83 = vector.broadcast %cst_35 : f32 to vector<256x4xf32>
    %84 = arith.select %82, %75, %83 : vector<256x4xi1>, vector<256x4xf32>
    %c16_36 = arith.constant 16 : index
    %c8 = arith.constant 8 : index
    %85 = vector.load %arg19[%c16_36, %c8] : memref<288x12xf32, #tpu.memory_space<vmem>>, vector<256x4xf32>
    tpu.vector_store %arg19[%c16_36, %c8], %84 {strides = array<i32>} : memref<288x12xf32, #tpu.memory_space<vmem>>, vector<256x4xf32>,
    %cst_37 = arith.constant 0.000000e+00 : f32
    %86 = vector.broadcast %cst_37 : f32 to vector<256x4xf32>
    %c0_38 = arith.constant 0 : index
    %c0_39 = arith.constant 0 : index
    %87 = vector.load %arg19[%c0_38, %c0_39] : memref<288x12xf32, #tpu.memory_space<vmem>>, vector<256x12xf32>
    %88 = arith.truncf %87 : vector<256x12xf32> to vector<256x12xbf16>
    %c0_40 = arith.constant 0 : index
    %c0_41 = arith.constant 0 : index
    %c0_42 = arith.constant 0 : index
    %89 = vector.load %arg6[%c0_40, %c0_41, %c0_42] : memref<3x12x4xbf16, #tpu.memory_space<vmem>>, vector<1x12x4xbf16>
    %90 = vector.shape_cast %89 : vector<1x12x4xbf16> to vector<12x4xbf16>
    %cst_43 = arith.constant dense<0.000000e+00> : vector<256x4xf32>
    %91 = tpu.matmul %88, %90, %cst_43 {dimension_numbers = #tpu.dot_dimension_numbers<[1], [0], [0], [1], [0, 0, 1, 1], [], []>} : vector<256x12xbf16>, vector<12x4xbf16>, vector<256x4xf32> -> vector<256x4xf32>
    %92 = arith.addf %86, %91 : vector<256x4xf32>
    %c16_44 = arith.constant 16 : index
    %c0_45 = arith.constant 0 : index
    %93 = vector.load %arg19[%c16_44, %c0_45] : memref<288x12xf32, #tpu.memory_space<vmem>>, vector<256x12xf32>
    %94 = arith.truncf %93 : vector<256x12xf32> to vector<256x12xbf16>
    %c1 = arith.constant 1 : index
    %c0_46 = arith.constant 0 : index
    %c0_47 = arith.constant 0 : index
    %95 = vector.load %arg6[%c1, %c0_46, %c0_47] : memref<3x12x4xbf16, #tpu.memory_space<vmem>>, vector<1x12x4xbf16>
    %96 = vector.shape_cast %95 : vector<1x12x4xbf16> to vector<12x4xbf16>
    %cst_48 = arith.constant dense<0.000000e+00> : vector<256x4xf32>
    %97 = tpu.matmul %94, %96, %cst_48 {dimension_numbers = #tpu.dot_dimension_numbers<[1], [0], [0], [1], [0, 0, 1, 1], [], []>} : vector<256x12xbf16>, vector<12x4xbf16>, vector<256x4xf32> -> vector<256x4xf32>
    %98 = arith.addf %92, %97 : vector<256x4xf32>
    %c32 = arith.constant 32 : index
    %c0_49 = arith.constant 0 : index
    %99 = vector.load %arg19[%c32, %c0_49] : memref<288x12xf32, #tpu.memory_space<vmem>>, vector<256x12xf32>
    %100 = arith.truncf %99 : vector<256x12xf32> to vector<256x12xbf16>
    %c2 = arith.constant 2 : index
    %c0_50 = arith.constant 0 : index
    %c0_51 = arith.constant 0 : index
    %101 = vector.load %arg6[%c2, %c0_50, %c0_51] : memref<3x12x4xbf16, #tpu.memory_space<vmem>>, vector<1x12x4xbf16>
    %102 = vector.shape_cast %101 : vector<1x12x4xbf16> to vector<12x4xbf16>
    %cst_52 = arith.constant dense<0.000000e+00> : vector<256x4xf32>
    %103 = tpu.matmul %100, %102, %cst_52 {dimension_numbers = #tpu.dot_dimension_numbers<[1], [0], [0], [1], [0, 0, 1, 1], [], []>} : vector<256x12xbf16>, vector<12x4xbf16>, vector<256x4xf32> -> vector<256x4xf32>
    %104 = arith.addf %98, %103 : vector<256x4xf32>
    %c0_53 = arith.constant 0 : index
    %c0_54 = arith.constant 0 : index
    %105 = vector.load %arg7[%c0_53, %c0_54] : memref<1x4xf32, #tpu.memory_space<vmem>>, vector<1x4xf32>
    %c0_55 = arith.constant 0 : index
    %c0_56 = arith.constant 0 : index
    %106 = vector.load %arg8[%c0_55, %c0_56] : memref<1x4xf32, #tpu.memory_space<vmem>>, vector<1x4xf32>
    %c0_57 = arith.constant 0 : index
    %c0_58 = arith.constant 0 : index
    %107 = vector.load %arg9[%c0_57, %c0_58] : memref<1x4xf32, #tpu.memory_space<vmem>>, vector<1x4xf32>
    %cst_59 = arith.constant dense<0.000000e+00> : vector<4xf32>
    %108 = vector.multi_reduction <add>, %104, %cst_59 [0] : vector<256x4xf32> to vector<4xf32>
    %109 = vector.shape_cast %108 : vector<4xf32> to vector<1x4xf32>
    %110 = arith.mulf %104, %104 : vector<256x4xf32>
    %cst_60 = arith.constant dense<0.000000e+00> : vector<4xf32>
    %111 = vector.multi_reduction <add>, %110, %cst_60 [0] : vector<256x4xf32> to vector<4xf32>
    %112 = vector.shape_cast %111 : vector<4xf32> to vector<1x4xf32>
    %113 = vector.extract_strided_slice %109 {offsets = [0, 0], sizes = [1, 2], strides = [1, 1]} : vector<1x4xf32> to vector<1x2xf32>
    %114 = vector.shape_cast %113 : vector<1x2xf32> to vector<1x1x2xf32>
    %cst_61 = arith.constant dense<0.000000e+00> : vector<1xf32>
    %115 = vector.multi_reduction <add>, %114, %cst_61 [1, 2] : vector<1x1x2xf32> to vector<1xf32>
    %116 = vector.shape_cast %115 : vector<1xf32> to vector<1x1x1xf32>
    %117 = vector.extract %116[0, 0, 0] : f32 from vector<1x1x1xf32>
    %cst_62 = arith.constant 0.001953125 : f32
    %118 = arith.mulf %117, %cst_62 : f32
    %119 = vector.extract_strided_slice %109 {offsets = [0, 2], sizes = [1, 2], strides = [1, 1]} : vector<1x4xf32> to vector<1x2xf32>
    %120 = vector.shape_cast %119 : vector<1x2xf32> to vector<1x1x2xf32>
    %cst_63 = arith.constant dense<0.000000e+00> : vector<1xf32>
    %121 = vector.multi_reduction <add>, %120, %cst_63 [1, 2] : vector<1x1x2xf32> to vector<1xf32>
    %122 = vector.shape_cast %121 : vector<1xf32> to vector<1x1x1xf32>
    %123 = vector.extract %122[0, 0, 0] : f32 from vector<1x1x1xf32>
    %cst_64 = arith.constant 0.001953125 : f32
    %124 = arith.mulf %123, %cst_64 : f32
    %125 = vector.extract_strided_slice %112 {offsets = [0, 0], sizes = [1, 2], strides = [1, 1]} : vector<1x4xf32> to vector<1x2xf32>
    %126 = vector.shape_cast %125 : vector<1x2xf32> to vector<1x1x2xf32>
    %cst_65 = arith.constant dense<0.000000e+00> : vector<1xf32>
    %127 = vector.multi_reduction <add>, %126, %cst_65 [1, 2] : vector<1x1x2xf32> to vector<1xf32>
    %128 = vector.shape_cast %127 : vector<1xf32> to vector<1x1x1xf32>
    %129 = vector.extract %128[0, 0, 0] : f32 from vector<1x1x1xf32>
    %cst_66 = arith.constant 0.001953125 : f32
    %130 = arith.mulf %129, %cst_66 : f32
    %131 = arith.mulf %118, %118 : f32
    %132 = arith.subf %130, %131 : f32
    %cst_67 = arith.constant 0.000000e+00 : f32
    %133 = arith.maximumf %132, %cst_67 : f32
    %134 = vector.extract_strided_slice %112 {offsets = [0, 2], sizes = [1, 2], strides = [1, 1]} : vector<1x4xf32> to vector<1x2xf32>
    %135 = vector.shape_cast %134 : vector<1x2xf32> to vector<1x1x2xf32>
    %cst_68 = arith.constant dense<0.000000e+00> : vector<1xf32>
    %136 = vector.multi_reduction <add>, %135, %cst_68 [1, 2] : vector<1x1x2xf32> to vector<1xf32>
    %137 = vector.shape_cast %136 : vector<1xf32> to vector<1x1x1xf32>
    %138 = vector.extract %137[0, 0, 0] : f32 from vector<1x1x1xf32>
    %cst_69 = arith.constant 0.001953125 : f32
    %139 = arith.mulf %138, %cst_69 : f32
    %140 = arith.mulf %124, %124 : f32
    %141 = arith.subf %139, %140 : f32
    %cst_70 = arith.constant 0.000000e+00 : f32
    %142 = arith.maximumf %141, %cst_70 : f32
    %cst_71 = arith.constant 9.99999974E-6 : f32
    %143 = arith.addf %133, %cst_71 : f32
    %144 = math.rsqrt %143 : f32
    %cst_72 = arith.constant 9.99999974E-6 : f32
    %145 = arith.addf %142, %cst_72 : f32
    %146 = math.rsqrt %145 : f32
    %147 = vector.broadcast %144 : f32 to vector<1x4xf32>
    %148 = arith.mulf %147, %105 : vector<1x4xf32>
    %149 = vector.broadcast %146 : f32 to vector<1x4xf32>
    %150 = arith.mulf %149, %106 : vector<1x4xf32>
    %151 = arith.addf %148, %150 : vector<1x4xf32>
    %152 = arith.mulf %118, %144 : f32
    %153 = vector.broadcast %152 : f32 to vector<1x4xf32>
    %154 = arith.mulf %153, %105 : vector<1x4xf32>
    %155 = arith.subf %107, %154 : vector<1x4xf32>
    %156 = arith.mulf %124, %146 : f32
    %157 = vector.broadcast %156 : f32 to vector<1x4xf32>
    %158 = arith.mulf %157, %106 : vector<1x4xf32>
    %159 = arith.subf %155, %158 : vector<1x4xf32>
    %160 = vector.broadcast %151 : vector<1x4xf32> to vector<256x4xf32>
    %161 = arith.mulf %104, %160 : vector<256x4xf32>
    %162 = vector.broadcast %159 : vector<1x4xf32> to vector<256x4xf32>
    %163 = arith.addf %161, %162 : vector<256x4xf32>
    %cst_73 = arith.constant 0.000000e+00 : f32
    %164 = vector.broadcast %cst_73 : f32 to vector<256x4xf32>
    %165 = arith.maximumf %163, %164 : vector<256x4xf32>
    %166 = arith.truncf %165 : vector<256x4xf32> to vector<256x4xbf16>
    %c0_74 = arith.constant 0 : index
    %c0_75 = arith.constant 0 : index
    %167 = vector.load %arg10[%c0_74, %c0_75] : memref<4x16xbf16, #tpu.memory_space<vmem>>, vector<4x16xbf16>
    %cst_76 = arith.constant dense<0.000000e+00> : vector<256x16xf32>
    %168 = tpu.matmul %166, %167, %cst_76 {dimension_numbers = #tpu.dot_dimension_numbers<[1], [0], [0], [1], [0, 0, 1, 1], [], []>} : vector<256x4xbf16>, vector<4x16xbf16>, vector<256x16xf32> -> vector<256x16xf32>
    %c0_77 = arith.constant 0 : index
    %c0_78 = arith.constant 0 : index
    %169 = vector.load %arg11[%c0_77, %c0_78] : memref<1x16xf32, #tpu.memory_space<vmem>>, vector<1x16xf32>
    %c0_79 = arith.constant 0 : index
    %c0_80 = arith.constant 0 : index
    %170 = vector.load %arg12[%c0_79, %c0_80] : memref<1x16xf32, #tpu.memory_space<vmem>>, vector<1x16xf32>
    %c0_81 = arith.constant 0 : index
    %c0_82 = arith.constant 0 : index
    %171 = vector.load %arg13[%c0_81, %c0_82] : memref<1x16xf32, #tpu.memory_space<vmem>>, vector<1x16xf32>
    %cst_83 = arith.constant dense<0.000000e+00> : vector<16xf32>
    %172 = vector.multi_reduction <add>, %168, %cst_83 [0] : vector<256x16xf32> to vector<16xf32>
    %173 = vector.shape_cast %172 : vector<16xf32> to vector<1x16xf32>
    %174 = arith.mulf %168, %168 : vector<256x16xf32>
    %cst_84 = arith.constant dense<0.000000e+00> : vector<16xf32>
    %175 = vector.multi_reduction <add>, %174, %cst_84 [0] : vector<256x16xf32> to vector<16xf32>
    %176 = vector.shape_cast %175 : vector<16xf32> to vector<1x16xf32>
    %177 = vector.extract_strided_slice %173 {offsets = [0, 0], sizes = [1, 8], strides = [1, 1]} : vector<1x16xf32> to vector<1x8xf32>
    %178 = vector.shape_cast %177 : vector<1x8xf32> to vector<1x1x8xf32>
    %cst_85 = arith.constant dense<0.000000e+00> : vector<1xf32>
    %179 = vector.multi_reduction <add>, %178, %cst_85 [1, 2] : vector<1x1x8xf32> to vector<1xf32>
    %180 = vector.shape_cast %179 : vector<1xf32> to vector<1x1x1xf32>
    %181 = vector.extract %180[0, 0, 0] : f32 from vector<1x1x1xf32>
    %cst_86 = arith.constant 4.8828125E-4 : f32
    %182 = arith.mulf %181, %cst_86 : f32
    %183 = vector.extract_strided_slice %173 {offsets = [0, 8], sizes = [1, 8], strides = [1, 1]} : vector<1x16xf32> to vector<1x8xf32>
    %184 = vector.shape_cast %183 : vector<1x8xf32> to vector<1x1x8xf32>
    %cst_87 = arith.constant dense<0.000000e+00> : vector<1xf32>
    %185 = vector.multi_reduction <add>, %184, %cst_87 [1, 2] : vector<1x1x8xf32> to vector<1xf32>
    %186 = vector.shape_cast %185 : vector<1xf32> to vector<1x1x1xf32>
    %187 = vector.extract %186[0, 0, 0] : f32 from vector<1x1x1xf32>
    %cst_88 = arith.constant 4.8828125E-4 : f32
    %188 = arith.mulf %187, %cst_88 : f32
    %189 = vector.extract_strided_slice %176 {offsets = [0, 0], sizes = [1, 8], strides = [1, 1]} : vector<1x16xf32> to vector<1x8xf32>
    %190 = vector.shape_cast %189 : vector<1x8xf32> to vector<1x1x8xf32>
    %cst_89 = arith.constant dense<0.000000e+00> : vector<1xf32>
    %191 = vector.multi_reduction <add>, %190, %cst_89 [1, 2] : vector<1x1x8xf32> to vector<1xf32>
    %192 = vector.shape_cast %191 : vector<1xf32> to vector<1x1x1xf32>
    %193 = vector.extract %192[0, 0, 0] : f32 from vector<1x1x1xf32>
    %cst_90 = arith.constant 4.8828125E-4 : f32
    %194 = arith.mulf %193, %cst_90 : f32
    %195 = arith.mulf %182, %182 : f32
    %196 = arith.subf %194, %195 : f32
    %cst_91 = arith.constant 0.000000e+00 : f32
    %197 = arith.maximumf %196, %cst_91 : f32
    %198 = vector.extract_strided_slice %176 {offsets = [0, 8], sizes = [1, 8], strides = [1, 1]} : vector<1x16xf32> to vector<1x8xf32>
    %199 = vector.shape_cast %198 : vector<1x8xf32> to vector<1x1x8xf32>
    %cst_92 = arith.constant dense<0.000000e+00> : vector<1xf32>
    %200 = vector.multi_reduction <add>, %199, %cst_92 [1, 2] : vector<1x1x8xf32> to vector<1xf32>
    %201 = vector.shape_cast %200 : vector<1xf32> to vector<1x1x1xf32>
    %202 = vector.extract %201[0, 0, 0] : f32 from vector<1x1x1xf32>
    %cst_93 = arith.constant 4.8828125E-4 : f32
    %203 = arith.mulf %202, %cst_93 : f32
    %204 = arith.mulf %188, %188 : f32
    %205 = arith.subf %203, %204 : f32
    %cst_94 = arith.constant 0.000000e+00 : f32
    %206 = arith.maximumf %205, %cst_94 : f32
    %cst_95 = arith.constant 9.99999974E-6 : f32
    %207 = arith.addf %197, %cst_95 : f32
    %208 = math.rsqrt %207 : f32
    %cst_96 = arith.constant 9.99999974E-6 : f32
    %209 = arith.addf %206, %cst_96 : f32
    %210 = math.rsqrt %209 : f32
    %211 = vector.broadcast %208 : f32 to vector<1x16xf32>
    %212 = arith.mulf %211, %169 : vector<1x16xf32>
    %213 = vector.broadcast %210 : f32 to vector<1x16xf32>
    %214 = arith.mulf %213, %170 : vector<1x16xf32>
    %215 = arith.addf %212, %214 : vector<1x16xf32>
    %216 = arith.mulf %182, %208 : f32
    %217 = vector.broadcast %216 : f32 to vector<1x16xf32>
    %218 = arith.mulf %217, %169 : vector<1x16xf32>
    %219 = arith.subf %171, %218 : vector<1x16xf32>
    %220 = arith.mulf %188, %210 : f32
    %221 = vector.broadcast %220 : f32 to vector<1x16xf32>
    %222 = arith.mulf %221, %170 : vector<1x16xf32>
    %223 = arith.subf %219, %222 : vector<1x16xf32>
    %224 = vector.broadcast %215 : vector<1x16xf32> to vector<256x16xf32>
    %225 = arith.mulf %168, %224 : vector<256x16xf32>
    %226 = vector.broadcast %223 : vector<1x16xf32> to vector<256x16xf32>
    %227 = arith.addf %225, %226 : vector<256x16xf32>
    %228 = arith.truncf %1 : vector<256x4xf32> to vector<256x4xbf16>
    %c0_97 = arith.constant 0 : index
    %c0_98 = arith.constant 0 : index
    %229 = vector.load %arg14[%c0_97, %c0_98] : memref<4x16xbf16, #tpu.memory_space<vmem>>, vector<4x16xbf16>
    %cst_99 = arith.constant dense<0.000000e+00> : vector<256x16xf32>
    %230 = tpu.matmul %228, %229, %cst_99 {dimension_numbers = #tpu.dot_dimension_numbers<[1], [0], [0], [1], [0, 0, 1, 1], [], []>} : vector<256x4xbf16>, vector<4x16xbf16>, vector<256x16xf32> -> vector<256x16xf32>
    %c0_100 = arith.constant 0 : index
    %c0_101 = arith.constant 0 : index
    %231 = vector.load %arg15[%c0_100, %c0_101] : memref<1x16xf32, #tpu.memory_space<vmem>>, vector<1x16xf32>
    %c0_102 = arith.constant 0 : index
    %c0_103 = arith.constant 0 : index
    %232 = vector.load %arg16[%c0_102, %c0_103] : memref<1x16xf32, #tpu.memory_space<vmem>>, vector<1x16xf32>
    %c0_104 = arith.constant 0 : index
    %c0_105 = arith.constant 0 : index
    %233 = vector.load %arg17[%c0_104, %c0_105] : memref<1x16xf32, #tpu.memory_space<vmem>>, vector<1x16xf32>
    %cst_106 = arith.constant dense<0.000000e+00> : vector<16xf32>
    %234 = vector.multi_reduction <add>, %230, %cst_106 [0] : vector<256x16xf32> to vector<16xf32>
    %235 = vector.shape_cast %234 : vector<16xf32> to vector<1x16xf32>
    %236 = arith.mulf %230, %230 : vector<256x16xf32>
    %cst_107 = arith.constant dense<0.000000e+00> : vector<16xf32>
    %237 = vector.multi_reduction <add>, %236, %cst_107 [0] : vector<256x16xf32> to vector<16xf32>
    %238 = vector.shape_cast %237 : vector<16xf32> to vector<1x16xf32>
    %239 = vector.extract_strided_slice %235 {offsets = [0, 0], sizes = [1, 8], strides = [1, 1]} : vector<1x16xf32> to vector<1x8xf32>
    %240 = vector.shape_cast %239 : vector<1x8xf32> to vector<1x1x8xf32>
    %cst_108 = arith.constant dense<0.000000e+00> : vector<1xf32>
    %241 = vector.multi_reduction <add>, %240, %cst_108 [1, 2] : vector<1x1x8xf32> to vector<1xf32>
    %242 = vector.shape_cast %241 : vector<1xf32> to vector<1x1x1xf32>
    %243 = vector.extract %242[0, 0, 0] : f32 from vector<1x1x1xf32>
    %cst_109 = arith.constant 4.8828125E-4 : f32
    %244 = arith.mulf %243, %cst_109 : f32
    %245 = vector.extract_strided_slice %235 {offsets = [0, 8], sizes = [1, 8], strides = [1, 1]} : vector<1x16xf32> to vector<1x8xf32>
    %246 = vector.shape_cast %245 : vector<1x8xf32> to vector<1x1x8xf32>
    %cst_110 = arith.constant dense<0.000000e+00> : vector<1xf32>
    %247 = vector.multi_reduction <add>, %246, %cst_110 [1, 2] : vector<1x1x8xf32> to vector<1xf32>
    %248 = vector.shape_cast %247 : vector<1xf32> to vector<1x1x1xf32>
    %249 = vector.extract %248[0, 0, 0] : f32 from vector<1x1x1xf32>
    %cst_111 = arith.constant 4.8828125E-4 : f32
    %250 = arith.mulf %249, %cst_111 : f32
    %251 = vector.extract_strided_slice %238 {offsets = [0, 0], sizes = [1, 8], strides = [1, 1]} : vector<1x16xf32> to vector<1x8xf32>
    %252 = vector.shape_cast %251 : vector<1x8xf32> to vector<1x1x8xf32>
    %cst_112 = arith.constant dense<0.000000e+00> : vector<1xf32>
    %253 = vector.multi_reduction <add>, %252, %cst_112 [1, 2] : vector<1x1x8xf32> to vector<1xf32>
    %254 = vector.shape_cast %253 : vector<1xf32> to vector<1x1x1xf32>
    %255 = vector.extract %254[0, 0, 0] : f32 from vector<1x1x1xf32>
    %cst_113 = arith.constant 4.8828125E-4 : f32
    %256 = arith.mulf %255, %cst_113 : f32
    %257 = arith.mulf %244, %244 : f32
    %258 = arith.subf %256, %257 : f32
    %cst_114 = arith.constant 0.000000e+00 : f32
    %259 = arith.maximumf %258, %cst_114 : f32
    %260 = vector.extract_strided_slice %238 {offsets = [0, 8], sizes = [1, 8], strides = [1, 1]} : vector<1x16xf32> to vector<1x8xf32>
    %261 = vector.shape_cast %260 : vector<1x8xf32> to vector<1x1x8xf32>
    %cst_115 = arith.constant dense<0.000000e+00> : vector<1xf32>
    %262 = vector.multi_reduction <add>, %261, %cst_115 [1, 2] : vector<1x1x8xf32> to vector<1xf32>
    %263 = vector.shape_cast %262 : vector<1xf32> to vector<1x1x1xf32>
    %264 = vector.extract %263[0, 0, 0] : f32 from vector<1x1x1xf32>
    %cst_116 = arith.constant 4.8828125E-4 : f32
    %265 = arith.mulf %264, %cst_116 : f32
    %266 = arith.mulf %250, %250 : f32
    %267 = arith.subf %265, %266 : f32
    %cst_117 = arith.constant 0.000000e+00 : f32
    %268 = arith.maximumf %267, %cst_117 : f32
    %cst_118 = arith.constant 9.99999974E-6 : f32
    %269 = arith.addf %259, %cst_118 : f32
    %270 = math.rsqrt %269 : f32
    %cst_119 = arith.constant 9.99999974E-6 : f32
    %271 = arith.addf %268, %cst_119 : f32
    %272 = math.rsqrt %271 : f32
    %273 = vector.broadcast %270 : f32 to vector<1x16xf32>
    %274 = arith.mulf %273, %231 : vector<1x16xf32>
    %275 = vector.broadcast %272 : f32 to vector<1x16xf32>
    %276 = arith.mulf %275, %232 : vector<1x16xf32>
    %277 = arith.addf %274, %276 : vector<1x16xf32>
    %278 = arith.mulf %244, %270 : f32
    %279 = vector.broadcast %278 : f32 to vector<1x16xf32>
    %280 = arith.mulf %279, %231 : vector<1x16xf32>
    %281 = arith.subf %233, %280 : vector<1x16xf32>
    %282 = arith.mulf %250, %272 : f32
    %283 = vector.broadcast %282 : f32 to vector<1x16xf32>
    %284 = arith.mulf %283, %232 : vector<1x16xf32>
    %285 = arith.subf %281, %284 : vector<1x16xf32>
    %286 = vector.broadcast %277 : vector<1x16xf32> to vector<256x16xf32>
    %287 = arith.mulf %230, %286 : vector<256x16xf32>
    %288 = vector.broadcast %285 : vector<1x16xf32> to vector<256x16xf32>
    %289 = arith.addf %287, %288 : vector<256x16xf32>
    %290 = arith.addf %227, %289 : vector<256x16xf32>
    %cst_120 = arith.constant 0.000000e+00 : f32
    %291 = vector.broadcast %cst_120 : f32 to vector<256x16xf32>
    %292 = arith.maximumf %290, %291 : vector<256x16xf32>
    %c0_121 = arith.constant 0 : index
    %c0_122 = arith.constant 0 : index
    %c0_123 = arith.constant 0 : index
    %293 = vector.load %arg18[%c0_121, %c0_122, %c0_123] : memref<1x256x16xf32, #tpu.memory_space<vmem>>, vector<1x256x16xf32>
    %294 = vector.shape_cast %293 : vector<1x256x16xf32> to vector<256x16xf32>
    %295 = vector.shape_cast %292 : vector<256x16xf32> to vector<1x256x16xf32>
    tpu.vector_store %arg18[%c0_121, %c0_122, %c0_123], %295 {strides = array<i32>} : memref<1x256x16xf32, #tpu.memory_space<vmem>>, vector<1x256x16xf32>,
    return
  }
  func.func @transform_0(%arg0: i32) -> (i32, i32, i32) {
    %c0_i32 = arith.constant 0 : i32
    %c0_i32_0 = arith.constant 0 : i32
    %c0_i32_1 = arith.constant 0 : i32
    return %arg0, %c0_i32, %c0_i32_0 : i32, i32, i32
  }
  func.func @transform_1(%arg0: i32) -> (i32, i32) {
    %c0_i32 = arith.constant 0 : i32
    %c0_i32_0 = arith.constant 0 : i32
    %c0_i32_1 = arith.constant 0 : i32
    return %c0_i32, %c0_i32_0 : i32, i32
  }
  func.func @transform_2(%arg0: i32) -> (i32, i32) {
    %c0_i32 = arith.constant 0 : i32
    %c0_i32_0 = arith.constant 0 : i32
    %c0_i32_1 = arith.constant 0 : i32
    return %c0_i32, %c0_i32_0 : i32, i32
  }
  func.func @transform_3(%arg0: i32) -> (i32, i32) {
    %c0_i32 = arith.constant 0 : i32
    %c0_i32_0 = arith.constant 0 : i32
    %c0_i32_1 = arith.constant 0 : i32
    return %c0_i32, %c0_i32_0 : i32, i32
  }
  func.func @transform_4(%arg0: i32) -> (i32, i32) {
    %c0_i32 = arith.constant 0 : i32
    %c0_i32_0 = arith.constant 0 : i32
    %c0_i32_1 = arith.constant 0 : i32
    return %c0_i32, %c0_i32_0 : i32, i32
  }
  func.func @transform_5(%arg0: i32) -> (i32, i32, i32) {
    %c0_i32 = arith.constant 0 : i32
    %c0_i32_0 = arith.constant 0 : i32
    %c0_i32_1 = arith.constant 0 : i32
    %c0_i32_2 = arith.constant 0 : i32
    return %c0_i32, %c0_i32_0, %c0_i32_1 : i32, i32, i32
  }
  func.func @transform_6(%arg0: i32) -> (i32, i32) {
    %c0_i32 = arith.constant 0 : i32
    %c0_i32_0 = arith.constant 0 : i32
    %c0_i32_1 = arith.constant 0 : i32
    return %c0_i32, %c0_i32_0 : i32, i32
  }
  func.func @transform_7(%arg0: i32) -> (i32, i32) {
    %c0_i32 = arith.constant 0 : i32
    %c0_i32_0 = arith.constant 0 : i32
    %c0_i32_1 = arith.constant 0 : i32
    return %c0_i32, %c0_i32_0 : i32, i32
  }
  func.func @transform_8(%arg0: i32) -> (i32, i32) {
    %c0_i32 = arith.constant 0 : i32
    %c0_i32_0 = arith.constant 0 : i32
    %c0_i32_1 = arith.constant 0 : i32
    return %c0_i32, %c0_i32_0 : i32, i32
  }
  func.func @transform_9(%arg0: i32) -> (i32, i32) {
    %c0_i32 = arith.constant 0 : i32
    %c0_i32_0 = arith.constant 0 : i32
    %c0_i32_1 = arith.constant 0 : i32
    return %c0_i32, %c0_i32_0 : i32, i32
  }
  func.func @transform_10(%arg0: i32) -> (i32, i32) {
    %c0_i32 = arith.constant 0 : i32
    %c0_i32_0 = arith.constant 0 : i32
    %c0_i32_1 = arith.constant 0 : i32
    return %c0_i32, %c0_i32_0 : i32, i32
  }
  func.func @transform_11(%arg0: i32) -> (i32, i32) {
    %c0_i32 = arith.constant 0 : i32
    %c0_i32_0 = arith.constant 0 : i32
    %c0_i32_1 = arith.constant 0 : i32
    return %c0_i32, %c0_i32_0 : i32, i32
  }
  func.func @transform_12(%arg0: i32) -> (i32, i32) {
    %c0_i32 = arith.constant 0 : i32
    %c0_i32_0 = arith.constant 0 : i32
    %c0_i32_1 = arith.constant 0 : i32
    return %c0_i32, %c0_i32_0 : i32, i32
  }
  func.func @transform_13(%arg0: i32) -> (i32, i32) {
    %c0_i32 = arith.constant 0 : i32
    %c0_i32_0 = arith.constant 0 : i32
    %c0_i32_1 = arith.constant 0 : i32
    return %c0_i32, %c0_i32_0 : i32, i32
  }
  func.func @transform_14(%arg0: i32) -> (i32, i32) {
    %c0_i32 = arith.constant 0 : i32
    %c0_i32_0 = arith.constant 0 : i32
    %c0_i32_1 = arith.constant 0 : i32
    return %c0_i32, %c0_i32_0 : i32, i32
  }
  func.func @transform_15(%arg0: i32) -> (i32, i32) {
    %c0_i32 = arith.constant 0 : i32
    %c0_i32_0 = arith.constant 0 : i32
    %c0_i32_1 = arith.constant 0 : i32
    return %c0_i32, %c0_i32_0 : i32, i32
  }
  func.func @transform_16(%arg0: i32) -> (i32, i32) {
    %c0_i32 = arith.constant 0 : i32
    %c0_i32_0 = arith.constant 0 : i32
    %c0_i32_1 = arith.constant 0 : i32
    return %c0_i32, %c0_i32_0 : i32, i32
  }
  func.func @transform_17(%arg0: i32) -> (i32, i32, i32) {
    %c0_i32 = arith.constant 0 : i32
    %c0_i32_0 = arith.constant 0 : i32
    %c0_i32_1 = arith.constant 0 : i32
    return %arg0, %c0_i32, %c0_i32_0 : i32, i32, i32
  }
}

</mosaic_0001>

<bundles_post_ra>
// kernel: bottleneck_forward.1
= control target key start
LH: loop header
LB: loop body
LE: loop exit
PB: predicated region body
PF: predicated region fallthrough
CT: control target
= control target key end

     0   :  { %s5032_s24 = smov 0   ;;  %s7247_s0 = inlined_call_operand.vmem [shape: f32[2,256,4], index: 0, kind: input, shape index: {}]   ;;  %s7248_s1 = inlined_call_operand.vmem [shape: bf16[4,4], index: 1, kind: input, shape index: {}]   ;;  %s7249_s2 = inlined_call_operand.vmem [shape: f32[1,4], index: 2, kind: input, shape index: {}]   ;;  %s7250_s3 = inlined_call_operand.vmem [shape: f32[1,4], index: 3, kind: input, shape index: {}]   ;;  %s7251_s4 = inlined_call_operand.vmem [shape: f32[1,4], index: 4, kind: input, shape index: {}]   ;;  %s7252_s5 = inlined_call_operand.vmem [shape: bf16[3,12,4], index: 5, kind: input, shape index: {}]   ;;  %s7253_s6 = inlined_call_operand.vmem [shape: f32[1,4], index: 6, kind: input, shape index: {}]   ;;  %s7254_s7 = inlined_call_operand.vmem [shape: f32[1,4], index: 7, kind: input, shape index: {}]   ;;  %s7255_s8 = inlined_call_operand.vmem [shape: f32[1,4], index: 8, kind: input, shape index: {}]   ;;  %s7256_s9 = inlined_call_operand.vmem [shape: bf16[4,16], index: 9, kind: input, shape index: {}]   ;;  %s7257_s10 = inlined_call_operand.vmem [shape: f32[1,16], index: 10, kind: input, shape index: {}]   ;;  %s7258_s11 = inlined_call_operand.vmem [shape: f32[1,16], index: 11, kind: input, shape index: {}]   ;;  %s7259_s12 = inlined_call_operand.vmem [shape: f32[1,16], index: 12, kind: input, shape index: {}]   ;;  %s7260_s13 = inlined_call_operand.vmem [shape: bf16[4,16], index: 13, kind: input, shape index: {}]   ;;  %s7261_s14 = inlined_call_operand.vmem [shape: f32[1,16], index: 14, kind: input, shape index: {}]   ;;  %s7262_s15 = inlined_call_operand.vmem [shape: f32[1,16], index: 15, kind: input, shape index: {}]   ;;  %s7263_s16 = inlined_call_operand.vmem [shape: f32[1,16], index: 16, kind: input, shape index: {}]   ;;  %s7264_s17 = inlined_call_operand.vmem [shape: f32[2,256,16], index: 17, kind: output, shape index: {}]  }
   0x1   :  { %7311 = sst [smem:[#allocation46_spill]] %s7247_s0 }
   0x2   :  { %7312 = sst [smem:[#allocation47_spill]] %s7248_s1 }
   0x3   :  { %7313 = sst [smem:[#allocation48_spill]] %s7249_s2 }
   0x4   :  { %7314 = sst [smem:[#allocation49_spill]] %s7264_s17 }
   0x5 LB: > { %7315 = sst [smem:[#allocation3_spill]] %s4934_s24  ;;  %s4419_s25 = sadd.s32 4294967295, %s4934_s24   ;;  %s4934_s24 = sphi %s5032_s24, %s27_s24  }
   0x6   : > { %p4423_p0 = scmp.ge.s32.totalorder %s4934_s24, 1  ;;  %p487_p1 = scmp.lt.s32.totalorder %s4934_s24, 3 }
   0x8   : > { %p488_p2 = pnand %p4423_p0, %p487_p1 }
   0xa   : > { %491 = sbr.rel (%p488_p2) target bundleno = 2661 (0xa65), region = 88 }
   0xf   : > { %s7316_s28 = sld [smem:[#allocation47_spill]]  ;;  %vm648_vm0 = vcmask 1041408   ;;  %p539_p3 = scmp.lt.s32.totalorder %s4419_s25, 1  ;;  %vm599_vm1 = vcmask 31744   ;;  %vm986_vm2 = vcmask 8192   ;;  %vm1174_vm3 = vcmask 97280  }
  0x10   : > { %s7317_s18 = sld [smem:[#allocation46_spill]]  ;;  %s7272_s1 = smov 126   ;;  %vm1307_vm4 = vcmask 64544   ;;  %vm2219_vm6 = vcmask 1045504  }
  0x11   : > { %s7462_s25 = smov (!%p539_p3, %s4419_s25), 1  ;;  %s7332_s2 = sld [smem:[#allocation48_spill]] }
  0x12   : > { %s7271_s29 = sshll.u32 %s7462_s25, 8 }
  0x15   : > { %v598_v0 = vld [vmem:[%s7316_s28] sm:$0x3] }
  0x16   : > { %4841 = vmatprep.subr.msk.bf16.mxu0 %vm648_vm0, %v598_v0  ;;  %v650_v1 = vsel %vm648_vm0, %v598_v0, 0  ;;  %s5053_s19 = scalar_lea.vmem %s7317_s18, %s7271_s29  ;;  %s4937_s29 = smov 0.0  }
  0x17   : > { %4638 = vmatpush3.bf16.msra.mxu0 %v650_v1  ;;  %v550_v2 = vld [vmem:[%s5053_s19] sm:$0xff]  ;;  %v551_v3 = vld [vmem:[%s5053_s19 + $0x8] sm:$0xff]  ;;  %v552_v4 = vld [vmem:[%s5053_s19 + $0x10] sm:$0xff] }
  0x18   : > { %v5058_v5 = vpack.c.bf16 %v551_v3, %v550_v2  ;;  %v553_v6 = vld [vmem:[%s5053_s19 + $0x18] sm:$0xff]  ;;  %v554_v7 = vld [vmem:[%s5053_s19 + $0x20] sm:$0xff]  ;;  %v555_v8 = vld [vmem:[%s5053_s19 + $0x28] sm:$0xff] }
  0x19   : > { %v5063_v9 = vpack.c.bf16 %v553_v6, %v552_v4  ;;  %v5065_v10 = vpack.c.bf16 %v555_v8, %v554_v7  ;;  %v556_v11 = vld [vmem:[%s5053_s19 + $0x30] sm:$0xff]  ;;  %v557_v12 = vld [vmem:[%s5053_s19 + $0x38] sm:$0xff]  ;;  %v558_v13 = vld [vmem:[%s5053_s19 + $0x40] sm:$0xff] }
  0x1a   : > { %4639 = vmatprep.mubr.msk.bf16.mxu0 %vm599_vm1, %v5058_v5  ;;  %v559_v14 = vld [vmem:[%s5053_s19 + $0x48] sm:$0xff]  ;;  %v5077_v15 = vpack.c.bf16 %v557_v12, %v556_v11  ;;  %v560_v17 = vld [vmem:[%s5053_s19 + $0x50] sm:$0xff]  ;;  %v561_v18 = vld [vmem:[%s5053_s19 + $0x58] sm:$0xff] }
  0x1b   : > { %7318 = vst [vmem:[#allocation4_spill] sm:$0xff] %v5065_v10  ;;  %4640 = vmatmul.mubr.msk.bf16.vlgmr.msra.gmra.mxu0 %vm599_vm1, %v5063_v9  ;;  %v5079_v16 = vpack.c.bf16 %v559_v14, %v558_v13  ;;  %v562_v19 = vld [vmem:[%s5053_s19 + $0x60] sm:$0xff]  ;;  %v563_v20 = vld [vmem:[%s5053_s19 + $0x68] sm:$0xff]  ;;  %v5089_v21 = vpack.c.bf16 %v561_v18, %v560_v17  ;;  %v564_v23 = vld [vmem:[%s5053_s19 + $0x70] sm:$0xff] }
  0x1c   : > { %4643 = vmatprep.mubr.msk.bf16.mxu0 %vm599_vm1, %v5065_v10  ;;  %7319 = vst [vmem:[#allocation5_spill] sm:$0xff] %v5077_v15  ;;  %v5091_v22 = vpack.c.bf16 %v563_v20, %v562_v19  ;;  %v565_v24 = vld [vmem:[%s5053_s19 + $0x78] sm:$0xff]  ;;  %v566_v25 = vld [vmem:[%s5053_s19 + $0x80] sm:$0xff]  ;;  %v567_v26 = vld [vmem:[%s5053_s19 + $0x88] sm:$0xff] }
  0x1d   : > { %7320 = vst [vmem:[#allocation6_spill] sm:$0xff] %v5079_v16  ;;  %7321 = vst [vmem:[#allocation7_spill] sm:$0xff] %v5089_v21  ;;  %v5101_v27 = vpack.c.bf16 %v565_v24, %v564_v23  ;;  %v5103_v28 = vpack.c.bf16 %v567_v26, %v566_v25  ;;  %v568_v29 = vld [vmem:[%s5053_s19 + $0x90] sm:$0xff]  ;;  %v569_v30 = vld [vmem:[%s5053_s19 + $0x98] sm:$0xff] }
  0x1e   : > { %7322 = vst [vmem:[#allocation8_spill] sm:$0xff] %v5091_v22  ;;  %v570_v31 = vld [vmem:[%s5053_s19 + $0xa0] sm:$0xff]  ;;  %v571_v32 = vld [vmem:[%s5053_s19 + $0xa8] sm:$0xff]  ;;  %v5113_v33 = vpack.c.bf16 %v569_v30, %v568_v29  ;;  %v572_v35 = vld [vmem:[%s5053_s19 + $0xb0] sm:$0xff] }
  0x1f   : > { %7323 = vst [vmem:[#allocation9_spill] sm:$0xff] %v5101_v27  ;;  %7324 = vst [vmem:[#allocation10_spill] sm:$0xff] %v5103_v28  ;;  %v5115_v34 = vpack.c.bf16 %v571_v32, %v570_v31  ;;  %v573_v36 = vld [vmem:[%s5053_s19 + $0xb8] sm:$0xff]  ;;  %v574_v37 = vld [vmem:[%s5053_s19 + $0xc0] sm:$0xff] }
  0x20   : > { %7325 = vst [vmem:[#allocation11_spill] sm:$0xff] %v5113_v33  ;;  %v575_v38 = vld [vmem:[%s5053_s19 + $0xc8] sm:$0xff]  ;;  %v5125_v39 = vpack.c.bf16 %v573_v36, %v572_v35  ;;  %v576_v41 = vld [vmem:[%s5053_s19 + $0xd0] sm:$0xff]  ;;  %v577_v42 = vld [vmem:[%s5053_s19 + $0xd8] sm:$0xff] }
  0x21   : > { %7326 = vst [vmem:[#allocation12_spill] sm:$0xff] %v5115_v34  ;;  %v5127_v40 = vpack.c.bf16 %v575_v38, %v574_v37  ;;  %v578_v43 = vld [vmem:[%s5053_s19 + $0xe0] sm:$0xff]  ;;  %v579_v44 = vld [vmem:[%s5053_s19 + $0xe8] sm:$0xff]  ;;  %v5137_v45 = vpack.c.bf16 %v577_v42, %v576_v41  ;;  %v580_v47 = vld [vmem:[%s5053_s19 + $0xf0] sm:$0xff] }
  0x22   : > { %7327 = vst [vmem:[#allocation13_spill] sm:$0xff] %v5125_v39  ;;  %v5139_v46 = vpack.c.bf16 %v579_v44, %v578_v43  ;;  %v581_v48 = vld [vmem:[%s5053_s19 + $0xf8] sm:$0xff] }
  0x23   : > { %4644 = vmatmul.mubr.msk.bf16.gmra.mxu0 %vm599_vm1, %v5077_v15  ;;  %7328 = vst [vmem:[#allocation14_spill] sm:$0xff] %v5127_v40  ;;  %7329 = vst [vmem:[#allocation15_spill] sm:$0xff] %v5137_v45  ;;  %v5147_v49 = vpack.c.bf16 %v581_v48, %v580_v47 }
  0x24   : > { %4647 = vmatprep.mubr.msk.bf16.mxu0 %vm599_vm1, %v5079_v16  ;;  %7330 = vst [vmem:[#allocation16_spill] sm:$0xff] %v5139_v46 }
  0x25   : > { %7331 = vst [vmem:[#allocation17_spill] sm:$0xff] %v5147_v49 }
  0x2b   : > { %4648 = vmatmul.mubr.msk.bf16.gmra.mxu0 %vm599_vm1, %v5089_v21 }
  0x2c   : > { %4651 = vmatprep.mubr.msk.bf16.mxu0 %vm599_vm1, %v5091_v22 }
  0x33   : > { %4652 = vmatmul.mubr.msk.bf16.gmra.mxu0 %vm599_vm1, %v5101_v27 }
  0x34   : > { %4655 = vmatprep.mubr.msk.bf16.mxu0 %vm599_vm1, %v5103_v28 }
  0x3b   : > { %4656 = vmatmul.mubr.msk.bf16.gmra.mxu0 %vm599_vm1, %v5113_v33 }
  0x3c   : > { %4659 = vmatprep.mubr.msk.bf16.mxu0 %vm599_vm1, %v5115_v34 }
  0x43   : > { %4660 = vmatmul.mubr.msk.bf16.gmra.mxu0 %vm599_vm1, %v5125_v39 }
  0x44   : > { %4663 = vmatprep.mubr.msk.bf16.mxu0 %vm599_vm1, %v5127_v40 }
  0x4b   : > { %4664 = vmatmul.mubr.msk.bf16.gmra.mxu0 %vm599_vm1, %v5137_v45 }
  0x4c   : > { %4667 = vmatprep.mubr.msk.bf16.mxu0 %vm599_vm1, %v5139_v46 }
  0x53   : > { %4668 = vmatmul.mubr.msk.bf16.gmra.mxu0 %vm599_vm1, %v5147_v49 }
  0xdb   : > { %v5151_v50 = vpop.f32.mrf.mxu0 }
  0xdc   : > { %v887_v55 = vmul.f32 %v5151_v50, %v5151_v50  ;;  %v819_v61 = vsel %vm599_vm1, %v5151_v50, 0.0 }
  0xdd   : > { %v5153_v51 = vpop.f32.mrf.mxu0 }
  0xde   : > { %v885_v53 = vmul.f32 %v5153_v51, %v5153_v51  ;;  %v816_v56 = vsel %vm599_vm1, %v5153_v51, 0.0  ;;  %v920_v4 = vsel %vm599_vm1, %v887_v55, 0.0 }
  0xdf   : > { %v5155_v52 = vpop.f32.mrf.mxu0 }
  0xe0   : > { %v917_v62 = vsel %vm599_vm1, %v885_v53, 0.0  ;;  %v888_v63 = vmul.f32 %v5155_v52, %v5155_v52  ;;  %v821_v6 = vsel %vm599_vm1, %v5155_v52, 0.0 }
  0xe1   : > { %v5159_v54 = vpop.f32.mrf.mxu0 }
  0xe2   : > { %v817_v57 = vsel %vm599_vm1, %v5159_v54, 0.0  ;;  %v886_v58 = vmul.f32 %v5159_v54, %v5159_v54  ;;  %v922_v13 = vsel %vm599_vm1, %v888_v63, 0.0 }
  0xe3   : > { %v818_v59 = vadd.f32 %v817_v57, %v816_v56  ;;  %v5169_v60 = vpop.f32.mrf.mxu0 }
  0xe4   : > { %v918_v0 = vsel %vm599_vm1, %v886_v58, 0.0  ;;  %v891_v20 = vmul.f32 %v5169_v60, %v5169_v60  ;;  %v827_v31 = vsel %vm599_vm1, %v5169_v60, 0.0 }
  0xe5   : > { %v820_v1 = vadd.f32 %v819_v61, %v818_v59  ;;  %v919_v2 = vadd.f32 %v918_v0, %v917_v62  ;;  %v5177_v3 = vpop.f32.mrf.mxu0 }
  0xe6   : > { %v889_v7 = vmul.f32 %v5177_v3, %v5177_v3  ;;  %v823_v14 = vsel %vm599_vm1, %v5177_v3, 0.0  ;;  %v928_v41 = vsel %vm599_vm1, %v891_v20, 0.0 }
  0xe7   : > { %v921_v8 = vadd.f32 %v920_v4, %v919_v2  ;;  %v822_v11 = vadd.f32 %v821_v6, %v820_v1  ;;  %v5184_v12 = vpop.f32.mrf.mxu0 }
  0xe8   : > { %v924_v23 = vsel %vm599_vm1, %v889_v7, 0.0  ;;  %v892_v32 = vmul.f32 %v5184_v12, %v5184_v12  ;;  %v829_v42 = vsel %vm599_vm1, %v5184_v12, 0.0 }
  0xe9   : > { %v824_v17 = vadd.f32 %v823_v14, %v822_v11  ;;  %v923_v18 = vadd.f32 %v922_v13, %v921_v8  ;;  %v5189_v19 = vpop.f32.mrf.mxu0 }
  0xea   : > { %v825_v24 = vsel %vm599_vm1, %v5189_v19, 0.0  ;;  %v890_v25 = vmul.f32 %v5189_v19, %v5189_v19  ;;  %v930_v53 = vsel %vm599_vm1, %v892_v32, 0.0 }
  0xeb   : > { %v925_v26 = vadd.f32 %v924_v23, %v923_v18  ;;  %v826_v29 = vadd.f32 %v825_v24, %v824_v17  ;;  %v5198_v30 = vpop.f32.mrf.mxu0 }
  0xec   : > { %v926_v35 = vsel %vm599_vm1, %v890_v25, 0.0  ;;  %v895_v59 = vmul.f32 %v5198_v30, %v5198_v30  ;;  %v835_v4 = vsel %vm599_vm1, %v5198_v30, 0.0 }
  0xed   : > { %v828_v36 = vadd.f32 %v827_v31, %v826_v29  ;;  %v927_v37 = vadd.f32 %v926_v35, %v925_v26  ;;  %v5205_v38 = vpop.f32.mrf.mxu0 }
  0xee   : > { %v893_v43 = vmul.f32 %v5205_v38, %v5205_v38  ;;  %v831_v55 = vsel %vm599_vm1, %v5205_v38, 0.0  ;;  %v936_v14 = vsel %vm599_vm1, %v895_v59, 0.0 }
  0xef   : > { %v929_v44 = vadd.f32 %v928_v41, %v927_v37  ;;  %v830_v47 = vadd.f32 %v829_v42, %v828_v36  ;;  %v5212_v48 = vpop.f32.mrf.mxu0 }
  0xf0   : > { %v932_v61 = vsel %vm599_vm1, %v893_v43, 0.0  ;;  %v896_v6 = vmul.f32 %v5212_v48, %v5212_v48  ;;  %v837_v17 = vsel %vm599_vm1, %v5212_v48, 0.0 }
  0xf1   : > { %v832_v56 = vadd.f32 %v831_v55, %v830_v47  ;;  %v931_v57 = vadd.f32 %v930_v53, %v929_v44  ;;  %v5217_v58 = vpop.f32.mrf.mxu0 }
  0xf2   : > { %v833_v62 = vsel %vm599_vm1, %v5217_v58, 0.0  ;;  %v894_v63 = vmul.f32 %v5217_v58, %v5217_v58  ;;  %v938_v25 = vsel %vm599_vm1, %v896_v6, 0.0 }
  0xf3   : > { %v933_v0 = vadd.f32 %v932_v61, %v931_v57  ;;  %v834_v1 = vadd.f32 %v833_v62, %v832_v56  ;;  %v5226_v2 = vpop.f32.mrf.mxu0 }
  0xf4   : > { %v934_v7 = vsel %vm599_vm1, %v894_v63, 0.0  ;;  %v899_v35 = vmul.f32 %v5226_v2, %v5226_v2  ;;  %v843_v47 = vsel %vm599_vm1, %v5226_v2, 0.0 }
  0xf5   : > { %v836_v8 = vadd.f32 %v835_v4, %v834_v1  ;;  %v935_v11 = vadd.f32 %v934_v7, %v933_v0  ;;  %v5233_v13 = vpop.f32.mrf.mxu0 }
  0xf6   : > { %v897_v18 = vmul.f32 %v5233_v13, %v5233_v13  ;;  %v839_v26 = vsel %vm599_vm1, %v5233_v13, 0.0  ;;  %v944_v61 = vsel %vm599_vm1, %v899_v35, 0.0 }
  0xf7   : > { %v937_v20 = vadd.f32 %v936_v14, %v935_v11  ;;  %v838_v23 = vadd.f32 %v837_v17, %v836_v8  ;;  %v5240_v24 = vpop.f32.mrf.mxu0 }
  0xf8   : > { %v940_v36 = vsel %vm599_vm1, %v897_v18, 0.0  ;;  %v900_v53 = vmul.f32 %v5240_v24, %v5240_v24  ;;  %v845_v62 = vsel %vm599_vm1, %v5240_v24, 0.0 }
  0xf9   : > { %v840_v29 = vadd.f32 %v839_v26, %v838_v23  ;;  %v939_v31 = vadd.f32 %v938_v25, %v937_v20  ;;  %v5245_v32 = vpop.f32.mrf.mxu0 }
  0xfa   : > { %v841_v37 = vsel %vm599_vm1, %v5245_v32, 0.0  ;;  %v898_v41 = vmul.f32 %v5245_v32, %v5245_v32  ;;  %v946_v6 = vsel %vm599_vm1, %v900_v53, 0.0 }
  0xfb   : > { %v941_v42 = vadd.f32 %v940_v36, %v939_v31  ;;  %v842_v43 = vadd.f32 %v841_v37, %v840_v29  ;;  %v5254_v44 = vpop.f32.mrf.mxu0 }
  0xfc   : > { %v942_v55 = vsel %vm599_vm1, %v898_v41, 0.0  ;;  %v903_v17 = vmul.f32 %v5254_v44, %v5254_v44  ;;  %v851_v31 = vsel %vm599_vm1, %v5254_v44, 0.0 }
  0xfd   : > { %v844_v56 = vadd.f32 %v843_v47, %v842_v43  ;;  %v943_v57 = vadd.f32 %v942_v55, %v941_v42  ;;  %v5261_v59 = vpop.f32.mrf.mxu0 }
  0xfe   : > { %v901_v63 = vmul.f32 %v5261_v59, %v5261_v59  ;;  %v847_v7 = vsel %vm599_vm1, %v5261_v59, 0.0  ;;  %v952_v43 = vsel %vm599_vm1, %v903_v17, 0.0 }
  0xff   : > { %v945_v0 = vadd.f32 %v944_v61, %v943_v57  ;;  %v846_v1 = vadd.f32 %v845_v62, %v844_v56  ;;  %v5268_v4 = vpop.f32.mrf.mxu0 }
 0x100   : > { %v948_v18 = vsel %vm599_vm1, %v901_v63, 0.0  ;;  %v904_v35 = vmul.f32 %v5268_v4, %v5268_v4  ;;  %v853_v47 = vsel %vm599_vm1, %v5268_v4, 0.0 }
 0x101   : > { %v848_v8 = vadd.f32 %v847_v7, %v846_v1  ;;  %v947_v11 = vadd.f32 %v946_v6, %v945_v0  ;;  %v5273_v14 = vpop.f32.mrf.mxu0 }
 0x102   : > { %v849_v20 = vsel %vm599_vm1, %v5273_v14, 0.0  ;;  %v902_v23 = vmul.f32 %v5273_v14, %v5273_v14  ;;  %v954_v61 = vsel %vm599_vm1, %v904_v35, 0.0 }
 0x103   : > { %v949_v25 = vadd.f32 %v948_v18, %v947_v11  ;;  %v850_v26 = vadd.f32 %v849_v20, %v848_v8  ;;  %v5282_v29 = vpop.f32.mrf.mxu0 }
 0x104   : > { %v950_v36 = vsel %vm599_vm1, %v902_v23, 0.0  ;;  %v907_v6 = vmul.f32 %v5282_v29, %v5282_v29  ;;  %v859_v23 = vsel %vm599_vm1, %v5282_v29, 0.0 }
 0x105   : > { %v852_v37 = vadd.f32 %v851_v31, %v850_v26  ;;  %v951_v41 = vadd.f32 %v950_v36, %v949_v25  ;;  %v5289_v42 = vpop.f32.mrf.mxu0 }
 0x106   : > { %v905_v53 = vmul.f32 %v5289_v42, %v5289_v42  ;;  %v855_v62 = vsel %vm599_vm1, %v5289_v42, 0.0 }
 0x107   : > { %v953_v55 = vadd.f32 %v952_v43, %v951_v41  ;;  %v854_v56 = vadd.f32 %v853_v47, %v852_v37  ;;  %v5296_v57 = vpop.f32.mrf.mxu0  ;;  %v960_v37 = vsel %vm599_vm1, %v907_v6, 0.0 }
 0x108   : > { %v956_v7 = vsel %vm599_vm1, %v905_v53, 0.0  ;;  %v908_v25 = vmul.f32 %v5296_v57, %v5296_v57  ;;  %v861_v41 = vsel %vm599_vm1, %v5296_v57, 0.0 }
 0x109   : > { %v856_v63 = vadd.f32 %v855_v62, %v854_v56  ;;  %v955_v0 = vadd.f32 %v954_v61, %v953_v55  ;;  %v5301_v1 = vpop.f32.mrf.mxu0 }
 0x10a   : > { %v857_v8 = vsel %vm599_vm1, %v5301_v1, 0.0  ;;  %v906_v11 = vmul.f32 %v5301_v1, %v5301_v1  ;;  %v962_v56 = vsel %vm599_vm1, %v908_v25, 0.0 }
 0x10b   : > { %v957_v17 = vadd.f32 %v956_v7, %v955_v0  ;;  %v858_v18 = vadd.f32 %v857_v8, %v856_v63  ;;  %v5310_v20 = vpop.f32.mrf.mxu0 }
 0x10c   : > { %v958_v26 = vsel %vm599_vm1, %v906_v11, 0.0  ;;  %v911_v6 = vmul.f32 %v5310_v20, %v5310_v20  ;;  %v867_v25 = vsel %vm599_vm1, %v5310_v20, 0.0 }
 0x10d   : > { %v860_v31 = vadd.f32 %v859_v23, %v858_v18  ;;  %v959_v35 = vadd.f32 %v958_v26, %v957_v17  ;;  %v5317_v36 = vpop.f32.mrf.mxu0 }
 0x10e   : > { %v909_v43 = vmul.f32 %v5317_v36, %v5317_v36  ;;  %v863_v61 = vsel %vm599_vm1, %v5317_v36, 0.0 }
 0x10f   : > { %v961_v47 = vadd.f32 %v960_v37, %v959_v35  ;;  %v862_v53 = vadd.f32 %v861_v41, %v860_v31  ;;  %v5324_v55 = vpop.f32.mrf.mxu0 }
 0x110   : > { %v964_v7 = vsel %vm599_vm1, %v909_v43, 0.0  ;;  %v912_v26 = vmul.f32 %v5324_v55, %v5324_v55  ;;  %v968_v43 = vsel %vm599_vm1, %v911_v6, 0.0 }
 0x111   : > { %v864_v62 = vadd.f32 %v863_v61, %v862_v53  ;;  %v963_v63 = vadd.f32 %v962_v56, %v961_v47  ;;  %v5329_v0 = vpop.f32.mrf.mxu0  ;;  %v869_v47 = vsel %vm599_vm1, %v5324_v55, 0.0 }
 0x112   : > { %v865_v8 = vsel %vm599_vm1, %v5329_v0, 0.0  ;;  %v910_v11 = vmul.f32 %v5329_v0, %v5329_v0 }
 0x113   : > { %v965_v17 = vadd.f32 %v964_v7, %v963_v63  ;;  %v866_v18 = vadd.f32 %v865_v8, %v864_v62  ;;  %v5338_v23 = vpop.f32.mrf.mxu0  ;;  %v970_v63 = vsel %vm599_vm1, %v912_v26, 0.0 }
 0x114   : > { %v966_v31 = vsel %vm599_vm1, %v910_v11, 0.0  ;;  %v915_v6 = vmul.f32 %v5338_v23, %v5338_v23 }
 0x115   : > { %v868_v35 = vadd.f32 %v867_v25, %v866_v18  ;;  %v967_v37 = vadd.f32 %v966_v31, %v965_v17  ;;  %v5345_v41 = vpop.f32.mrf.mxu0 }
 0x116   : > { %v913_v53 = vmul.f32 %v5345_v41, %v5345_v41  ;;  %v871_v7 = vsel %vm599_vm1, %v5345_v41, 0.0 }
 0x117   : > { %v969_v56 = vadd.f32 %v968_v43, %v967_v37  ;;  %v870_v61 = vadd.f32 %v869_v47, %v868_v35  ;;  %v5352_v62 = vpop.f32.mrf.mxu0  ;;  %v875_v37 = vsel %vm599_vm1, %v5338_v23, 0.0 }
 0x118   : > { %v972_v18 = vsel %vm599_vm1, %v913_v53, 0.0  ;;  %v916_v43 = vmul.f32 %v5352_v62, %v5352_v62  ;;  %v976_v53 = vsel %vm599_vm1, %v915_v6, 0.0 }
 0x119   : > { %v872_v8 = vadd.f32 %v871_v7, %v870_v61  ;;  %v971_v11 = vadd.f32 %v970_v63, %v969_v56  ;;  %v5357_v17 = vpop.f32.mrf.mxu0  ;;  %v877_v63 = vsel %vm599_vm1, %v5352_v62, 0.0 }
 0x11a   : > { %v873_v25 = vsel %vm599_vm1, %v5357_v17, 0.0  ;;  %v914_v31 = vmul.f32 %v5357_v17, %v5357_v17 }
 0x11b   : > { %v973_v35 = vadd.f32 %v972_v18, %v971_v11  ;;  %v874_v26 = vadd.f32 %v873_v25, %v872_v8  ;;  %v978_v11 = vsel %vm599_vm1, %v916_v43, 0.0 }
 0x11c   : > { %v974_v47 = vsel %vm599_vm1, %v914_v31, 0.0 }
 0x11d   : > { %v876_v56 = vadd.f32 %v875_v37, %v874_v26  ;;  %v975_v61 = vadd.f32 %v974_v47, %v973_v35 }
 0x11f   : > { %v977_v7 = vadd.f32 %v976_v53, %v975_v61  ;;  %v878_v49 = vadd.f32 %v877_v63, %v876_v56 }
 0x121   : > { %v879_v8 = vrot.slane %v878_v49, 4  ;;  %v979_v18 = vadd.f32 %v978_v11, %v977_v7 }
 0x123   : > { %v880_v25 = vadd.f32 %v879_v8, %v878_v49  ;;  %v980_v46 = vrot.slane %v979_v18, 4 }
 0x125   : > { %v881_v45 = vrot.slane %v880_v25, 2  ;;  %v981_v40 = vadd.f32 %v980_v46, %v979_v18 }
 0x127   : > { %v882_v39 = vadd.f32 %v881_v45, %v880_v25  ;;  %v982_v34 = vrot.slane %v981_v40, 2 }
 0x129   : > { %v883_v31 = vrot.slane %v882_v39, 1  ;;  %v983_v26 = vadd.f32 %v982_v34, %v981_v40 }
 0x12b   : > { %v884_v35 = vadd.f32 %v883_v31, %v882_v39  ;;  %v984_v6 = vrot.slane %v983_v26, 1 }
 0x12d   : > { %999 = vrot.lane.b32.xlu0 %v884_v35, %s7272_s1  ;;  %v987_v37 = vsel %vm986_vm2, %v884_v35, 0.0  ;;  %v985_v43 = vadd.f32 %v984_v6, %v983_v26 }
 0x12e   : > { %988 = vadd.xlane.f32.xlu1 %v987_v37 }
 0x12f   : > { %v1013_v49 = vsel %vm986_vm2, %v985_v43, 0.0 }
 0x131   : > { %1028 = vrot.lane.b32.xlu0 %v985_v43, %s7272_s1 }
 0x150   : > { %1014 = vadd.xlane.f32.xlu0 %v1013_v49 }
 0x19f   : > { %v1000_v46 = vpop.permute.xlu0 %999 }
 0x1a0   : > { %v1002_v45 = vsel %vm986_vm2, %v1000_v46, 0.0 }
 0x1a1   : > { %1003 = vadd.xlane.f32.xlu1 %v1002_v45 }
 0x1a3   : > { %v1029_v34 = vpop.permute.xlu0 %1028 }
 0x1a4   : > { %v1031_v39 = vsel %vm986_vm2, %v1029_v34, 0.0 }
 0x1a5   : > { %1032 = vadd.xlane.f32.xlu1 %v1031_v39 }
 0x1b7   : > { %v989_v40 = vpop.xlane.xlu1 %988 }
 0x1b8   : > { %v990_v47 = vrot.slane %v989_v40, 4 }
 0x1ba   : > { %v991_v56 = vadd.f32 %v990_v47, %v989_v40 }
 0x1bc   : > { %v992_v61 = vrot.slane %v991_v56, 2 }
 0x1be   : > { %v993_v53 = vadd.f32 %v992_v61, %v991_v56 }
 0x1c0   : > { %v994_v63 = vrot.slane %v993_v53, 1 }
 0x1c2   : > { %v995_v7 = vadd.f32 %v994_v63, %v993_v53 }
 0x1c4   : > { %4847 = vpush %v995_v7 }
 0x1d9   : > { %v1015_v11 = vpop.xlane.xlu0 %1014 }
 0x1da   : > { %v1016_v8 = vrot.slane %v1015_v11, 4 }
 0x1dc   : > { %v1017_v18 = vadd.f32 %v1016_v8, %v1015_v11 }
 0x1de   : > { %v1018_v31 = vrot.slane %v1017_v18, 2 }
 0x1e0   : > { %v1019_v37 = vadd.f32 %v1018_v31, %v1017_v18  ;;  %v813_v31 = vld [vmem:[%s7332_s2] sm:$0x1] }
 0x1e2   : > { %v1020_v34 = vrot.slane %v1019_v37, 1 }
 0x1e4   : > { %v1021_v61 = vadd.f32 %v1020_v34, %v1019_v37  ;;  %v815_v34 = vld [vmem:[%s7251_s4] sm:$0x1] }
 0x1f5   : > { %s4848_s20 = spop %4847 }
 0x1f6   : > { %s5381_s21 = smul.f32 0.001953125, %s4848_s20 }
 0x1f8   : > { %s1024_s22 = smul.f32 %s5381_s21, %s5381_s21 }
 0x22a   : > { %v1004_v25 = vpop.xlane.xlu1 %1003 }
 0x22b   : > { %v1005_v26 = vrot.slane %v1004_v25, 4 }
 0x22d   : > { %v1006_v35 = vadd.f32 %v1005_v26, %v1004_v25  ;;  %v1067_v25 = vlaneseq }
 0x22e   : > { %v1033_v6 = vpop.xlane.xlu1 %1032 }
 0x22f   : > { %v1034_v43 = vrot.slane %v1033_v6, 4  ;;  %v1007_v49 = vrot.slane %v1006_v35, 2  ;;  %v5398_v37 = vshrl.u32 %v1067_v25, 7 }
 0x231   : > { %v1035_v46 = vadd.f32 %v1034_v43, %v1033_v6  ;;  %v1008_v45 = vadd.f32 %v1007_v49, %v1006_v35  ;;  %v814_v6 = vld [vmem:[%s7250_s3] sm:$0x1] }
 0x233   : > { %v1009_v39 = vrot.slane %v1008_v45, 1  ;;  %v1036_v40 = vrot.slane %v1035_v46, 2 }
 0x235   : > { %v1010_v47 = vadd.f32 %v1009_v39, %v1008_v45  ;;  %v1037_v56 = vadd.f32 %v1036_v40, %v1035_v46 }
 0x237   : > { %4849 = vpush %v1010_v47  ;;  %v1038_v53 = vrot.slane %v1037_v56, 1 }
 0x238   : > { %4851 = vpush %v1021_v61 }
 0x239   : > { %v1039_v63 = vadd.f32 %v1038_v53, %v1037_v56  ;;  %v5405_v56 = vsub.s32 0, %v5398_v37 }
 0x23b   : > { %4853 = vpush %v1039_v63  ;;  %7333 = vst [vmem:[#allocation18_spill] sm:$0xff] %v5405_v56 }
 0x268   : > { %s4850_s23 = spop %4849 }
 0x269   : > { %s5385_s26 = smul.f32 0.001953125, %s4850_s23  ;;  %s4852_s27 = spop %4851 }
 0x26a   : > { %s1023_s28 = smul.f32 0.001953125, %s4852_s27 }
 0x26b   : > { %s1042_s19 = smul.f32 %s5385_s26, %s5385_s26 }
 0x26c   : > { %s1025_s0 = ssub.f32 %s1023_s28, %s1024_s22  ;;  %s4854_s30 = spop %4853 }
 0x26d   : > { %s1041_s18 = smul.f32 0.001953125, %s4854_s30 }
 0x26e   : > { %s1026_s1 = smax.f32 %s4937_s29, %s1025_s0 }
 0x26f   : > { %s1045_s20 = sadd.f32 1e-05, %s1026_s1  ;;  %s7349_s1 = smov 126  }
 0x270   : > { %s1043_s24 = ssub.f32 %s1041_s18, %s1042_s19  ;;  %s4940_s19 = smov 124  }
 0x271   : > { %v1046_v7 = vstv %s1045_s20 }
 0x272   : > { %4912 = vrsqrt.f32 %v1046_v7  ;;  %s1044_s17 = smax.f32 %s4937_s29, %s1043_s24 }
 0x273   : > { %s1049_s23 = sadd.f32 1e-05, %s1044_s17 }
 0x275   : > { %v1050_v11 = vstv %s1049_s23 }
 0x276   : > { %4914 = vrsqrt.f32 %v1050_v11 }
 0x27f   : > { %v4913_v8 = vpop.eup %4912 }
 0x280   : > { %4855 = vpush %v4913_v8 }
 0x283   : > { %v4915_v18 = vpop.eup %4914 }
 0x284   : > { %4857 = vpush %v4915_v18 }
 0x2b1   : > { %s4856_s22 = spop %4855 }
 0x2b2   : > { %s1058_s27 = smul.f32 %s4856_s22, %s5381_s21  ;;  %v1053_v26 = vstv %s4856_s22 }
 0x2b3   : > { %v1054_v49 = vmul.f32 %v1053_v26, %v813_v31 }
 0x2b4   : > { %v1059_v35 = vstv %s1058_s27 }
 0x2b5   : > { %s4858_s17 = spop %4857  ;;  %v1060_v46 = vmul.f32 %v1059_v35, %v813_v31 }
 0x2b6   : > { %v1055_v43 = vstv %s4858_s17  ;;  %s1062_s24 = smul.f32 %s4858_s17, %s5385_s26  ;;  %s4938_s26 = smov 4  }
 0x2b7   : > { %v1056_v45 = vmul.f32 %v1055_v43, %v814_v6  ;;  %v1061_v61 = vsub.f32 %v815_v34, %v1060_v46 }
 0x2b8   : > { %v1063_v39 = vstv %s1062_s24 }
 0x2b9   : > { %v1057_v40 = vadd.f32 %v1056_v45, %v1054_v49  ;;  %v1064_v47 = vmul.f32 %v1063_v39, %v814_v6 }
 0x2bb   : > { %v1065_v53 = vsub.f32 %v1061_v61, %v1064_v47  ;;  %v5408_v63 = vrot.slane %v1057_v40, %v5405_v56 }
 0x2bd   : > { %v5411_v7 = vrot.slane %v1065_v53, %v5405_v56  ;;  %v1072_v11 = vmul.f32 %v5408_v63, %v5153_v51  ;;  %v1076_v8 = vmul.f32 %v5408_v63, %v5177_v3  ;;  %v1073_v18 = vmul.f32 %v5408_v63, %v5159_v54 }
 0x2be   : > { %v1082_v25 = vmul.f32 %v5198_v30, %v5408_v63  ;;  %v1074_v35 = vmul.f32 %v5151_v50, %v5408_v63  ;;  %v1084_v6 = vmul.f32 %v5408_v63, %v5233_v13  ;;  %v1075_v54 = vmul.f32 %v5155_v52, %v5408_v63 }
 0x2bf   : > { %v1114_v31 = vadd.f32 %v5411_v7, %v1076_v8  ;;  %v1110_v26 = vadd.f32 %v5411_v7, %v1072_v11  ;;  %v1111_v49 = vadd.f32 %v5411_v7, %v1073_v18  ;;  %v1086_v50 = vmul.f32 %v5226_v2, %v5408_v63 }
 0x2c0   : > { %v1120_v3 = vadd.f32 %v5411_v7, %v1082_v25  ;;  %v1122_v13 = vadd.f32 %v5411_v7, %v1084_v6  ;;  %v1112_v45 = vadd.f32 %v5411_v7, %v1074_v35  ;;  %v1077_v34 = vmul.f32 %v5408_v63, %v5189_v19 }
 0x2c1   : > { %v1146_v51 = vmax.f32 %v1114_v31, 0.0  ;;  %v1142_v43 = vmax.f32 %v1110_v26, 0.0  ;;  %v1143_v46 = vmax.f32 %v1111_v49, 0.0  ;;  %v1088_v39 = vmul.f32 %v5408_v63, %v5261_v59 }
 0x2c2   : > { %v1152_v30 = vmax.f32 %v1120_v3, 0.0  ;;  %v1097_v52 = vmul.f32 %v5408_v63, %v5329_v0  ;;  %v1099_v2 = vmul.f32 %v5324_v55, %v5408_v63  ;;  %v1101_v40 = vmul.f32 %v5408_v63, %v5357_v17 }
 0x2c3   : > { %1219 = vrot.lane.b32.xlu0 %v1146_v51, %s4938_s26  ;;  %1211 = vrot.lane.b32.xlu1 %v1142_v43, %s4938_s26  ;;  %v1124_v47 = vadd.f32 %v5411_v7, %v1086_v50  ;;  %v1103_v19 = vmul.f32 %v5352_v62, %v5408_v63  ;;  %v1154_v61 = vmax.f32 %v1122_v13, 0.0  ;;  %v1144_v59 = vmax.f32 %v1112_v45, 0.0 }
 0x2c4   : > { %v1113_v53 = vadd.f32 %v5411_v7, %v1075_v54  ;;  %v1078_v11 = vmul.f32 %v5169_v60, %v5408_v63  ;;  %v1090_v0 = vmul.f32 %v5254_v44, %v5408_v63  ;;  %v5460_v17 = vadd.f32 %v5411_v7, %v1097_v52 }
 0x2c5   : > { %v1156_v55 = vmax.f32 %v1124_v47, 0.0  ;;  %v5463_v62 = vadd.f32 %v5411_v7, %v1099_v2  ;;  %v5466_v8 = vadd.f32 %v5411_v7, %v1101_v40  ;;  %v1126_v60 = vadd.f32 %v5411_v7, %v1088_v39 }
 0x2c6   : > { %v1145_v18 = vmax.f32 %v1113_v53, 0.0  ;;  %v1115_v25 = vadd.f32 %v5411_v7, %v1077_v34  ;;  %v5471_v44 = vadd.f32 %v5411_v7, %v1103_v19  ;;  %v1079_v31 = vmul.f32 %v5184_v12, %v5408_v63 }
 0x2c7   : > { %1231 = vrot.lane.b32.xlu0 %v1152_v30, %s4938_s26  ;;  %1213 = vrot.lane.b32.xlu1 %v1143_v46, %s4938_s26  ;;  %v1092_v26 = vmul.f32 %v5408_v63, %v5289_v42  ;;  %v4939_v35 = vmov 0.0   ;;  %v1158_v6 = vmax.f32 %v1126_v60, 0.0  ;;  %v1128_v43 = vadd.f32 %v5411_v7, %v1090_v0 }
 0x2c8   : > { %1176 = vst.msk [vmem:[#allocation2 + $0x8] sm:$0xff] %vm1174_vm3, %v4939_v35  ;;  %1175 = vst.msk [vmem:[#allocation2] sm:$0xff] %vm1174_vm3, %v4939_v35  ;;  %v1147_v51 = vmax.f32 %v1115_v25, 0.0  ;;  %v1116_v3 = vadd.f32 %v5411_v7, %v1078_v11  ;;  %v1080_v12 = vmul.f32 %v5408_v63, %v5205_v38  ;;  %v1094_v42 = vmul.f32 %v5282_v29, %v5408_v63 }
 0x2c9   : > { %1177 = vst.msk [vmem:[#allocation2 + $0x110] sm:$0xff] %vm1174_vm3, %v4939_v35  ;;  %1178 = vst.msk [vmem:[#allocation2 + $0x118] sm:$0xff] %vm1174_vm3, %v4939_v35  ;;  %v1160_v49 = vmax.f32 %v1128_v43, 0.0  ;;  %v1130_v50 = vadd.f32 %v5411_v7, %v1092_v26  ;;  %v1117_v30 = vadd.f32 %v5411_v7, %v1079_v31  ;;  %v1081_v46 = vmul.f32 %v5408_v63, %v5217_v58 }
 0x2ca   : > { %v1148_v54 = vmax.f32 %v1116_v3, 0.0  ;;  %v1096_v13 = vmul.f32 %v5408_v63, %v5317_v36  ;;  %v1132_v29 = vadd.f32 %v5411_v7, %v1094_v42  ;;  %v1118_v34 = vadd.f32 %v5411_v7, %v1080_v12 }
 0x2cb   : > { %1235 = vrot.lane.b32.xlu0 %v1154_v61, %s4938_s26  ;;  %1215 = vrot.lane.b32.xlu1 %v1144_v59, %s4938_s26  ;;  %v1162_v38 = vmax.f32 %v1130_v50, 0.0  ;;  %v1149_v45 = vmax.f32 %v1117_v30, 0.0  ;;  %v1083_v39 = vmul.f32 %v5212_v48, %v5408_v63  ;;  %v1098_v52 = vmul.f32 %v5310_v20, %v5408_v63 }
 0x2cc   : > { %v1164_v58 = vmax.f32 %v1132_v29, 0.0  ;;  %v1150_v2 = vmax.f32 %v1118_v34, 0.0  ;;  %v1134_v36 = vadd.f32 %v5411_v7, %v1096_v13  ;;  %v1119_v40 = vadd.f32 %v5411_v7, %v1081_v46 }
 0x2cd   : > { %v1085_v47 = vmul.f32 %v5408_v63, %v5245_v32  ;;  %v1100_v19 = vmul.f32 %v5408_v63, %v5345_v41  ;;  %v1136_v20 = vadd.f32 %v5411_v7, %v1098_v52  ;;  %v1121_v59 = vadd.f32 %v5411_v7, %v1083_v39 }
 0x2ce   : > { %v1166_v48 = vmax.f32 %v1134_v36, 0.0  ;;  %v1151_v61 = vmax.f32 %v1119_v40, 0.0  ;;  %v1087_v53 = vmul.f32 %v5240_v24, %v5408_v63  ;;  %v1102_v11 = vmul.f32 %v5338_v23, %v5408_v63 }
 0x2cf   : > { %1239 = vrot.lane.b32.xlu0 %v1156_v55, %s4938_s26  ;;  %1217 = vrot.lane.b32.xlu1 %v1145_v18, %s4938_s26  ;;  %v1168_v32 = vmax.f32 %v1136_v20, 0.0  ;;  %v1153_v0 = vmax.f32 %v1121_v59, 0.0  ;;  %v1138_v41 = vadd.f32 %v5411_v7, %v1100_v19  ;;  %v1123_v55 = vadd.f32 %v5411_v7, %v1085_v47 }
 0x2d0   : > { %v1089_v18 = vmul.f32 %v5408_v63, %v5273_v14  ;;  %v1140_v24 = vadd.f32 %v5411_v7, %v1102_v11  ;;  %v1125_v31 = vadd.f32 %v5411_v7, %v1087_v53  ;;  %v1091_v23 = vmul.f32 %v5268_v4, %v5408_v63 }
 0x2d1   : > { %v1170_v60 = vmax.f32 %v1138_v41, 0.0  ;;  %v1155_v25 = vmax.f32 %v1123_v55, 0.0  ;;  %v1093_v14 = vmul.f32 %v5408_v63, %v5301_v1  ;;  %v1095_v3 = vmul.f32 %v5296_v57, %v5408_v63 }
 0x2d2   : > { %v1172_v26 = vmax.f32 %v1140_v24, 0.0  ;;  %v1157_v35 = vmax.f32 %v1125_v31, 0.0  ;;  %v1129_v43 = vadd.f32 %v5411_v7, %v1091_v23  ;;  %v1167_v1 = vmax.f32 %v5460_v17, 0.0 }
 0x2d3   : > { %1243 = vrot.lane.b32.xlu0 %v1158_v6, %s4938_s26  ;;  %1221 = vrot.lane.b32.xlu1 %v1147_v51, %s4938_s26  ;;  %v1127_v6 = vadd.f32 %v5411_v7, %v1089_v18  ;;  %v1131_v12 = vadd.f32 %v5411_v7, %v1093_v14  ;;  %v1169_v50 = vmax.f32 %v5463_v62, 0.0  ;;  %v1171_v57 = vmax.f32 %v5466_v8, 0.0 }
 0x2d4   : > { %v1161_v4 = vmax.f32 %v1129_v43, 0.0  ;;  %v1173_v63 = vmax.f32 %v5471_v44, 0.0 }
 0x2d5   : > { %v1159_v51 = vmax.f32 %v1127_v6, 0.0  ;;  %v1163_v42 = vmax.f32 %v1131_v12, 0.0 }
 0x2d7   : > { %1247 = vrot.lane.b32.xlu0 %v1160_v49, %s4938_s26  ;;  %1223 = vrot.lane.b32.xlu1 %v1148_v54, %s4938_s26  ;;  %v1133_v49 = vadd.f32 %v5411_v7, %v1095_v3 }
 0x2d9   : > { %v1165_v54 = vmax.f32 %v1133_v49, 0.0 }
 0x2db   : > { %1251 = vrot.lane.b32.xlu0 %v1162_v38, %s4938_s26  ;;  %1225 = vrot.lane.b32.xlu1 %v1149_v45, %s4938_s26 }
 0x2df   : > { %1255 = vrot.lane.b32.xlu0 %v1164_v58, %s4938_s26  ;;  %1227 = vrot.lane.b32.xlu1 %v1150_v2, %s4938_s26 }
 0x2e3   : > { %1259 = vrot.lane.b32.xlu0 %v1166_v48, %s4938_s26  ;;  %1229 = vrot.lane.b32.xlu1 %v1151_v61, %s4938_s26 }
 0x2e7   : > { %1263 = vrot.lane.b32.xlu0 %v1168_v32, %s4938_s26  ;;  %1233 = vrot.lane.b32.xlu1 %v1153_v0, %s4938_s26 }
 0x2eb   : > { %1267 = vrot.lane.b32.xlu0 %v1170_v60, %s4938_s26  ;;  %1237 = vrot.lane.b32.xlu1 %v1155_v25, %s4938_s26 }
 0x2ef   : > { %1271 = vrot.lane.b32.xlu0 %v1172_v26, %s4938_s26  ;;  %1241 = vrot.lane.b32.xlu1 %v1157_v35, %s4938_s26 }
 0x2f3   : > { %1245 = vrot.lane.b32.xlu1 %v1159_v51, %s4938_s26 }
 0x2f7   : > { %1249 = vrot.lane.b32.xlu1 %v1161_v4, %s4938_s26 }
 0x2fb   : > { %1253 = vrot.lane.b32.xlu1 %v1163_v42, %s4938_s26 }
 0x2ff   : > { %1257 = vrot.lane.b32.xlu1 %v1165_v54, %s4938_s26 }
 0x303   : > { %1261 = vrot.lane.b32.xlu1 %v1167_v1, %s4938_s26 }
 0x307   : > { %1265 = vrot.lane.b32.xlu1 %v1169_v50, %s4938_s26 }
 0x30b   : > { %1269 = vrot.lane.b32.xlu1 %v1171_v57, %s4938_s26 }
 0x30f   : > { %1273 = vrot.lane.b32.xlu1 %v1173_v63, %s4938_s26 }
 0x335   : > { %v1220_v7 = vpop.permute.xlu0 %1219  ;;  %v1212_v30 = vpop.permute.xlu1 %1211 }
 0x336   : > { %1312 = vst.msk [vmem:[#allocation2 + $0x30] sm:$0xff] %vm1307_vm4, %v1220_v7  ;;  %1308 = vst.msk [vmem:[#allocation2 + $0x10] sm:$0xff] %vm1307_vm4, %v1212_v30 }
 0x339   : > { %v1232_v17 = vpop.permute.xlu0 %1231  ;;  %v1214_v46 = vpop.permute.xlu1 %1213 }
 0x33a   : > { %1318 = vst.msk [vmem:[#allocation2 + $0x60] sm:$0xff] %vm1307_vm4, %v1232_v17  ;;  %1309 = vst.msk [vmem:[#allocation2 + $0x18] sm:$0xff] %vm1307_vm4, %v1214_v46 }
 0x33d   : > { %v1236_v62 = vpop.permute.xlu0 %1235  ;;  %v1216_v8 = vpop.permute.xlu1 %1215 }
 0x33e   : > { %1320 = vst.msk [vmem:[#allocation2 + $0x70] sm:$0xff] %vm1307_vm4, %v1236_v62  ;;  %1310 = vst.msk [vmem:[#allocation2 + $0x20] sm:$0xff] %vm1307_vm4, %v1216_v8 }
 0x341   : > { %v1240_v44 = vpop.permute.xlu0 %1239  ;;  %v1218_v13 = vpop.permute.xlu1 %1217  ;;  %v1629_v38 = vld [vmem:[#allocation2 + $0x11] sm:$0xff] }
 0x342   : > { %v1598_v45 = vld [vmem:[#allocation2 + $0x17] sm:$0xff]  ;;  %1322 = vst.msk [vmem:[#allocation2 + $0x80] sm:$0xff] %vm1307_vm4, %v1240_v44  ;;  %1311 = vst.msk [vmem:[#allocation2 + $0x28] sm:$0xff] %vm1307_vm4, %v1218_v13  ;;  %1981 = vrot.lane.b32.xlu0 %v1629_v38, %s4938_s26  ;;  %v1343_v38 = vadd.s32 16, %v5398_v37 }
 0x343   : > { %1759 = vrot.lane.b32.xlu1 %v1598_v45, %s4940_s19  ;;  %v1377_v45 = vand.u32 15, %v5398_v37 }
 0x345   : > { %v1244_v29 = vpop.permute.xlu0 %1243  ;;  %v1222_v34 = vpop.permute.xlu1 %1221  ;;  %vm1661_vm5 = vcmp.ne.s32.totalorder %v1377_v45, 0  ;;  %v1353_v45 = vadd.s32 96, %v5398_v37 }
 0x346   : > { %1324 = vst.msk [vmem:[#allocation2 + $0x90] sm:$0xff] %vm1307_vm4, %v1244_v29  ;;  %1313 = vst.msk [vmem:[#allocation2 + $0x38] sm:$0xff] %vm1307_vm4, %v1222_v34  ;;  %v1342_v29 = vadd.s32 8, %v5398_v37  ;;  %v1345_v34 = vadd.s32 32, %v5398_v37 }
 0x349   : > { %v1248_v39 = vpop.permute.xlu0 %1247  ;;  %v1224_v52 = vpop.permute.xlu1 %1223  ;;  %v1631_v58 = vld [vmem:[#allocation2 + $0x21] sm:$0xff] }
 0x34a   : > { %v1600_v2 = vld [vmem:[#allocation2 + $0x27] sm:$0xff]  ;;  %1326 = vst.msk [vmem:[#allocation2 + $0xa0] sm:$0xff] %vm1307_vm4, %v1248_v39  ;;  %1314 = vst.msk [vmem:[#allocation2 + $0x40] sm:$0xff] %vm1307_vm4, %v1224_v52  ;;  %1985 = vrot.lane.b32.xlu0 %v1631_v58, %s4938_s26  ;;  %v1344_v39 = vadd.s32 24, %v5398_v37 }
 0x34b   : > { %1763 = vrot.lane.b32.xlu1 %v1600_v2, %s4940_s19  ;;  %v1391_v2 = vand.u32 15, %v1343_v38 }
 0x34d   : > { %v1252_v36 = vpop.permute.xlu0 %1251  ;;  %v1226_v40 = vpop.permute.xlu1 %1225  ;;  %v1633_v47 = vld [vmem:[#allocation2 + $0x31] sm:$0xff]  ;;  %vm5629_vm7 = vcmp.ne.s32.totalorder %v1391_v2, 0 }
 0x34e   : > { %v1602_v19 = vld [vmem:[#allocation2 + $0x37] sm:$0xff]  ;;  %1328 = vst.msk [vmem:[#allocation2 + $0xb0] sm:$0xff] %vm1307_vm4, %v1252_v36  ;;  %1315 = vst.msk [vmem:[#allocation2 + $0x48] sm:$0xff] %vm1307_vm4, %v1226_v40  ;;  %1989 = vrot.lane.b32.xlu0 %v1633_v47, %s4938_s26  ;;  %v1597_v36 = vld [vmem:[#allocation2 + $0xf] sm:$0xff]  ;;  %v1384_v40 = vand.u32 15, %v1342_v29  ;;  %v1352_v29 = vadd.s32 88, %v5398_v37 }
 0x34f   : > { %1767 = vrot.lane.b32.xlu1 %v1602_v19, %s4940_s19  ;;  %v4909_v47 = vld [vmem:[%s7252_s5] sm:$0x3f]   ;;  %v1405_v19 = vand.u32 15, %v1345_v34 }
 0x350   : > { %4843 = vmatprep.subr.msk.bf16.mxu0 %vm2219_vm6, %v4909_v47  ;;  %vm5636_vm8 = vcmp.ne.s32.totalorder %v1384_v40, 15  ;;  %v1454_v40 = vand.u32 15, %v1352_v29 }
 0x351   : > { %v1256_v48 = vpop.permute.xlu0 %1255  ;;  %v1228_v61 = vpop.permute.xlu1 %1227  ;;  %vm5644_vm9 = vcmp.ne.s32.totalorder %v1405_v19, 0 }
 0x352   : > { %1330 = vst.msk [vmem:[#allocation2 + $0xc0] sm:$0xff] %vm1307_vm4, %v1256_v48  ;;  %1316 = vst.msk [vmem:[#allocation2 + $0x50] sm:$0xff] %vm1307_vm4, %v1228_v61  ;;  %v1398_v48 = vand.u32 15, %v1344_v39  ;;  %v2393_v61 = vsel %vm2219_vm6, %v4909_v47, 0  ;;  %v1354_v47 = vadd.s32 104, %v5398_v37 }
 0x353   : > { %4706 = vmatpush3.bf16.msra.mxu0 %v2393_v61 }
 0x354   : > { %vm5648_vm10 = vcmp.ne.s32.totalorder %v1398_v48, 15 }
 0x355   : > { %v1260_v20 = vpop.permute.xlu0 %1259  ;;  %v1230_v59 = vpop.permute.xlu1 %1229  ;;  %v1635_v53 = vld [vmem:[#allocation2 + $0x41] sm:$0xff] }
 0x356   : > { %v1604_v11 = vld [vmem:[#allocation2 + $0x47] sm:$0xff]  ;;  %1332 = vst.msk [vmem:[#allocation2 + $0xd0] sm:$0xff] %vm1307_vm4, %v1260_v20  ;;  %1317 = vst.msk [vmem:[#allocation2 + $0x58] sm:$0xff] %vm1307_vm4, %v1230_v59  ;;  %1993 = vrot.lane.b32.xlu0 %v1635_v53, %s4938_s26  ;;  %v1693_v20 = vsel %vm1661_vm5, %v1597_v36, 0.0  ;;  %v1599_v53 = vld [vmem:[#allocation2 + $0x1f] sm:$0xff]  ;;  %v1461_v36 = vand.u32 15, %v1353_v45 }
 0x357   : > { %1771 = vrot.lane.b32.xlu1 %v1604_v11, %s4940_s19  ;;  %v1468_v11 = vand.u32 15, %v1354_v47 }
 0x358   : > { %vm1673_vm5 = vcmp.ne.s32.totalorder %v1461_v36, 0  ;;  %v1366_v36 = vadd.s32 200, %v5398_v37 }
 0x359   : > { %v1264_v32 = vpop.permute.xlu0 %1263  ;;  %v1234_v0 = vpop.permute.xlu1 %1233 }
 0x35a   : > { %1334 = vst.msk [vmem:[#allocation2 + $0xe0] sm:$0xff] %vm1307_vm4, %v1264_v32  ;;  %1319 = vst.msk [vmem:[#allocation2 + $0x68] sm:$0xff] %vm1307_vm4, %v1234_v0  ;;  %v1630_v32 = vld [vmem:[#allocation2 + $0x19] sm:$0xff]  ;;  %v1347_v0 = vadd.s32 48, %v5398_v37 }
 0x35d   : > { %v1268_v41 = vpop.permute.xlu0 %1267  ;;  %v1238_v55 = vpop.permute.xlu1 %1237  ;;  %v1637_v18 = vld [vmem:[#allocation2 + $0x51] sm:$0xff]  ;;  %v1638_v2 = vld [vmem:[#allocation2 + $0x59] sm:$0xff] }
 0x35e   : > { %v1606_v60 = vld [vmem:[#allocation2 + $0x57] sm:$0xff]  ;;  %1336 = vst.msk [vmem:[#allocation2 + $0xf0] sm:$0xff] %vm1307_vm4, %v1268_v41  ;;  %1321 = vst.msk [vmem:[#allocation2 + $0x78] sm:$0xff] %vm1307_vm4, %v1238_v55  ;;  %1997 = vrot.lane.b32.xlu0 %v1637_v18, %s4938_s26  ;;  %v1346_v55 = vadd.s32 40, %v5398_v37  ;;  %v4910_v18 = vld [vmem:[%s7252_s5 + $0x8] sm:$0x3f]  }
 0x35f   : > { %1775 = vrot.lane.b32.xlu1 %v1606_v60, %s4940_s19  ;;  %v2110_v60 = vld [vmem:[#allocation2] sm:$0xff]  ;;  %4842 = vmatprep.subr.msk.bf16.mxu1 %vm2219_vm6, %v4910_v18 }
 0x361   : > { %v1272_v25 = vpop.permute.xlu0 %1271  ;;  %v1242_v24 = vpop.permute.xlu1 %1241  ;;  %v1639_v31 = vld [vmem:[#allocation2 + $0x61] sm:$0xff] }
 0x362   : > { %v1608_v23 = vld [vmem:[#allocation2 + $0x67] sm:$0xff]  ;;  %1338 = vst.msk [vmem:[#allocation2 + $0x100] sm:$0xff] %vm1307_vm4, %v1272_v25  ;;  %1323 = vst.msk [vmem:[#allocation2 + $0x88] sm:$0xff] %vm1307_vm4, %v1242_v24  ;;  %2001 = vrot.lane.b32.xlu0 %v1639_v31, %s4938_s26  ;;  %v1358_v31 = vadd.s32 136, %v5398_v37 }
 0x363   : > { %1779 = vrot.lane.b32.xlu1 %v1608_v23, %s4940_s19  ;;  %v2111_v25 = vld [vmem:[#allocation2 + $0x8] sm:$0xff] }
 0x364   : > { %v2142_v24 = vpack.c.bf16 %v2111_v25, %v2110_v60 }
 0x365   : > { %v1246_v26 = vpop.permute.xlu1 %1245  ;;  %v1641_v35 = vld [vmem:[#allocation2 + $0x71] sm:$0xff]  ;;  %v1642_v60 = vld [vmem:[#allocation2 + $0x79] sm:$0xff] }
 0x366   : > { %v1610_v6 = vld [vmem:[#allocation2 + $0x77] sm:$0xff]  ;;  %1325 = vst.msk [vmem:[#allocation2 + $0x98] sm:$0xff] %vm1307_vm4, %v1246_v26  ;;  %2005 = vrot.lane.b32.xlu0 %v1641_v35, %s4938_s26  ;;  %v2221_v26 = vsel %vm2219_vm6, %v4910_v18, 0  ;;  %v1695_v35 = vsel %vm5629_vm7, %v1599_v53, 0.0  ;;  %4707 = vmatprep.mubr.msk.bf16.mxu0 %vm1174_vm3, %v2142_v24  ;;  %v1640_v53 = vld [vmem:[#allocation2 + $0x69] sm:$0xff]  ;;  %v1611_v18 = vld [vmem:[#allocation2 + $0x7f] sm:$0xff] }
 0x367   : > { %1783 = vrot.lane.b32.xlu1 %v1610_v6, %s4940_s19  ;;  %v1918_v6 = vsel %vm5636_vm8, %v1630_v32, 0.0  ;;  %4672 = vmatpush3.bf16.msra.mxu1 %v2221_v26  ;;  %v1356_v32 = vadd.s32 120, %v5398_v37  ;;  %vm1898_vm8 = vcmp.ne.s32.totalorder %v1468_v11, 15  ;;  %v1359_v24 = vadd.s32 144, %v5398_v37 }
 0x368   : > { %v1930_v26 = vsel %vm1898_vm8, %v1642_v60, 0.0  ;;  %v1368_v11 = vadd.s32 216, %v5398_v37 }
 0x369   : > { %v1250_v14 = vpop.permute.xlu1 %1249  ;;  %v1643_v51 = vld [vmem:[#allocation2 + $0x81] sm:$0xff]  ;;  %v1482_v25 = vand.u32 15, %v1356_v32 }
 0x36a   : > { %v1612_v43 = vld [vmem:[#allocation2 + $0x87] sm:$0xff]  ;;  %1327 = vst.msk [vmem:[#allocation2 + $0xa8] sm:$0xff] %vm1307_vm4, %v1250_v14  ;;  %2009 = vrot.lane.b32.xlu0 %v1643_v51, %s4938_s26  ;;  %v1419_v14 = vand.u32 15, %v1347_v0  ;;  %v1349_v51 = vadd.s32 64, %v5398_v37 }
 0x36b   : > { %1787 = vrot.lane.b32.xlu1 %v1612_v43, %s4940_s19  ;;  %v1601_v43 = vld [vmem:[#allocation2 + $0x2f] sm:$0xff] }
 0x36c   : > { %vm1667_vm11 = vcmp.ne.s32.totalorder %v1419_v14, 0  ;;  %v1644_v14 = vld [vmem:[#allocation2 + $0x89] sm:$0xff] }
 0x36d   : > { %v1254_v3 = vpop.permute.xlu1 %1253  ;;  %v1645_v4 = vld [vmem:[#allocation2 + $0x91] sm:$0xff] }
 0x36e   : > { %v1614_v12 = vld [vmem:[#allocation2 + $0x97] sm:$0xff]  ;;  %1329 = vst.msk [vmem:[#allocation2 + $0xb8] sm:$0xff] %vm1307_vm4, %v1254_v3  ;;  %2013 = vrot.lane.b32.xlu0 %v1645_v4, %s4938_s26  ;;  %v1632_v3 = vld [vmem:[#allocation2 + $0x29] sm:$0xff]  ;;  %v1412_v4 = vand.u32 15, %v1346_v55 }
 0x36f   : > { %1791 = vrot.lane.b32.xlu1 %v1614_v12, %s4940_s19  ;;  %v1348_v12 = vadd.s32 56, %v5398_v37 }
 0x370   : > { %vm1890_vm12 = vcmp.ne.s32.totalorder %v1412_v4, 15 }
 0x371   : > { %v1258_v42 = vpop.permute.xlu1 %1257  ;;  %v1647_v49 = vld [vmem:[#allocation2 + $0xa1] sm:$0xff] }
 0x372   : > { %v1616_v54 = vld [vmem:[#allocation2 + $0xa7] sm:$0xff]  ;;  %1331 = vst.msk [vmem:[#allocation2 + $0xc8] sm:$0xff] %vm1307_vm4, %v1258_v42  ;;  %2017 = vrot.lane.b32.xlu0 %v1647_v49, %s4938_s26  ;;  %v4911_v42 = vld [vmem:[%s7252_s5 + $0x10] sm:$0x3f]  }
 0x373   : > { %1795 = vrot.lane.b32.xlu1 %v1616_v54, %s4940_s19  ;;  %4844 = vmatprep.subr.msk.bf16.mxu1 %vm2219_vm6, %v4911_v42  ;;  %v5668_v49 = vsel %vm2219_vm6, %v4911_v42, 0  ;;  %v1697_v54 = vsel %vm5644_vm9, %v1601_v43, 0.0  ;;  %vm1896_vm6 = vcmp.ne.s32.totalorder %v1454_v40, 15  ;;  %v1496_v43 = vand.u32 15, %v1358_v31 }
 0x374   : > { %v1928_v41 = vsel %vm1896_vm6, %v1640_v53, 0.0  ;;  %v1552_v53 = vand.u32 15, %v1366_v36  ;;  %v1370_v31 = vadd.s32 232, %v5398_v37 }
 0x375   : > { %v1262_v1 = vpop.permute.xlu1 %1261  ;;  %v1649_v50 = vld [vmem:[#allocation2 + $0xb1] sm:$0xff] }
 0x376   : > { %v1618_v57 = vld [vmem:[#allocation2 + $0xb7] sm:$0xff]  ;;  %1333 = vst.msk [vmem:[#allocation2 + $0xd8] sm:$0xff] %vm1307_vm4, %v1262_v1  ;;  %2021 = vrot.lane.b32.xlu0 %v1649_v50, %s4938_s26  ;;  %v1920_v1 = vsel %vm5648_vm10, %v1632_v3, 0.0  ;;  %v1433_v50 = vand.u32 15, %v1349_v51  ;;  %vm1900_vm10 = vcmp.ne.s32.totalorder %v1482_v25, 15  ;;  %v1503_v51 = vand.u32 15, %v1359_v24 }
 0x377   : > { %1799 = vrot.lane.b32.xlu1 %v1618_v57, %s4940_s19  ;;  %v1351_v57 = vadd.s32 80, %v5398_v37  ;;  %v1360_v3 = vadd.s32 152, %v5398_v37  ;;  %vm1910_vm8 = vcmp.ne.s32.totalorder %v1552_v53, 15  ;;  %v1566_v25 = vand.u32 15, %v1368_v11 }
 0x378   : > { %vm1669_vm13 = vcmp.ne.s32.totalorder %v1433_v50, 0  ;;  %v1646_v50 = vld [vmem:[#allocation2 + $0x99] sm:$0xff]  ;;  %v1371_v24 = vadd.s32 240, %v5398_v37 }
 0x379   : > { %v1266_v63 = vpop.permute.xlu1 %1265  ;;  %v1651_v7 = vld [vmem:[#allocation2 + $0xc1] sm:$0xff] }
 0x37a   : > { %v1620_v30 = vld [vmem:[#allocation2 + $0xc7] sm:$0xff]  ;;  %1335 = vst.msk [vmem:[#allocation2 + $0xe8] sm:$0xff] %vm1307_vm4, %v1266_v63  ;;  %2025 = vrot.lane.b32.xlu0 %v1651_v7, %s4938_s26  ;;  %v1603_v63 = vld [vmem:[#allocation2 + $0x3f] sm:$0xff] }
 0x37b   : > { %1803 = vrot.lane.b32.xlu1 %v1620_v30, %s4940_s19  ;;  %v1634_v7 = vld [vmem:[#allocation2 + $0x39] sm:$0xff]  ;;  %v1426_v30 = vand.u32 15, %v1348_v12  ;;  %v1932_v12 = vsel %vm1900_vm10, %v1644_v14, 0.0  ;;  %vm1912_vm10 = vcmp.ne.s32.totalorder %v1566_v25, 15 }
 0x37d   : > { %v1270_v17 = vpop.permute.xlu1 %1269  ;;  %v1653_v46 = vld [vmem:[#allocation2 + $0xd1] sm:$0xff]  ;;  %vm1892_vm14 = vcmp.ne.s32.totalorder %v1426_v30, 15  ;;  %v1654_v60 = vld [vmem:[#allocation2 + $0xd9] sm:$0xff] }
 0x37e   : > { %v1622_v62 = vld [vmem:[#allocation2 + $0xd7] sm:$0xff]  ;;  %1337 = vst.msk [vmem:[#allocation2 + $0xf8] sm:$0xff] %vm1307_vm4, %v1270_v17  ;;  %2029 = vrot.lane.b32.xlu0 %v1653_v46, %s4938_s26  ;;  %v1350_v17 = vadd.s32 72, %v5398_v37  ;;  %v1699_v46 = vsel %vm1667_vm11, %v1603_v63, 0.0  ;;  %vm1679_vm11 = vcmp.ne.s32.totalorder %v1503_v51, 0  ;;  %v1362_v63 = vadd.s32 168, %v5398_v37 }
 0x37f   : > { %1807 = vrot.lane.b32.xlu1 %v1622_v62, %s4940_s19  ;;  %v1922_v62 = vsel %vm1890_vm12, %v1634_v7, 0.0  ;;  %vm1902_vm12 = vcmp.ne.s32.totalorder %v1496_v43, 15  ;;  %v1587_v43 = vand.u32 15, %v1371_v24 }
 0x380   : > { %v1440_v38 = vand.u32 15, %v1350_v17  ;;  %v1934_v30 = vsel %vm1902_vm12, %v1646_v50, 0.0 }
 0x381   : > { %v1274_v8 = vpop.permute.xlu1 %1273  ;;  %v1655_v44 = vld [vmem:[#allocation2 + $0xe1] sm:$0xff]  ;;  %v1625_v14 = vld [vmem:[#allocation2 + $0xef] sm:$0xff] }
 0x382   : > { %v1624_v13 = vld [vmem:[#allocation2 + $0xe7] sm:$0xff]  ;;  %1339 = vst.msk [vmem:[#allocation2 + $0x108] sm:$0xff] %vm1307_vm4, %v1274_v8  ;;  %2033 = vrot.lane.b32.xlu0 %v1655_v44, %s4938_s26  ;;  %v1447_v8 = vand.u32 15, %v1351_v57  ;;  %v1605_v44 = vld [vmem:[#allocation2 + $0x4f] sm:$0xff]  ;;  %vm1894_vm4 = vcmp.ne.s32.totalorder %v1440_v38, 15  ;;  %v1510_v57 = vand.u32 15, %v1360_v3 }
 0x383   : > { %1811 = vrot.lane.b32.xlu1 %v1624_v13, %s4940_s19  ;;  %v1636_v13 = vld [vmem:[#allocation2 + $0x49] sm:$0xff]  ;;  %v1701_v34 = vsel %vm1669_vm13, %v1605_v44, 0.0  ;;  %v1926_v48 = vsel %vm1894_vm4, %v1638_v2, 0.0  ;;  %v1365_v44 = vadd.s32 192, %v5398_v37  ;;  %v1580_v3 = vand.u32 15, %v1370_v31 }
 0x384   : > { %v1924_v39 = vsel %vm1892_vm14, %v1636_v13, 0.0  ;;  %vm1671_vm15 = vcmp.ne.s32.totalorder %v1447_v8, 0  ;;  %vm1904_vm14 = vcmp.ne.s32.totalorder %v1510_v57, 15  ;;  %v1524_v8 = vand.u32 15, %v1362_v63  ;;  %v1656_v51 = vld [vmem:[#allocation2 + $0xe9] sm:$0xff] }
 0x385   : > { %v1657_v52 = vld [vmem:[#allocation2 + $0xf1] sm:$0xff]  ;;  %v1364_v13 = vadd.s32 184, %v5398_v37  ;;  %v1627_v50 = vld [vmem:[#allocation2 + $0xff] sm:$0xff]  ;;  %vm1914_vm12 = vcmp.ne.s32.totalorder %v1580_v3, 15 }
 0x386   : > { %v1626_v58 = vld [vmem:[#allocation2 + $0xf7] sm:$0xff]  ;;  %2037 = vrot.lane.b32.xlu0 %v1657_v52, %s4938_s26  ;;  %v1355_v52 = vadd.s32 112, %v5398_v37  ;;  %vm1906_vm4 = vcmp.ne.s32.totalorder %v1524_v8, 15 }
 0x387   : > { %1815 = vrot.lane.b32.xlu1 %v1626_v58, %s4940_s19  ;;  %v1607_v58 = vld [vmem:[#allocation2 + $0x5f] sm:$0xff]  ;;  %v1538_v2 = vand.u32 15, %v1364_v13 }
 0x388   : > { %v1703_v19 = vsel %vm1671_vm15, %v1607_v58, 0.0  ;;  %v1475_v61 = vand.u32 15, %v1355_v52  ;;  %v1650_v52 = vld [vmem:[#allocation2 + $0xb9] sm:$0xff]  ;;  %v1545_v58 = vand.u32 15, %v1365_v44 }
 0x389   : > { %v1628_v59 = vld [vmem:[#allocation2 + $0x107] sm:$0xff]  ;;  %vm1908_vm6 = vcmp.ne.s32.totalorder %v1538_v2, 15  ;;  %v1658_v57 = vld [vmem:[#allocation2 + $0xf9] sm:$0xff] }
 0x38a   : > { %1757 = vrot.lane.b32.xlu0 %v1693_v20, %s4940_s19  ;;  %v1357_v20 = vadd.s32 128, %v5398_v37  ;;  %vm1675_vm7 = vcmp.ne.s32.totalorder %v1475_v61, 0  ;;  %v1369_v61 = vadd.s32 224, %v5398_v37 }
 0x38b   : > { %1819 = vrot.lane.b32.xlu1 %v1628_v59, %s4940_s19  ;;  %v1609_v59 = vld [vmem:[#allocation2 + $0x6f] sm:$0xff]  ;;  %v1707_v23 = vsel %vm1675_vm7, %v1611_v18, 0.0  ;;  %v1623_v18 = vld [vmem:[#allocation2 + $0xdf] sm:$0xff] }
 0x38c   : > { %v1705_v0 = vsel %vm1673_vm5, %v1609_v59, 0.0  ;;  %v1489_v55 = vand.u32 15, %v1357_v20  ;;  %v1621_v20 = vld [vmem:[#allocation2 + $0xcf] sm:$0xff]  ;;  %vm1685_vm5 = vcmp.ne.s32.totalorder %v1545_v58, 0 }
 0x38d   : > { %v1652_v59 = vld [vmem:[#allocation2 + $0xc9] sm:$0xff]  ;;  %v1717_v32 = vsel %vm1685_vm5, %v1621_v20, 0.0 }
 0x38e   : > { %1761 = vrot.lane.b32.xlu0 %v1695_v35, %s4940_s19  ;;  %vm1677_vm9 = vcmp.ne.s32.totalorder %v1489_v55, 0  ;;  %v1361_v35 = vadd.s32 160, %v5398_v37  ;;  %v1573_v55 = vand.u32 15, %v1369_v61 }
 0x38f   : > { %1983 = vrot.lane.b32.xlu1 %v1918_v6, %s4938_s26  ;;  %v1613_v6 = vld [vmem:[#allocation2 + $0x8f] sm:$0xff] }
 0x390   : > { %v1709_v4 = vsel %vm1677_vm9, %v1613_v6, 0.0  ;;  %v1517_v42 = vand.u32 15, %v1361_v35  ;;  %v1942_v35 = vsel %vm1910_vm8, %v1654_v60, 0.0  ;;  %vm1689_vm9 = vcmp.ne.s32.totalorder %v1573_v55, 0 }
 0x392   : > { %1765 = vrot.lane.b32.xlu0 %v1697_v54, %s4940_s19  ;;  %v1363_v54 = vadd.s32 176, %v5398_v37  ;;  %vm1681_vm13 = vcmp.ne.s32.totalorder %v1517_v42, 0  ;;  %v1721_v42 = vsel %vm1689_vm9, %v1625_v14, 0.0 }
 0x393   : > { %1987 = vrot.lane.b32.xlu1 %v1920_v1, %s4938_s26  ;;  %v1615_v1 = vld [vmem:[#allocation2 + $0x9f] sm:$0xff] }
 0x394   : > { %v1711_v7 = vsel %vm1679_vm11, %v1615_v1, 0.0  ;;  %v1531_v17 = vand.u32 15, %v1363_v54  ;;  %v1944_v54 = vsel %vm1912_vm10, %v1656_v51, 0.0  ;;  %vm1691_vm11 = vcmp.ne.s32.totalorder %v1587_v43, 0 }
 0x396   : > { %1769 = vrot.lane.b32.xlu0 %v1699_v46, %s4940_s19  ;;  %v1617_v46 = vld [vmem:[#allocation2 + $0xaf] sm:$0xff]  ;;  %vm5706_vm15 = vcmp.ne.s32.totalorder %v1531_v17, 0 }
 0x397   : > { %1991 = vrot.lane.b32.xlu1 %v1922_v62, %s4938_s26  ;;  %v1648_v62 = vld [vmem:[#allocation2 + $0xa9] sm:$0xff]  ;;  %v1713_v38 = vsel %vm1681_vm13, %v1617_v46, 0.0 }
 0x398   : > { %v1936_v45 = vsel %vm1904_vm14, %v1648_v62, 0.0  ;;  %v1659_v62 = vld [vmem:[#allocation2 + $0x101] sm:$0xff]  ;;  %vm2077_vm14 = vcmask 97344  }
 0x39a   : > { %1773 = vrot.lane.b32.xlu0 %v1701_v34, %s4940_s19  ;;  %v1367_v34 = vadd.s32 208, %v5398_v37 }
 0x39b   : > { %1995 = vrot.lane.b32.xlu1 %v1924_v39, %s4938_s26  ;;  %v1619_v39 = vld [vmem:[#allocation2 + $0xbf] sm:$0xff] }
 0x39c   : > { %v1715_v47 = vsel %vm5706_vm15, %v1619_v39, 0.0 }
 0x39e   : > { %1777 = vrot.lane.b32.xlu0 %v1703_v19, %s4940_s19  ;;  %v1938_v19 = vsel %vm1906_vm4, %v1650_v52, 0.0 }
 0x39f   : > { %1999 = vrot.lane.b32.xlu1 %v1926_v48, %s4938_s26  ;;  %v1559_v48 = vand.u32 15, %v1367_v34 }
 0x3a1   : > { %vm5721_vm7 = vcmp.ne.s32.totalorder %v1559_v48, 0 }
 0x3a2   : > { %1781 = vrot.lane.b32.xlu0 %v1705_v0, %s4940_s19  ;;  %v1940_v0 = vsel %vm1908_vm6, %v1652_v59, 0.0 }
 0x3a3   : > { %2003 = vrot.lane.b32.xlu1 %v1928_v41, %s4938_s26 }
 0x3a6   : > { %1785 = vrot.lane.b32.xlu0 %v1707_v23, %s4940_s19 }
 0x3a7   : > { %2007 = vrot.lane.b32.xlu1 %v1930_v26, %s4938_s26  ;;  %v1719_v26 = vsel %vm5721_vm7, %v1623_v18, 0.0 }
 0x3aa   : > { %1789 = vrot.lane.b32.xlu0 %v1709_v4, %s4940_s19  ;;  %v1372_v4 = vadd.s32 248, %v5398_v37  ;;  %v1660_v37 = vld [vmem:[#allocation2 + $0x109] sm:$0xff] }
 0x3ab   : > { %2011 = vrot.lane.b32.xlu1 %v1932_v12, %s4938_s26 }
 0x3ac   : > { %v1594_v63 = vand.u32 15, %v1372_v4 }
 0x3ae   : > { %1793 = vrot.lane.b32.xlu0 %v1711_v7, %s4940_s19  ;;  %v1723_v7 = vsel %vm1691_vm11, %v1627_v50, 0.0  ;;  %vm1916_vm13 = vcmp.ne.s32.totalorder %v1594_v63, 15 }
 0x3af   : > { %2015 = vrot.lane.b32.xlu1 %v1934_v30, %s4938_s26  ;;  %v1946_v30 = vsel %vm1914_vm12, %v1658_v57, 0.0  ;;  %v1948_v8 = vsel %vm1916_vm13, %v1660_v37, 0.0 }
 0x3b2   : > { %1797 = vrot.lane.b32.xlu0 %v1713_v38, %s4940_s19 }
 0x3b3   : > { %2019 = vrot.lane.b32.xlu1 %v1936_v45, %s4938_s26 }
 0x3b4   : > { %v5732_v6 = vpop.permute.xlu0 %1981 }
 0x3b5   : > { %v1760_v40 = vpop.permute.xlu1 %1759 }
 0x3b6   : > { %1854 = vst.msk [vmem:[#allocation2 + $0x18] sm:$0xff] %vm599_vm1, %v1760_v40  ;;  %1801 = vrot.lane.b32.xlu0 %v1715_v47, %s4940_s19 }
 0x3b7   : > { %2023 = vrot.lane.b32.xlu1 %v1938_v19, %s4938_s26 }
 0x3ba   : > { %1805 = vrot.lane.b32.xlu0 %v1717_v32, %s4940_s19 }
 0x3bb   : > { %2027 = vrot.lane.b32.xlu1 %v1940_v0, %s4938_s26 }
 0x3bc   : > { %v5738_v1 = vpop.permute.xlu0 %1985 }
 0x3bd   : > { %v1764_v23 = vpop.permute.xlu1 %1763 }
 0x3be   : > { %1856 = vst.msk [vmem:[#allocation2 + $0x28] sm:$0xff] %vm599_vm1, %v1764_v23  ;;  %1809 = vrot.lane.b32.xlu0 %v1719_v26, %s4940_s19 }
 0x3bf   : > { %2031 = vrot.lane.b32.xlu1 %v1942_v35, %s4938_s26 }
 0x3c0   : > { %v1990_v17 = vpop.permute.xlu0 %1989 }
 0x3c1   : > { %v1768_v12 = vpop.permute.xlu1 %1767 }
 0x3c2   : > { %1858 = vst.msk [vmem:[#allocation2 + $0x38] sm:$0xff] %vm599_vm1, %v1768_v12  ;;  %1813 = vrot.lane.b32.xlu0 %v1721_v42, %s4940_s19 }
 0x3c3   : > { %2035 = vrot.lane.b32.xlu1 %v1944_v54, %s4938_s26 }
 0x3c6   : > { %1817 = vrot.lane.b32.xlu0 %v1723_v7, %s4940_s19 }
 0x3c7   : > { %2039 = vrot.lane.b32.xlu1 %v1946_v30, %s4938_s26 }
 0x3c8   : > { %v1994_v44 = vpop.permute.xlu0 %1993 }
 0x3c9   : > { %v1772_v46 = vpop.permute.xlu1 %1771 }
 0x3ca   : > { %1860 = vst.msk [vmem:[#allocation2 + $0x48] sm:$0xff] %vm599_vm1, %v1772_v46  ;;  %2041 = vrot.lane.b32.xlu0 %v1659_v62, %s4938_s26 }
 0x3cb   : > { %2043 = vrot.lane.b32.xlu1 %v1948_v8, %s4938_s26 }
 0x3d0   : > { %v5747_v13 = vpop.permute.xlu0 %1997 }
 0x3d1   : > { %v1776_v38 = vpop.permute.xlu1 %1775 }
 0x3d2   : > { %1862 = vst.msk [vmem:[#allocation2 + $0x58] sm:$0xff] %vm599_vm1, %v1776_v38 }
 0x3d4   : > { %v5750_v45 = vpop.permute.xlu0 %2001 }
 0x3d5   : > { %v1780_v29 = vpop.permute.xlu1 %1779 }
 0x3d6   : > { %1864 = vst.msk [vmem:[#allocation2 + $0x68] sm:$0xff] %vm599_vm1, %v1780_v29 }
 0x3d8   : > { %v5753_v34 = vpop.permute.xlu0 %2005 }
 0x3d9   : > { %v1784_v39 = vpop.permute.xlu1 %1783 }
 0x3da   : > { %1866 = vst.msk [vmem:[#allocation2 + $0x78] sm:$0xff] %vm599_vm1, %v1784_v39 }
 0x3dc   : > { %v5756_v52 = vpop.permute.xlu0 %2009 }
 0x3dd   : > { %v1788_v58 = vpop.permute.xlu1 %1787 }
 0x3de   : > { %1868 = vst.msk [vmem:[#allocation2 + $0x88] sm:$0xff] %vm599_vm1, %v1788_v58 }
 0x3e0   : > { %v5759_v2 = vpop.permute.xlu0 %2013 }
 0x3e1   : > { %v1792_v36 = vpop.permute.xlu1 %1791 }
 0x3e2   : > { %1870 = vst.msk [vmem:[#allocation2 + $0x98] sm:$0xff] %vm599_vm1, %v1792_v36 }
 0x3e4   : > { %v5762_v40 = vpop.permute.xlu0 %2017 }
 0x3e5   : > { %v1796_v47 = vpop.permute.xlu1 %1795 }
 0x3e6   : > { %1872 = vst.msk [vmem:[#allocation2 + $0xa8] sm:$0xff] %vm599_vm1, %v1796_v47 }
 0x3e8   : > { %v5765_v19 = vpop.permute.xlu0 %2021 }
 0x3e9   : > { %v1800_v48 = vpop.permute.xlu1 %1799 }
 0x3ea   : > { %1874 = vst.msk [vmem:[#allocation2 + $0xb8] sm:$0xff] %vm599_vm1, %v1800_v48 }
 0x3ec   : > { %v5768_v61 = vpop.permute.xlu0 %2025 }
 0x3ed   : > { %v1804_v20 = vpop.permute.xlu1 %1803 }
 0x3ee   : > { %1876 = vst.msk [vmem:[#allocation2 + $0xc8] sm:$0xff] %vm599_vm1, %v1804_v20 }
 0x3f0   : > { %v5771_v59 = vpop.permute.xlu0 %2029 }
 0x3f1   : > { %v1808_v53 = vpop.permute.xlu1 %1807 }
 0x3f2   : > { %1878 = vst.msk [vmem:[#allocation2 + $0xd8] sm:$0xff] %vm599_vm1, %v1808_v53 }
 0x3f4   : > { %v5774_v11 = vpop.permute.xlu0 %2033 }
 0x3f5   : > { %v1812_v32 = vpop.permute.xlu1 %1811 }
 0x3f6   : > { %1880 = vst.msk [vmem:[#allocation2 + $0xe8] sm:$0xff] %vm599_vm1, %v1812_v32 }
 0x3f8   : > { %v5777_v0 = vpop.permute.xlu0 %2037 }
 0x3f9   : > { %v1816_v41 = vpop.permute.xlu1 %1815 }
 0x3fa   : > { %1882 = vst.msk [vmem:[#allocation2 + $0xf8] sm:$0xff] %vm599_vm1, %v1816_v41 }
 0x3fc   : > { %v1758_v55 = vpop.permute.xlu0 %1757 }
 0x3fd   : > { %v1820_v18 = vpop.permute.xlu1 %1819  ;;  %1853 = vst.msk [vmem:[#allocation2 + $0x10] sm:$0xff] %vm599_vm1, %v1758_v55 }
 0x3fe   : > { %1884 = vst.msk [vmem:[#allocation2 + $0x108] sm:$0xff] %vm599_vm1, %v1820_v18 }
 0x3ff   : > { %2078 = vst.msk [vmem:[#allocation2 + $0x10] sm:$0xff] %vm2077_vm14, %v5732_v6 }
 0x400   : > { %v1762_v60 = vpop.permute.xlu0 %1761 }
 0x401   : > { %v1984_v25 = vpop.permute.xlu1 %1983  ;;  %1855 = vst.msk [vmem:[#allocation2 + $0x20] sm:$0xff] %vm599_vm1, %v1762_v60 }
 0x402   : > { %2079 = vst.msk [vmem:[#allocation2 + $0x18] sm:$0xff] %vm2077_vm14, %v1984_v25  ;;  %2080 = vst.msk [vmem:[#allocation2 + $0x20] sm:$0xff] %vm2077_vm14, %v5738_v1 }
 0x404   : > { %v1766_v24 = vpop.permute.xlu0 %1765 }
 0x405   : > { %v1988_v31 = vpop.permute.xlu1 %1987  ;;  %1857 = vst.msk [vmem:[#allocation2 + $0x30] sm:$0xff] %vm599_vm1, %v1766_v24 }
 0x406   : > { %2081 = vst.msk [vmem:[#allocation2 + $0x28] sm:$0xff] %vm2077_vm14, %v1988_v31  ;;  %2082 = vst.msk [vmem:[#allocation2 + $0x30] sm:$0xff] %vm2077_vm14, %v1990_v17  ;;  %v2112_v35 = vld [vmem:[#allocation2 + $0x10] sm:$0xff] }
 0x408   : > { %v1770_v23 = vpop.permute.xlu0 %1769 }
 0x409   : > { %v1992_v26 = vpop.permute.xlu1 %1991  ;;  %v2113_v6 = vld [vmem:[#allocation2 + $0x18] sm:$0xff]  ;;  %1859 = vst.msk [vmem:[#allocation2 + $0x40] sm:$0xff] %vm599_vm1, %v1770_v23  ;;  %v2114_v3 = vld [vmem:[#allocation2 + $0x20] sm:$0xff] }
 0x40a   : > { %2083 = vst.msk [vmem:[#allocation2 + $0x38] sm:$0xff] %vm2077_vm14, %v1992_v26  ;;  %v2143_v14 = vpack.c.bf16 %v2113_v6, %v2112_v35  ;;  %2084 = vst.msk [vmem:[#allocation2 + $0x40] sm:$0xff] %vm2077_vm14, %v1994_v44 }
 0x40c   : > { %4673 = vmatprep.mubr.msk.bf16.mxu1 %vm1174_vm3, %v2143_v14  ;;  %4708 = vmatmul.mubr.msk.bf16.vlgmr.msra.gmra.mxu0 %vm1174_vm3, %v2143_v14  ;;  %v1774_v51 = vpop.permute.xlu0 %1773 }
 0x40d   : > { %v1996_v43 = vpop.permute.xlu1 %1995  ;;  %v2115_v4 = vld [vmem:[#allocation2 + $0x28] sm:$0xff]  ;;  %1861 = vst.msk [vmem:[#allocation2 + $0x50] sm:$0xff] %vm599_vm1, %v1774_v51  ;;  %v2116_v1 = vld [vmem:[#allocation2 + $0x30] sm:$0xff] }
 0x40e   : > { %2085 = vst.msk [vmem:[#allocation2 + $0x48] sm:$0xff] %vm2077_vm14, %v1996_v43  ;;  %v5798_v12 = vpack.c.bf16 %v2115_v4, %v2114_v3  ;;  %2086 = vst.msk [vmem:[#allocation2 + $0x50] sm:$0xff] %vm2077_vm14, %v5747_v13 }
 0x410   : > { %4674 = vmatmul.mubr.msk.bf16.vlgmr.msra.gmra.mxu1 %vm1174_vm3, %v5798_v12  ;;  %4711 = vmatprep.mubr.msk.bf16.mxu0 %vm1174_vm3, %v5798_v12  ;;  %v1778_v42 = vpop.permute.xlu0 %1777 }
 0x411   : > { %4740 = vmatpush3.bf16.msra.mxu1 %v5668_v49  ;;  %v2000_v54 = vpop.permute.xlu1 %1999  ;;  %v2117_v50 = vld [vmem:[#allocation2 + $0x38] sm:$0xff]  ;;  %1863 = vst.msk [vmem:[#allocation2 + $0x60] sm:$0xff] %vm599_vm1, %v1778_v42  ;;  %v2118_v7 = vld [vmem:[#allocation2 + $0x40] sm:$0xff] }
 0x412   : > { %2087 = vst.msk [vmem:[#allocation2 + $0x58] sm:$0xff] %vm2077_vm14, %v2000_v54  ;;  %v5809_v57 = vpack.c.bf16 %v2117_v50, %v2116_v1  ;;  %2088 = vst.msk [vmem:[#allocation2 + $0x60] sm:$0xff] %vm2077_vm14, %v5750_v45 }
 0x414   : > { %4677 = vmatprep.mubr.msk.bf16.mxu1 %vm1174_vm3, %v5809_v57  ;;  %4712 = vmatmul.mubr.msk.bf16.gmra.mxu0 %vm1174_vm3, %v5809_v57  ;;  %v1782_v49 = vpop.permute.xlu0 %1781 }
 0x415   : > { %v2004_v63 = vpop.permute.xlu1 %2003  ;;  %v2119_v30 = vld [vmem:[#allocation2 + $0x48] sm:$0xff]  ;;  %1865 = vst.msk [vmem:[#allocation2 + $0x70] sm:$0xff] %vm599_vm1, %v1782_v49  ;;  %v2120_v62 = vld [vmem:[#allocation2 + $0x50] sm:$0xff] }
 0x416   : > { %2089 = vst.msk [vmem:[#allocation2 + $0x68] sm:$0xff] %vm2077_vm14, %v2004_v63  ;;  %v5819_v37 = vpack.c.bf16 %v2119_v30, %v2118_v7  ;;  %2090 = vst.msk [vmem:[#allocation2 + $0x70] sm:$0xff] %vm2077_vm14, %v5753_v34 }
 0x418   : > { %4678 = vmatmul.mubr.msk.bf16.gmra.mxu1 %vm1174_vm3, %v5819_v37  ;;  %4715 = vmatprep.mubr.msk.bf16.mxu0 %vm1174_vm3, %v5819_v37  ;;  %v1786_v17 = vpop.permute.xlu0 %1785 }
 0x419   : > { %v2008_v46 = vpop.permute.xlu1 %2007  ;;  %v2121_v8 = vld [vmem:[#allocation2 + $0x58] sm:$0xff]  ;;  %1867 = vst.msk [vmem:[#allocation2 + $0x80] sm:$0xff] %vm599_vm1, %v1786_v17  ;;  %v2122_v45 = vld [vmem:[#allocation2 + $0x60] sm:$0xff] }
 0x41a   : > { %2091 = vst.msk [vmem:[#allocation2 + $0x78] sm:$0xff] %vm2077_vm14, %v2008_v46  ;;  %v5829_v44 = vpack.c.bf16 %v2121_v8, %v2120_v62  ;;  %2092 = vst.msk [vmem:[#allocation2 + $0x80] sm:$0xff] %vm2077_vm14, %v5756_v52 }
 0x41c   : > { %4681 = vmatprep.mubr.msk.bf16.mxu1 %vm1174_vm3, %v5829_v44  ;;  %4716 = vmatmul.mubr.msk.bf16.gmra.mxu0 %vm1174_vm3, %v5829_v44  ;;  %v1790_v13 = vpop.permute.xlu0 %1789 }
 0x41d   : > { %v2012_v38 = vpop.permute.xlu1 %2011  ;;  %v2123_v29 = vld [vmem:[#allocation2 + $0x68] sm:$0xff]  ;;  %1869 = vst.msk [vmem:[#allocation2 + $0x90] sm:$0xff] %vm599_vm1, %v1790_v13  ;;  %v2124_v58 = vld [vmem:[#allocation2 + $0x70] sm:$0xff] }
 0x41e   : > { %2093 = vst.msk [vmem:[#allocation2 + $0x88] sm:$0xff] %vm2077_vm14, %v2012_v38  ;;  %v5839_v34 = vpack.c.bf16 %v2123_v29, %v2122_v45  ;;  %2094 = vst.msk [vmem:[#allocation2 + $0x90] sm:$0xff] %vm2077_vm14, %v5759_v2 }
 0x420   : > { %4682 = vmatmul.mubr.msk.bf16.gmra.mxu1 %vm1174_vm3, %v5839_v34  ;;  %4719 = vmatprep.mubr.msk.bf16.mxu0 %vm1174_vm3, %v5839_v34  ;;  %v1794_v39 = vpop.permute.xlu0 %1793 }
 0x421   : > { %v2016_v52 = vpop.permute.xlu1 %2015  ;;  %v2125_v36 = vld [vmem:[#allocation2 + $0x78] sm:$0xff]  ;;  %1871 = vst.msk [vmem:[#allocation2 + $0xa0] sm:$0xff] %vm599_vm1, %v1794_v39  ;;  %v2126_v20 = vld [vmem:[#allocation2 + $0x80] sm:$0xff] }
 0x422   : > { %2095 = vst.msk [vmem:[#allocation2 + $0x98] sm:$0xff] %vm2077_vm14, %v2016_v52  ;;  %v5849_v47 = vpack.c.bf16 %v2125_v36, %v2124_v58  ;;  %2096 = vst.msk [vmem:[#allocation2 + $0xa0] sm:$0xff] %vm2077_vm14, %v5762_v40 }
 0x424   : > { %4685 = vmatprep.mubr.msk.bf16.mxu1 %vm1174_vm3, %v5849_v47  ;;  %4720 = vmatmul.mubr.msk.bf16.gmra.mxu0 %vm1174_vm3, %v5849_v47  ;;  %v1798_v2 = vpop.permute.xlu0 %1797 }
 0x425   : > { %v2020_v48 = vpop.permute.xlu1 %2019  ;;  %v2127_v53 = vld [vmem:[#allocation2 + $0x88] sm:$0xff]  ;;  %1873 = vst.msk [vmem:[#allocation2 + $0xb0] sm:$0xff] %vm599_vm1, %v1798_v2  ;;  %v2128_v55 = vld [vmem:[#allocation2 + $0x90] sm:$0xff] }
 0x426   : > { %2097 = vst.msk [vmem:[#allocation2 + $0xa8] sm:$0xff] %vm2077_vm14, %v2020_v48  ;;  %v5859_v32 = vpack.c.bf16 %v2127_v53, %v2126_v20  ;;  %2098 = vst.msk [vmem:[#allocation2 + $0xb0] sm:$0xff] %vm2077_vm14, %v5765_v19 }
 0x428   : > { %4686 = vmatmul.mubr.msk.bf16.gmra.mxu1 %vm1174_vm3, %v5859_v32  ;;  %4723 = vmatprep.mubr.msk.bf16.mxu0 %vm1174_vm3, %v5859_v32  ;;  %v1802_v40 = vpop.permute.xlu0 %1801 }
 0x429   : > { %v2024_v41 = vpop.permute.xlu1 %2023  ;;  %v2129_v18 = vld [vmem:[#allocation2 + $0x98] sm:$0xff]  ;;  %1875 = vst.msk [vmem:[#allocation2 + $0xc0] sm:$0xff] %vm599_vm1, %v1802_v40  ;;  %v2130_v24 = vld [vmem:[#allocation2 + $0xa0] sm:$0xff] }
 0x42a   : > { %2099 = vst.msk [vmem:[#allocation2 + $0xb8] sm:$0xff] %vm2077_vm14, %v2024_v41  ;;  %v5869_v60 = vpack.c.bf16 %v2129_v18, %v2128_v55  ;;  %2100 = vst.msk [vmem:[#allocation2 + $0xc0] sm:$0xff] %vm2077_vm14, %v5768_v61 }
 0x42c   : > { %4689 = vmatprep.mubr.msk.bf16.mxu1 %vm1174_vm3, %v5869_v60  ;;  %4724 = vmatmul.mubr.msk.bf16.gmra.mxu0 %vm1174_vm3, %v5869_v60  ;;  %v1806_v19 = vpop.permute.xlu0 %1805 }
 0x42d   : > { %v2028_v25 = vpop.permute.xlu1 %2027  ;;  %v2131_v31 = vld [vmem:[#allocation2 + $0xa8] sm:$0xff]  ;;  %1877 = vst.msk [vmem:[#allocation2 + $0xd0] sm:$0xff] %vm599_vm1, %v1806_v19  ;;  %v2132_v35 = vld [vmem:[#allocation2 + $0xb0] sm:$0xff] }
 0x42e   : > { %2101 = vst.msk [vmem:[#allocation2 + $0xc8] sm:$0xff] %vm2077_vm14, %v2028_v25  ;;  %v2152_v23 = vpack.c.bf16 %v2131_v31, %v2130_v24  ;;  %2102 = vst.msk [vmem:[#allocation2 + $0xd0] sm:$0xff] %vm2077_vm14, %v5771_v59 }
 0x430   : > { %4690 = vmatmul.mubr.msk.bf16.gmra.mxu1 %vm1174_vm3, %v2152_v23  ;;  %4727 = vmatprep.mubr.msk.bf16.mxu0 %vm1174_vm3, %v2152_v23  ;;  %v1810_v61 = vpop.permute.xlu0 %1809 }
 0x431   : > { %v2032_v26 = vpop.permute.xlu1 %2031  ;;  %v2133_v6 = vld [vmem:[#allocation2 + $0xb8] sm:$0xff]  ;;  %1879 = vst.msk [vmem:[#allocation2 + $0xe0] sm:$0xff] %vm599_vm1, %v1810_v61  ;;  %v2134_v43 = vld [vmem:[#allocation2 + $0xc0] sm:$0xff] }
 0x432   : > { %2103 = vst.msk [vmem:[#allocation2 + $0xd8] sm:$0xff] %vm2077_vm14, %v2032_v26  ;;  %v2153_v14 = vpack.c.bf16 %v2133_v6, %v2132_v35  ;;  %2104 = vst.msk [vmem:[#allocation2 + $0xe0] sm:$0xff] %vm2077_vm14, %v5774_v11 }
 0x434   : > { %4693 = vmatprep.mubr.msk.bf16.mxu1 %vm1174_vm3, %v2153_v14  ;;  %4728 = vmatmul.mubr.msk.bf16.gmra.mxu0 %vm1174_vm3, %v2153_v14  ;;  %v1814_v59 = vpop.permute.xlu0 %1813 }
 0x435   : > { %v2036_v51 = vpop.permute.xlu1 %2035  ;;  %v2135_v3 = vld [vmem:[#allocation2 + $0xc8] sm:$0xff]  ;;  %1881 = vst.msk [vmem:[#allocation2 + $0xf0] sm:$0xff] %vm599_vm1, %v1814_v59  ;;  %v2136_v54 = vld [vmem:[#allocation2 + $0xd0] sm:$0xff] }
 0x436   : > { %2105 = vst.msk [vmem:[#allocation2 + $0xe8] sm:$0xff] %vm2077_vm14, %v2036_v51  ;;  %v2154_v4 = vpack.c.bf16 %v2135_v3, %v2134_v43  ;;  %2106 = vst.msk [vmem:[#allocation2 + $0xf0] sm:$0xff] %vm2077_vm14, %v5777_v0 }
 0x438   : > { %4694 = vmatmul.mubr.msk.bf16.gmra.mxu1 %vm1174_vm3, %v2154_v4  ;;  %4731 = vmatprep.mubr.msk.bf16.mxu0 %vm1174_vm3, %v2154_v4  ;;  %v1818_v11 = vpop.permute.xlu0 %1817 }
 0x439   : > { %v2040_v42 = vpop.permute.xlu1 %2039  ;;  %v2137_v1 = vld [vmem:[#allocation2 + $0xd8] sm:$0xff]  ;;  %1883 = vst.msk [vmem:[#allocation2 + $0x100] sm:$0xff] %vm599_vm1, %v1818_v11  ;;  %v2138_v0 = vld [vmem:[#allocation2 + $0xe0] sm:$0xff] }
 0x43a   : > { %2107 = vst.msk [vmem:[#allocation2 + $0xf8] sm:$0xff] %vm2077_vm14, %v2040_v42  ;;  %v2155_v50 = vpack.c.bf16 %v2137_v1, %v2136_v54 }
 0x43c   : > { %4697 = vmatprep.mubr.msk.bf16.mxu1 %vm1174_vm3, %v2155_v50  ;;  %4732 = vmatmul.mubr.msk.bf16.gmra.mxu0 %vm1174_vm3, %v2155_v50  ;;  %v2042_v49 = vpop.permute.xlu0 %2041 }
 0x43d   : > { %v2044_v63 = vpop.permute.xlu1 %2043  ;;  %v2139_v7 = vld [vmem:[#allocation2 + $0xe8] sm:$0xff]  ;;  %2108 = vst.msk [vmem:[#allocation2 + $0x100] sm:$0xff] %vm2077_vm14, %v2042_v49  ;;  %v2140_v17 = vld [vmem:[#allocation2 + $0xf0] sm:$0xff] }
 0x43e   : > { %2109 = vst.msk [vmem:[#allocation2 + $0x108] sm:$0xff] %vm2077_vm14, %v2044_v63  ;;  %v2156_v30 = vpack.c.bf16 %v2139_v7, %v2138_v0 }
 0x440   : > { %4698 = vmatmul.mubr.msk.bf16.gmra.mxu1 %vm1174_vm3, %v2156_v30  ;;  %4735 = vmatprep.mubr.msk.bf16.mxu0 %vm1174_vm3, %v2156_v30 }
 0x441   : > { %v2141_v46 = vld [vmem:[#allocation2 + $0xf8] sm:$0xff] }
 0x442   : > { %v2157_v62 = vpack.c.bf16 %v2141_v46, %v2140_v17 }
 0x444   : > { %4701 = vmatprep.mubr.msk.bf16.mxu1 %vm1174_vm3, %v2157_v62  ;;  %4736 = vmatmul.mubr.msk.bf16.gmra.mxu0 %vm1174_vm3, %v2157_v62  ;;  %v2160_v8 = vld [vmem:[#allocation2 + $0x100] sm:$0xff] }
 0x445   : > { %v2161_v13 = vld [vmem:[#allocation2 + $0x108] sm:$0xff] }
 0x446   : > { %v2162_v38 = vpack.c.bf16 %v2161_v13, %v2160_v8 }
 0x448   : > { %4702 = vmatmul.mubr.msk.bf16.gmra.mxu1 %vm1174_vm3, %v2162_v38 }
 0x449   : > { %4741 = vmatprep.mubr.msk.bf16.mxu1 %vm1174_vm3, %v5798_v12  ;;  %v2586_v12 = vld [vmem:[#allocation2 + $0x110] sm:$0xff] }
 0x450   : > { %4742 = vmatmul.mubr.msk.bf16.vlgmr.msra.gmra.mxu1 %vm1174_vm3, %v5809_v57  ;;  %v2587_v57 = vld [vmem:[#allocation2 + $0x118] sm:$0xff] }
 0x451   : > { %4745 = vmatprep.mubr.msk.bf16.mxu1 %vm1174_vm3, %v5819_v37  ;;  %v2603_v37 = vpack.c.bf16 %v2587_v57, %v2586_v12 }
 0x458   : > { %4746 = vmatmul.mubr.msk.bf16.gmra.mxu1 %vm1174_vm3, %v5829_v44 }
 0x459   : > { %4749 = vmatprep.mubr.msk.bf16.mxu1 %vm1174_vm3, %v5839_v34 }
 0x460   : > { %4750 = vmatmul.mubr.msk.bf16.gmra.mxu1 %vm1174_vm3, %v5849_v47 }
 0x461   : > { %4753 = vmatprep.mubr.msk.bf16.mxu1 %vm1174_vm3, %v5859_v32 }
 0x468   : > { %4754 = vmatmul.mubr.msk.bf16.gmra.mxu1 %vm1174_vm3, %v5869_v60 }
 0x469   : > { %4757 = vmatprep.mubr.msk.bf16.mxu1 %vm1174_vm3, %v2152_v23 }
 0x470   : > { %4758 = vmatmul.mubr.msk.bf16.gmra.mxu1 %vm1174_vm3, %v2153_v14 }
 0x471   : > { %4761 = vmatprep.mubr.msk.bf16.mxu1 %vm1174_vm3, %v2154_v4 }
 0x478   : > { %4762 = vmatmul.mubr.msk.bf16.gmra.mxu1 %vm1174_vm3, %v2155_v50 }
 0x479   : > { %4765 = vmatprep.mubr.msk.bf16.mxu1 %vm1174_vm3, %v2156_v30 }
 0x480   : > { %4766 = vmatmul.mubr.msk.bf16.gmra.mxu1 %vm1174_vm3, %v2157_v62 }
 0x481   : > { %4769 = vmatprep.mubr.msk.bf16.mxu1 %vm1174_vm3, %v2162_v38 }
 0x488   : > { %4770 = vmatmul.mubr.msk.bf16.gmra.mxu1 %vm1174_vm3, %v2603_v37 }
 0x489   : > { %4809 = vmatprep.mubr.msk.bf16.mxu1 %vm599_vm1, %v5058_v5 }
 0x4cc   : > { %v4709_v44 = vpop.f32.mrf.mxu0 }
 0x4ce   : > { %v2429_v34 = vpop.f32.mrf.mxu0 }
 0x4d0   : > { %v4675_v45 = vpop.f32.mrf.mxu1  ;;  %v4710_v58 = vpop.f32.mrf.mxu0 }
 0x4d1   : > { %v2438_v57 = vadd.f32 %v4709_v44, %v4675_v45 }
 0x4d2   : > { %v2257_v29 = vpop.f32.mrf.mxu1  ;;  %v2432_v2 = vpop.f32.mrf.mxu0 }
 0x4d3   : > { %v2430_v38 = vadd.f32 %v2429_v34, %v2257_v29 }
 0x4d4   : > { %v4676_v39 = vpop.f32.mrf.mxu1  ;;  %v4713_v53 = vpop.f32.mrf.mxu0 }
 0x4d5   : > { %v2441_v28 = vadd.f32 %v4710_v58, %v4676_v39 }
 0x4d6   : > { %v2260_v52 = vpop.f32.mrf.mxu1  ;;  %v2445_v5 = vpop.f32.mrf.mxu0 }
 0x4d7   : > { %v2433_v27 = vadd.f32 %v2432_v2, %v2260_v52 }
 0x4d8   : > { %v5932_v36 = vpop.f32.mrf.mxu1  ;;  %v4714_v18 = vpop.f32.mrf.mxu0 }
 0x4d9   : > { %v2454_v2 = vadd.f32 %v4713_v53, %v5932_v36 }
 0x4da   : > { %v2273_v47 = vpop.f32.mrf.mxu1  ;;  %v2448_v25 = vpop.f32.mrf.mxu0 }
 0x4db   : > { %v2446_v44 = vadd.f32 %v2445_v5, %v2273_v47 }
 0x4dc   : > { %v5934_v48 = vpop.f32.mrf.mxu1  ;;  %v5954_v23 = vpop.f32.mrf.mxu0 }
 0x4de   : > { %v5936_v20 = vpop.f32.mrf.mxu1  ;;  %v5960_v35 = vpop.f32.mrf.mxu0 }
 0x4df   : > { %v2449_v36 = vadd.f32 %v2448_v25, %v5936_v20 }
 0x4e0   : > { %v5938_v32 = vpop.f32.mrf.mxu1  ;;  %v5966_v59 = vpop.f32.mrf.mxu0 }
 0x4e2   : > { %v5940_v40 = vpop.f32.mrf.mxu1  ;;  %v5972_v3 = vpop.f32.mrf.mxu0 }
 0x4e4   : > { %v5942_v41 = vpop.f32.mrf.mxu1  ;;  %v5978_v42 = vpop.f32.mrf.mxu0 }
 0x4e6   : > { %v5944_v55 = vpop.f32.mrf.mxu1  ;;  %v5984_v50 = vpop.f32.mrf.mxu0 }
 0x4e8   : > { %v5946_v60 = vpop.f32.mrf.mxu1  ;;  %v5990_v0 = vpop.f32.mrf.mxu0 }
 0x4ea   : > { %v5948_v19 = vpop.f32.mrf.mxu1  ;;  %v5996_v17 = vpop.f32.mrf.mxu0 }
 0x4ec   : > { %v5950_v24 = vpop.f32.mrf.mxu1  ;;  %v6002_v8 = vpop.f32.mrf.mxu0 }
 0x4ee   : > { %v5952_v31 = vpop.f32.mrf.mxu1  ;;  %v6004_v37 = vpop.f32.mrf.mxu0 }
 0x4f0   : > { %v5956_v61 = vpop.f32.mrf.mxu1  ;;  %v6010_v16 = vpop.f32.mrf.mxu0 }
 0x4f2   : > { %v5958_v26 = vpop.f32.mrf.mxu1 }
 0x4f4   : > { %v5962_v6 = vpop.f32.mrf.mxu1 }
 0x4f6   : > { %v5964_v14 = vpop.f32.mrf.mxu1 }
 0x4f8   : > { %v5968_v51 = vpop.f32.mrf.mxu1 }
 0x4fa   : > { %v5970_v43 = vpop.f32.mrf.mxu1 }
 0x4fc   : > { %v5974_v4 = vpop.f32.mrf.mxu1 }
 0x4fe   : > { %v5976_v11 = vpop.f32.mrf.mxu1 }
 0x500   : > { %v5980_v54 = vpop.f32.mrf.mxu1 }
 0x502   : > { %v5982_v1 = vpop.f32.mrf.mxu1 }
 0x504   : > { %v5986_v49 = vpop.f32.mrf.mxu1 }
 0x506   : > { %v5988_v63 = vpop.f32.mrf.mxu1 }
 0x508   : > { %v5992_v7 = vpop.f32.mrf.mxu1 }
 0x50a   : > { %v5994_v30 = vpop.f32.mrf.mxu1 }
 0x50c   : > { %v5998_v46 = vpop.f32.mrf.mxu1 }
 0x50e   : > { %v6000_v62 = vpop.f32.mrf.mxu1 }
 0x510   : > { %v4743_v13 = vpop.f32.mrf.mxu1 }
 0x511   : > { %v6008_v22 = vadd.f32 %v4743_v13, %v2438_v57 }
 0x512   : > { %v2697_v12 = vpop.f32.mrf.mxu1 }
 0x513   : > { %v6006_v56 = vadd.f32 %v2697_v12, %v2430_v38  ;;  %7347 = vst [vmem:[#allocation20_spill] sm:$0xff] %v6008_v22  ;;  %v2930_v34 = vmul.f32 %v6008_v22, %v6008_v22  ;;  %v2457_v12 = vadd.f32 %v4714_v18, %v5934_v48 }
 0x514   : > { %v4744_v33 = vpop.f32.mrf.mxu1 }
 0x515   : > { %7346 = vst [vmem:[#allocation19_spill] sm:$0xff] %v6006_v56  ;;  %v2928_v15 = vmul.f32 %v6006_v56, %v6006_v56  ;;  %v6014_v10 = vadd.f32 %v4744_v33, %v2441_v28  ;;  %v2859_v39 = vsel %vm599_vm1, %v6006_v56, 0.0  ;;  %v6029_v33 = vpop.f32.mrf.mxu0 }
 0x516   : > { %v2700_v21 = vpop.f32.mrf.mxu1 }
 0x517   : > { %v6016_v29 = vadd.f32 %v2700_v21, %v2433_v27  ;;  %v2862_v21 = vsel %vm599_vm1, %v6008_v22, 0.0  ;;  %v2960_v47 = vsel %vm599_vm1, %v2928_v15, 0.0  ;;  %v2931_v5 = vmul.f32 %v6014_v10, %v6014_v10  ;;  %v6046_v56 = vpop.f32.mrf.mxu0 }
 0x518   : > { %v4747_v45 = vpop.f32.mrf.mxu1 }
 0x519   : > { %7348 = vst [vmem:[#allocation21_spill] sm:$0xff] %v6016_v29  ;;  %v2860_v52 = vsel %vm599_vm1, %v6016_v29, 0.0  ;;  %v2929_v58 = vmul.f32 %v6016_v29, %v6016_v29  ;;  %v6042_v15 = vadd.f32 %v4747_v45, %v2454_v2  ;;  %v2965_v48 = vsel %vm599_vm1, %v2931_v5, 0.0 }
 0x51a   : > { %v2861_v27 = vadd.f32 %v2860_v52, %v2859_v39  ;;  %v2713_v28 = vpop.f32.mrf.mxu1  ;;  %v2963_v39 = vsel %vm599_vm1, %v2930_v34, 0.0  ;;  %v2864_v52 = vsel %vm599_vm1, %v6014_v10, 0.0  ;;  %v2462_v45 = vadd.f32 %v5960_v35, %v5940_v40  ;;  %v6066_v35 = vpop.f32.mrf.mxu0 }
 0x51b   : > { %v2961_v13 = vsel %vm599_vm1, %v2929_v58, 0.0  ;;  %v6035_v38 = vadd.f32 %v2713_v28, %v2446_v44 }
 0x51c   : > { %v2863_v53 = vadd.f32 %v2862_v21, %v2861_v27  ;;  %v2962_v57 = vadd.f32 %v2961_v13, %v2960_v47  ;;  %v4748_v22 = vpop.f32.mrf.mxu1  ;;  %v2934_v27 = vmul.f32 %v6042_v15, %v6042_v15  ;;  %v2470_v13 = vadd.f32 %v5954_v23, %v5938_v32 }
 0x51d   : > { %v2932_v29 = vmul.f32 %v6035_v38, %v6035_v38  ;;  %v2866_v20 = vsel %vm599_vm1, %v6035_v38, 0.0  ;;  %v6051_v18 = vadd.f32 %v4748_v22, %v2457_v12  ;;  %v2465_v32 = vadd.f32 %v5972_v3, %v5944_v55 }
 0x51e   : > { %v2964_v58 = vadd.f32 %v2963_v39, %v2962_v57  ;;  %v2865_v44 = vadd.f32 %v2864_v52, %v2863_v53  ;;  %v2716_v28 = vpop.f32.mrf.mxu1  ;;  %v2870_v53 = vsel %vm599_vm1, %v6042_v15, 0.0  ;;  %v2473_v52 = vadd.f32 %v5966_v59, %v5942_v41  ;;  %v6086_v41 = vpop.f32.mrf.mxu0 }
 0x51f   : > { %v6053_v25 = vadd.f32 %v2716_v28, %v2449_v36  ;;  %v2967_v47 = vsel %vm599_vm1, %v2932_v29, 0.0  ;;  %v2935_v29 = vmul.f32 %v6051_v18, %v6051_v18  ;;  %v2971_v28 = vsel %vm599_vm1, %v2934_v27, 0.0 }
 0x520   : > { %v2867_v34 = vadd.f32 %v2866_v20, %v2865_v44  ;;  %v2966_v2 = vadd.f32 %v2965_v48, %v2964_v58  ;;  %v4751_v21 = vpop.f32.mrf.mxu1  ;;  %v2872_v48 = vsel %vm599_vm1, %v6051_v18, 0.0 }
 0x521   : > { %v2868_v5 = vsel %vm599_vm1, %v6053_v25, 0.0  ;;  %v2933_v22 = vmul.f32 %v6053_v25, %v6053_v25  ;;  %v6082_v20 = vadd.f32 %v4751_v21, %v2470_v13  ;;  %v2973_v55 = vsel %vm599_vm1, %v2935_v29, 0.0 }
 0x522   : > { %v2968_v12 = vadd.f32 %v2967_v47, %v2966_v2  ;;  %v2869_v36 = vadd.f32 %v2868_v5, %v2867_v34  ;;  %v2729_v40 = vpop.f32.mrf.mxu1  ;;  %v2478_v21 = vadd.f32 %v5984_v50, %v5948_v19  ;;  %v2486_v29 = vadd.f32 %v5978_v42, %v5946_v60  ;;  %v6106_v50 = vpop.f32.mrf.mxu0 }
 0x523   : > { %v2969_v57 = vsel %vm599_vm1, %v2933_v22, 0.0  ;;  %v6073_v39 = vadd.f32 %v2729_v40, %v2462_v45  ;;  %v2481_v60 = vadd.f32 %v5996_v17, %v5952_v31 }
 0x524   : > { %v2871_v23 = vadd.f32 %v2870_v53, %v2869_v36  ;;  %v2970_v58 = vadd.f32 %v2969_v57, %v2968_v12  ;;  %v4752_v44 = vpop.f32.mrf.mxu1  ;;  %v2938_v12 = vmul.f32 %v6082_v20, %v6082_v20 }
 0x525   : > { %v2936_v45 = vmul.f32 %v6073_v39, %v6073_v39  ;;  %v2874_v59 = vsel %vm599_vm1, %v6073_v39, 0.0  ;;  %v6091_v3 = vadd.f32 %v4752_v44, %v2473_v52 }
 0x526   : > { %v2972_v34 = vadd.f32 %v2971_v28, %v2970_v58  ;;  %v2873_v2 = vadd.f32 %v2872_v48, %v2871_v23  ;;  %v2732_v47 = vpop.f32.mrf.mxu1  ;;  %v2489_v28 = vadd.f32 %v5990_v0, %v5950_v24  ;;  %v6126_v24 = vpop.f32.mrf.mxu0 }
 0x527   : > { %v6093_v27 = vadd.f32 %v2732_v47, %v2465_v32  ;;  %v2975_v36 = vsel %vm599_vm1, %v2936_v45, 0.0  ;;  %v2878_v32 = vsel %vm599_vm1, %v6082_v20, 0.0  ;;  %v2939_v23 = vmul.f32 %v6091_v3, %v6091_v3 }
 0x528   : > { %v2875_v5 = vadd.f32 %v2874_v59, %v2873_v2  ;;  %v2974_v22 = vadd.f32 %v2973_v55, %v2972_v34  ;;  %v4755_v13 = vpop.f32.mrf.mxu1  ;;  %v2979_v34 = vsel %vm599_vm1, %v2938_v12, 0.0  ;;  %v2880_v2 = vsel %vm599_vm1, %v6091_v3, 0.0 }
 0x529   : > { %v2876_v40 = vsel %vm599_vm1, %v6093_v27, 0.0  ;;  %v2937_v53 = vmul.f32 %v6093_v27, %v6093_v27  ;;  %v6122_v47 = vadd.f32 %v4755_v13, %v2486_v29  ;;  %v2981_v31 = vsel %vm599_vm1, %v2939_v23, 0.0 }
 0x52a   : > { %v2976_v57 = vadd.f32 %v2975_v36, %v2974_v22  ;;  %v2877_v52 = vadd.f32 %v2876_v40, %v2875_v5  ;;  %v2745_v19 = vpop.f32.mrf.mxu1  ;;  %v2494_v13 = vadd.f32 %v6004_v37, %v5958_v26  ;;  %v2525_v37 = vpop.f32.mrf.mxu0 }
 0x52b   : > { %v2977_v58 = vsel %vm599_vm1, %v2937_v53, 0.0  ;;  %v6113_v44 = vadd.f32 %v2745_v19, %v2478_v21  ;;  %v2942_v53 = vmul.f32 %v6122_v47, %v6122_v47  ;;  %v2502_v19 = vadd.f32 %v6002_v8, %v5956_v61 }
 0x52c   : > { %v2879_v42 = vadd.f32 %v2878_v32, %v2877_v52  ;;  %v2978_v48 = vadd.f32 %v2977_v58, %v2976_v57  ;;  %v4756_v45 = vpop.f32.mrf.mxu1  ;;  %v2886_v58 = vsel %vm599_vm1, %v6122_v47, 0.0  ;;  %v2497_v61 = vadd.f32 %v6029_v33, %v5964_v14 }
 0x52d   : > { %v2940_v55 = vmul.f32 %v6113_v44, %v6113_v44  ;;  %v2882_v0 = vsel %vm599_vm1, %v6113_v44, 0.0  ;;  %v6131_v17 = vadd.f32 %v4756_v45, %v2489_v28 }
 0x52e   : > { %v2980_v59 = vadd.f32 %v2979_v34, %v2978_v48  ;;  %v2881_v21 = vadd.f32 %v2880_v2, %v2879_v42  ;;  %v2748_v5 = vpop.f32.mrf.mxu1  ;;  %v2505_v48 = vadd.f32 %v6010_v16, %v5962_v6  ;;  %v2987_v2 = vsel %vm599_vm1, %v2942_v53, 0.0  ;;  %v4734_v16 = vpop.f32.mrf.mxu0 }
 0x52f   : > { %v6133_v22 = vadd.f32 %v2748_v5, %v2481_v60  ;;  %v2983_v29 = vsel %vm599_vm1, %v2940_v55, 0.0  ;;  %v2943_v28 = vmul.f32 %v6131_v17, %v6131_v17  ;;  %v2888_v55 = vsel %vm599_vm1, %v6131_v17, 0.0 }
 0x530   : > { %v2883_v12 = vadd.f32 %v2882_v0, %v2881_v21  ;;  %v2982_v36 = vadd.f32 %v2981_v31, %v2980_v59  ;;  %v4759_v40 = vpop.f32.mrf.mxu1 }
 0x531   : > { %v2884_v57 = vsel %vm599_vm1, %v6133_v22, 0.0  ;;  %v2941_v52 = vmul.f32 %v6133_v22, %v6133_v22  ;;  %v6160_v59 = vadd.f32 %v4759_v40, %v2502_v19  ;;  %v2989_v6 = vsel %vm599_vm1, %v2943_v28, 0.0 }
 0x532   : > { %v2984_v32 = vadd.f32 %v2983_v29, %v2982_v36  ;;  %v2885_v23 = vadd.f32 %v2884_v57, %v2883_v12  ;;  %v2761_v26 = vpop.f32.mrf.mxu1  ;;  %v2510_v12 = vadd.f32 %v6066_v35, %v5970_v43  ;;  %v2528_v35 = vpop.f32.mrf.mxu0 }
 0x533   : > { %v2985_v60 = vsel %vm599_vm1, %v2941_v52, 0.0  ;;  %v6151_v42 = vadd.f32 %v2761_v26, %v2494_v13  ;;  %v2946_v29 = vmul.f32 %v6160_v59, %v6160_v59 }
 0x534   : > { %v2887_v8 = vadd.f32 %v2886_v58, %v2885_v23  ;;  %v2986_v45 = vadd.f32 %v2985_v60, %v2984_v32  ;;  %v4760_v34 = vpop.f32.mrf.mxu1  ;;  %v2518_v32 = vadd.f32 %v6046_v56, %v5968_v51  ;;  %v2894_v58 = vsel %vm599_vm1, %v6160_v59, 0.0 }
 0x535   : > { %v2944_v21 = vmul.f32 %v6151_v42, %v6151_v42  ;;  %v2890_v14 = vsel %vm599_vm1, %v6151_v42, 0.0  ;;  %v6167_v33 = vadd.f32 %v4760_v34, %v2505_v48  ;;  %v2513_v56 = vadd.f32 %v6106_v50, %v5976_v11 }
 0x536   : > { %v2988_v5 = vadd.f32 %v2987_v2, %v2986_v45  ;;  %v2889_v31 = vadd.f32 %v2888_v55, %v2887_v8  ;;  %v2764_v0 = vpop.f32.mrf.mxu1  ;;  %v2995_v34 = vsel %vm599_vm1, %v2946_v29, 0.0 }
 0x537   : > { %v6169_v13 = vadd.f32 %v2764_v0, %v2497_v61  ;;  %v2991_v57 = vsel %vm599_vm1, %v2944_v21, 0.0  ;;  %v2947_v28 = vmul.f32 %v6167_v33, %v6167_v33  ;;  %v2521_v61 = vadd.f32 %v6086_v41, %v5974_v4  ;;  %v4737_v4 = vpop.f32.mrf.mxu0 }
 0x538   : > { %v2891_v36 = vadd.f32 %v2890_v14, %v2889_v31  ;;  %v2990_v40 = vadd.f32 %v2989_v6, %v2988_v5  ;;  %v4763_v53 = vpop.f32.mrf.mxu1  ;;  %v2896_v2 = vsel %vm599_vm1, %v6167_v33, 0.0  ;;  %v2526_v14 = vadd.f32 %v2525_v37, %v5982_v1 }
 0x539   : > { %v2892_v52 = vsel %vm599_vm1, %v6169_v13, 0.0  ;;  %v2945_v19 = vmul.f32 %v6169_v13, %v6169_v13  ;;  %v6196_v55 = vadd.f32 %v4763_v53, %v2518_v32  ;;  %v2997_v41 = vsel %vm599_vm1, %v2947_v28, 0.0  ;;  %v2541_v37 = vpop.f32.mrf.mxu0 }
 0x53a   : > { %v2992_v23 = vadd.f32 %v2991_v57, %v2990_v40  ;;  %v2893_v26 = vadd.f32 %v2892_v52, %v2891_v36  ;;  %v2777_v43 = vpop.f32.mrf.mxu1 }
 0x53b   : > { %v2993_v60 = vsel %vm599_vm1, %v2945_v19, 0.0  ;;  %v6187_v48 = vadd.f32 %v2777_v43, %v2510_v12  ;;  %v2950_v53 = vmul.f32 %v6196_v55, %v6196_v55  ;;  %v2534_v19 = vadd.f32 %v6126_v24, %v5980_v54 }
 0x53c   : > { %v2895_v51 = vadd.f32 %v2894_v58, %v2893_v26  ;;  %v2994_v8 = vadd.f32 %v2993_v60, %v2992_v23  ;;  %v4764_v45 = vpop.f32.mrf.mxu1  ;;  %v2902_v26 = vsel %vm599_vm1, %v6196_v55, 0.0  ;;  %v2537_v60 = vadd.f32 %v4734_v16, %v5986_v49 }
 0x53d   : > { %v2948_v21 = vmul.f32 %v6187_v48, %v6187_v48  ;;  %v2898_v11 = vsel %vm599_vm1, %v6187_v48, 0.0  ;;  %v6203_v50 = vadd.f32 %v4764_v45, %v2521_v61  ;;  %v2529_v61 = vadd.f32 %v2528_v35, %v5988_v63 }
 0x53e   : > { %v2996_v5 = vadd.f32 %v2995_v34, %v2994_v8  ;;  %v2897_v31 = vadd.f32 %v2896_v2, %v2895_v51  ;;  %v2780_v0 = vpop.f32.mrf.mxu1  ;;  %v3003_v51 = vsel %vm599_vm1, %v2950_v53, 0.0 }
 0x53f   : > { %v6205_v6 = vadd.f32 %v2780_v0, %v2513_v56  ;;  %v2999_v29 = vsel %vm599_vm1, %v2948_v21, 0.0  ;;  %v2951_v43 = vmul.f32 %v6203_v50, %v6203_v50  ;;  %v2904_v8 = vsel %vm599_vm1, %v6203_v50, 0.0 }
 0x540   : > { %v2899_v12 = vadd.f32 %v2898_v11, %v2897_v31  ;;  %v2998_v36 = vadd.f32 %v2997_v41, %v2996_v5  ;;  %v4767_v40 = vpop.f32.mrf.mxu1  ;;  %v4738_v31 = vpop.f32.mrf.mxu0  ;;  %v2542_v0 = vadd.f32 %v2541_v37, %v5994_v30 }
 0x541   : > { %v2900_v57 = vsel %vm599_vm1, %v6205_v6, 0.0  ;;  %v2949_v52 = vmul.f32 %v6205_v6, %v6205_v6  ;;  %v6229_v45 = vadd.f32 %v4767_v40, %v2534_v19  ;;  %v3005_v49 = vsel %vm599_vm1, %v2951_v43, 0.0 }
 0x542   : > { %v3000_v32 = vadd.f32 %v2999_v29, %v2998_v36  ;;  %v2901_v23 = vadd.f32 %v2900_v57, %v2899_v12  ;;  %v2793_v1 = vpop.f32.mrf.mxu1  ;;  %v2550_v29 = vadd.f32 %v4737_v4, %v5992_v7  ;;  %v2544_v30 = vpop.f32.mrf.mxu0 }
 0x543   : > { %v3001_v58 = vsel %vm599_vm1, %v2949_v52, 0.0  ;;  %v6222_v28 = vadd.f32 %v2793_v1, %v2526_v14  ;;  %v2954_v12 = vmul.f32 %v6229_v45, %v6229_v45  ;;  %v2545_v43 = vadd.f32 %v2544_v30, %v6000_v62 }
 0x544   : > { %v2903_v56 = vadd.f32 %v2902_v26, %v2901_v23  ;;  %v3002_v54 = vadd.f32 %v3001_v58, %v3000_v32  ;;  %v4768_v24 = vpop.f32.mrf.mxu1  ;;  %v2910_v32 = vsel %vm599_vm1, %v6229_v45, 0.0  ;;  %v2553_v26 = vadd.f32 %v4738_v31, %v5998_v46 }
 0x545   : > { %v2952_v34 = vmul.f32 %v6222_v28, %v6222_v28  ;;  %v2906_v63 = vsel %vm599_vm1, %v6222_v28, 0.0  ;;  %v6236_v16 = vadd.f32 %v4768_v24, %v2537_v60  ;;  %v3011_v60 = vsel %vm599_vm1, %v2954_v12, 0.0 }
 0x546   : > { %v3004_v2 = vadd.f32 %v3003_v51, %v3002_v54  ;;  %v2905_v21 = vadd.f32 %v2904_v8, %v2903_v56  ;;  %v2796_v5 = vpop.f32.mrf.mxu1 }
 0x547   : > { %v6238_v35 = vadd.f32 %v2796_v5, %v2529_v61  ;;  %v3007_v36 = vsel %vm599_vm1, %v2952_v34, 0.0  ;;  %v2955_v23 = vmul.f32 %v6236_v16, %v6236_v16  ;;  %v2912_v61 = vsel %vm599_vm1, %v6236_v16, 0.0 }
 0x548   : > { %v2907_v41 = vadd.f32 %v2906_v63, %v2905_v21  ;;  %v3006_v11 = vadd.f32 %v3005_v49, %v3004_v2  ;;  %v4771_v14 = vpop.f32.mrf.mxu1 }
 0x549   : > { %v2908_v40 = vsel %vm599_vm1, %v6238_v35, 0.0  ;;  %v2953_v53 = vmul.f32 %v6238_v35, %v6238_v35  ;;  %v6261_v56 = vadd.f32 %v4771_v14, %v2550_v29  ;;  %v3013_v46 = vsel %vm599_vm1, %v2955_v23, 0.0 }
 0x54a   : > { %v3008_v57 = vadd.f32 %v3007_v36, %v3006_v11  ;;  %v2909_v52 = vadd.f32 %v2908_v40, %v2907_v41  ;;  %v2809_v19 = vpop.f32.mrf.mxu1 }
 0x54b   : > { %v3009_v1 = vsel %vm599_vm1, %v2953_v53, 0.0  ;;  %v6254_v37 = vadd.f32 %v2809_v19, %v2542_v0  ;;  %v2958_v31 = vmul.f32 %v6261_v56, %v6261_v56  ;;  %v2918_v14 = vsel %vm599_vm1, %v6261_v56, 0.0 }
 0x54c   : > { %v2911_v58 = vadd.f32 %v2910_v32, %v2909_v52  ;;  %v3010_v7 = vadd.f32 %v3009_v1, %v3008_v57  ;;  %v4772_v4 = vpop.f32.mrf.mxu1 }
 0x54d   : > { %v2956_v54 = vmul.f32 %v6254_v37, %v6254_v37  ;;  %v2914_v62 = vsel %vm599_vm1, %v6254_v37, 0.0  ;;  %v6268_v34 = vadd.f32 %v4772_v4, %v2553_v26  ;;  %v3019_v29 = vsel %vm599_vm1, %v2958_v31, 0.0 }
 0x54e   : > { %v3012_v24 = vadd.f32 %v3011_v60, %v3010_v7  ;;  %v2913_v51 = vadd.f32 %v2912_v61, %v2911_v58  ;;  %v2812_v8 = vpop.f32.mrf.mxu1 }
 0x54f   : > { %v6270_v2 = vadd.f32 %v2812_v8, %v2545_v43  ;;  %v3015_v49 = vsel %vm599_vm1, %v2956_v54, 0.0  ;;  %v2959_v12 = vmul.f32 %v6268_v34, %v6268_v34  ;;  %v2920_v57 = vsel %vm599_vm1, %v6268_v34, 0.0 }
 0x550   : > { %v2915_v21 = vadd.f32 %v2914_v62, %v2913_v51  ;;  %v3014_v5 = vadd.f32 %v3013_v46, %v3012_v24 }
 0x551   : > { %v2916_v63 = vsel %vm599_vm1, %v6270_v2, 0.0  ;;  %v2957_v0 = vmul.f32 %v6270_v2, %v6270_v2  ;;  %v3021_v30 = vsel %vm599_vm1, %v2959_v12, 0.0 }
 0x552   : > { %v3016_v41 = vadd.f32 %v3015_v49, %v3014_v5  ;;  %v2917_v11 = vadd.f32 %v2916_v63, %v2915_v21 }
 0x553   : > { %v3017_v36 = vsel %vm599_vm1, %v2957_v0, 0.0 }
 0x554   : > { %v2919_v40 = vadd.f32 %v2918_v14, %v2917_v11  ;;  %v3018_v53 = vadd.f32 %v3017_v36, %v3016_v41  ;;  %v3232_v36 = vld [vmem:[%s7256_s9] sm:$0x3] }
 0x555   : > { %4845 = vmatprep.subr.msk.bf16.mxu0 %vm648_vm0, %v3232_v36 }
 0x556   : > { %v3020_v52 = vadd.f32 %v3019_v29, %v3018_v53  ;;  %v2921_v19 = vadd.f32 %v2920_v57, %v2919_v40  ;;  %v3282_v40 = vsel %vm648_vm0, %v3232_v36, 0  ;;  %v7355_v36 = vld [vmem:[#allocation9_spill] sm:$0xff] }
 0x557   : > { %4774 = vmatpush3.bf16.msra.mxu0 %v3282_v40  ;;  %v7356_v40 = vld [vmem:[#allocation10_spill] sm:$0xff] }
 0x558   : > { %v3022_v32 = vadd.f32 %v3021_v30, %v3020_v52  ;;  %v2922_v23 = vrot.slane %v2921_v19, 4 }
 0x55a   : > { %v2923_v1 = vadd.f32 %v2922_v23, %v2921_v19  ;;  %v3023_v26 = vrot.slane %v3022_v32, 4 }
 0x55c   : > { %v2924_v43 = vrot.slane %v2923_v1, 2  ;;  %v3024_v58 = vadd.f32 %v3023_v26, %v3022_v32 }
 0x55e   : > { %v2925_v7 = vadd.f32 %v2924_v43, %v2923_v1  ;;  %v3025_v4 = vrot.slane %v3024_v58, 2 }
 0x560   : > { %v2926_v60 = vrot.slane %v2925_v7, 1  ;;  %v3026_v61 = vadd.f32 %v3025_v4, %v3024_v58 }
 0x562   : > { %v2927_v54 = vadd.f32 %v2926_v60, %v2925_v7  ;;  %v3027_v24 = vrot.slane %v3026_v61, 1 }
 0x564   : > { %3041 = vrot.lane.b32.xlu0 %v2927_v54, %s7349_s1  ;;  %v3028_v51 = vadd.f32 %v3027_v24, %v3026_v61  ;;  %v3029_v8 = vsel %vm986_vm2, %v2927_v54, 0.0 }
 0x566   : > { %3070 = vrot.lane.b32.xlu1 %v3028_v51, %s7349_s1  ;;  %v3055_v46 = vsel %vm986_vm2, %v3028_v51, 0.0 }
 0x583   : > { %3030 = vadd.xlane.f32.xlu0 %v3029_v8 }
 0x587   : > { %3056 = vadd.xlane.f32.xlu0 %v3055_v46 }
 0x5d6   : > { %v3042_v62 = vpop.permute.xlu0 %3041 }
 0x5d7   : > { %v3044_v21 = vsel %vm986_vm2, %v3042_v62, 0.0 }
 0x5d8   : > { %v3071_v5 = vpop.permute.xlu1 %3070  ;;  %3045 = vadd.xlane.f32.xlu1 %v3044_v21 }
 0x5d9   : > { %v3073_v31 = vsel %vm986_vm2, %v3071_v5, 0.0 }
 0x5da   : > { %3074 = vadd.xlane.f32.xlu0 %v3073_v31 }
 0x60c   : > { %v3031_v49 = vpop.xlane.xlu0 %3030 }
 0x60d   : > { %v3032_v63 = vrot.slane %v3031_v49, 4 }
 0x60f   : > { %v3033_v0 = vadd.f32 %v3032_v63, %v3031_v49  ;;  %v3775_v49 = vld [vmem:[%s7260_s13] sm:$0x3] }
 0x610   : > { %v3057_v53 = vpop.xlane.xlu0 %3056  ;;  %4846 = vmatprep.subr.msk.bf16.mxu1 %vm648_vm0, %v3775_v49  ;;  %v3777_v63 = vsel %vm648_vm0, %v3775_v49, 0  ;;  %vm3448_vm0 = vcmask 130048  }
 0x611   : > { %v3034_v41 = vrot.slane %v3033_v0, 2  ;;  %v3058_v29 = vrot.slane %v3057_v53, 4  ;;  %4808 = vmatpush3.bf16.msra.mxu1 %v3777_v63  ;;  %v7366_v63 = vld [vmem:[#allocation20_spill] sm:$0xff] }
 0x613   : > { %v3035_v11 = vadd.f32 %v3034_v41, %v3033_v0  ;;  %v3059_v57 = vadd.f32 %v3058_v29, %v3057_v53  ;;  %v7350_v0 = vld [vmem:[#allocation4_spill] sm:$0xff]  ;;  %v7351_v41 = vld [vmem:[#allocation5_spill] sm:$0xff] }
 0x614   : > { %4810 = vmatmul.mubr.msk.bf16.vlgmr.msra.gmra.mxu1 %vm599_vm1, %v5063_v9  ;;  %v7357_v9 = vld [vmem:[#allocation11_spill] sm:$0xff]  ;;  %v7358_v53 = vld [vmem:[#allocation12_spill] sm:$0xff] }
 0x615   : > { %v3036_v14 = vrot.slane %v3035_v11, 1  ;;  %v3060_v52 = vrot.slane %v3059_v57, 2  ;;  %4813 = vmatprep.mubr.msk.bf16.mxu1 %vm599_vm1, %v7350_v0 }
 0x617   : > { %v3037_v12 = vadd.f32 %v3036_v14, %v3035_v11  ;;  %v3061_v26 = vadd.f32 %v3060_v52, %v3059_v57  ;;  %v7352_v11 = vld [vmem:[#allocation6_spill] sm:$0xff]  ;;  %v7353_v14 = vld [vmem:[#allocation7_spill] sm:$0xff]  ;;  %v2857_v57 = vld [vmem:[%s7254_s7] sm:$0x1] }
 0x619   : > { %4859 = vpush %v3037_v12  ;;  %v3062_v60 = vrot.slane %v3061_v26, 1  ;;  %v7354_v12 = vld [vmem:[#allocation8_spill] sm:$0xff] }
 0x61b   : > { %v3063_v8 = vadd.f32 %v3062_v60, %v3061_v26 }
 0x61c   : > { %4814 = vmatmul.mubr.msk.bf16.gmra.mxu1 %vm599_vm1, %v7351_v41 }
 0x61d   : > { %4817 = vmatprep.mubr.msk.bf16.mxu1 %vm599_vm1, %v7352_v11 }
 0x624   : > { %4818 = vmatmul.mubr.msk.bf16.gmra.mxu1 %vm599_vm1, %v7353_v14 }
 0x625   : > { %4821 = vmatprep.mubr.msk.bf16.mxu1 %vm599_vm1, %v7354_v12 }
 0x62c   : > { %4822 = vmatmul.mubr.msk.bf16.gmra.mxu1 %vm599_vm1, %v7355_v36 }
 0x62d   : > { %4825 = vmatprep.mubr.msk.bf16.mxu1 %vm599_vm1, %v7356_v40 }
 0x634   : > { %4826 = vmatmul.mubr.msk.bf16.gmra.mxu1 %vm599_vm1, %v7357_v9 }
 0x635   : > { %4829 = vmatprep.mubr.msk.bf16.mxu1 %vm599_vm1, %v7358_v53  ;;  %v7367_v53 = vld [vmem:[#allocation17_spill] sm:$0xff] }
 0x64a   : > { %s4860_s24 = spop %4859 }
 0x64b   : > { %s6299_s18 = smul.f32 0.001953125, %s4860_s24 }
 0x64d   : > { %s3066_s21 = smul.f32 %s6299_s18, %s6299_s18 }
 0x661   : > { %v3046_v19 = vpop.xlane.xlu1 %3045 }
 0x662   : > { %v3047_v30 = vrot.slane %v3046_v19, 4 }
 0x663   : > { %v3075_v32 = vpop.xlane.xlu0 %3074 }
 0x664   : > { %v3048_v23 = vadd.f32 %v3047_v30, %v3046_v19  ;;  %v3076_v1 = vrot.slane %v3075_v32, 4  ;;  %v2856_v19 = vld [vmem:[%s7253_s6] sm:$0x1] }
 0x666   : > { %v3049_v43 = vrot.slane %v3048_v23, 2  ;;  %v3077_v58 = vadd.f32 %v3076_v1, %v3075_v32 }
 0x668   : > { %v3078_v7 = vrot.slane %v3077_v58, 2  ;;  %v3050_v4 = vadd.f32 %v3049_v43, %v3048_v23  ;;  %v2858_v23 = vld [vmem:[%s7255_s8] sm:$0x1]  ;;  %v7359_v43 = vld [vmem:[#allocation13_spill] sm:$0xff] }
 0x669   : > { %4830 = vmatmul.mubr.msk.bf16.gmra.mxu1 %vm599_vm1, %v7359_v43 }
 0x66a   : > { %v3051_v61 = vrot.slane %v3050_v4, 1  ;;  %v3079_v54 = vadd.f32 %v3078_v7, %v3077_v58  ;;  %v7360_v58 = vld [vmem:[#allocation14_spill] sm:$0xff] }
 0x66b   : > { %4833 = vmatprep.mubr.msk.bf16.mxu1 %vm599_vm1, %v7360_v58 }
 0x66c   : > { %v3052_v24 = vadd.f32 %v3051_v61, %v3050_v4  ;;  %v3080_v51 = vrot.slane %v3079_v54, 1 }
 0x66e   : > { %4861 = vpush %v3052_v24  ;;  %v3081_v46 = vadd.f32 %v3080_v51, %v3079_v54  ;;  %v7361_v24 = vld [vmem:[#allocation18_spill] sm:$0xff] }
 0x66f   : > { %4863 = vpush %v3063_v8  ;;  %v7362_v8 = vld [vmem:[#allocation15_spill] sm:$0xff] }
 0x670   : > { %4865 = vpush %v3081_v46  ;;  %v7363_v46 = vld [vmem:[#allocation16_spill] sm:$0xff] }
 0x671   : > { %4834 = vmatmul.mubr.msk.bf16.gmra.mxu1 %vm599_vm1, %v7362_v8 }
 0x672   : > { %4837 = vmatprep.mubr.msk.bf16.mxu1 %vm599_vm1, %v7363_v46 }
 0x679   : > { %4838 = vmatmul.mubr.msk.bf16.gmra.mxu1 %vm599_vm1, %v7367_v53 }
 0x69f   : > { %s4862_s26 = spop %4861 }
 0x6a0   : > { %s6303_s19 = smul.f32 0.001953125, %s4862_s26  ;;  %s4864_s20 = spop %4863 }
 0x6a1   : > { %s3065_s23 = smul.f32 0.001953125, %s4864_s20  ;;  %s4866_s22 = spop %4865 }
 0x6a2   : > { %s3084_s27 = smul.f32 %s6303_s19, %s6303_s19 }
 0x6a3   : > { %s3067_s28 = ssub.f32 %s3065_s23, %s3066_s21  ;;  %s3083_s30 = smul.f32 0.001953125, %s4866_s22 }
 0x6a5   : > { %s3068_s1 = smax.f32 %s4937_s29, %s3067_s28  ;;  %s3085_s0 = ssub.f32 %s3083_s30, %s3084_s27 }
 0x6a6   : > { %s3087_s17 = sadd.f32 1e-05, %s3068_s1 }
 0x6a7   : > { %s3086_s24 = smax.f32 %s4937_s29, %s3085_s0 }
 0x6a8   : > { %v3088_v62 = vstv %s3087_s17  ;;  %s3091_s2 = sadd.f32 1e-05, %s3086_s24 }
 0x6a9   : > { %4916 = vrsqrt.f32 %v3088_v62 }
 0x6aa   : > { %v3092_v21 = vstv %s3091_s2 }
 0x6ab   : > { %4918 = vrsqrt.f32 %v3092_v21  ;;  %v7364_v21 = vld [vmem:[#allocation19_spill] sm:$0xff] }
 0x6b6   : > { %v4917_v5 = vpop.eup %4916 }
 0x6b7   : > { %4867 = vpush %v4917_v5 }
 0x6b8   : > { %v4919_v31 = vpop.eup %4918 }
 0x6b9   : > { %4869 = vpush %v4919_v31  ;;  %v7365_v31 = vld [vmem:[#allocation21_spill] sm:$0xff] }
 0x6e8   : > { %s4868_s2 = spop %4867 }
 0x6e9   : > { %s3100_s21 = smul.f32 %s4868_s2, %s6299_s18  ;;  %v3095_v30 = vstv %s4868_s2 }
 0x6ea   : > { %s4870_s23 = spop %4869  ;;  %v3096_v7 = vmul.f32 %v3095_v30, %v2856_v19 }
 0x6eb   : > { %v3101_v29 = vstv %s3100_s21  ;;  %s3104_s22 = smul.f32 %s4870_s23, %s6303_s19  ;;  %v3097_v52 = vstv %s4870_s23  ;;  %s4941_s19 = smov 120  }
 0x6ec   : > { %v3102_v32 = vmul.f32 %v3101_v29, %v2856_v19  ;;  %v3098_v1 = vmul.f32 %v3097_v52, %v2857_v57 }
 0x6ed   : > { %v3105_v26 = vstv %s3104_s22 }
 0x6ee   : > { %v3103_v4 = vsub.f32 %v2858_v23, %v3102_v32  ;;  %v3106_v60 = vmul.f32 %v3105_v26, %v2857_v57  ;;  %v3099_v61 = vadd.f32 %v3098_v1, %v3096_v7 }
 0x6f0   : > { %v3107_v54 = vsub.f32 %v3103_v4, %v3106_v60  ;;  %v6350_v51 = vrot.slane %v3099_v61, %v7361_v24 }
 0x6f2   : > { %v6357_v62 = vrot.slane %v3107_v54, %v7361_v24  ;;  %v3114_v5 = vmul.f32 %v6350_v51, %v7364_v21  ;;  %v3115_v49 = vmul.f32 %v6350_v51, %v7365_v31  ;;  %v3116_v0 = vmul.f32 %v6350_v51, %v7366_v63 }
 0x6f3   : > { %v3117_v41 = vmul.f32 %v6350_v51, %v6014_v10  ;;  %v3118_v11 = vmul.f32 %v6350_v51, %v6035_v38  ;;  %v3119_v14 = vmul.f32 %v6350_v51, %v6053_v25  ;;  %v3120_v25 = vmul.f32 %v6350_v51, %v6042_v15 }
 0x6f4   : > { %v3152_v12 = vadd.f32 %v6357_v62, %v3114_v5  ;;  %v3153_v36 = vadd.f32 %v6357_v62, %v3115_v49  ;;  %v3154_v40 = vadd.f32 %v6357_v62, %v3116_v0  ;;  %v3121_v30 = vmul.f32 %v6350_v51, %v6051_v18 }
 0x6f5   : > { %v3155_v9 = vadd.f32 %v6357_v62, %v3117_v41  ;;  %v3156_v29 = vadd.f32 %v6357_v62, %v3118_v11  ;;  %v3157_v10 = vadd.f32 %v6357_v62, %v3119_v14  ;;  %v3122_v32 = vmul.f32 %v6350_v51, %v6073_v39 }
 0x6f6   : > { %v3184_v57 = vmax.f32 %v3152_v12, 0.0  ;;  %v3185_v38 = vmax.f32 %v3153_v36, 0.0  ;;  %v3186_v52 = vmax.f32 %v3154_v40, 0.0  ;;  %v3123_v23 = vmul.f32 %v6350_v51, %v6093_v27 }
 0x6f7   : > { %v3187_v19 = vmax.f32 %v3155_v9, 0.0  ;;  %v3188_v1 = vmax.f32 %v3156_v29, 0.0  ;;  %v3189_v26 = vmax.f32 %v3157_v10, 0.0  ;;  %v3158_v7 = vadd.f32 %v6357_v62, %v3120_v25 }
 0x6f8   : > { %v3216_v43 = vpack.c.bf16 %v3185_v38, %v3184_v57  ;;  %v3159_v4 = vadd.f32 %v6357_v62, %v3121_v30  ;;  %v3160_v60 = vadd.f32 %v6357_v62, %v3122_v32  ;;  %v3161_v15 = vadd.f32 %v6357_v62, %v3123_v23 }
 0x6f9   : > { %v3217_v58 = vpack.c.bf16 %v3187_v19, %v3186_v52  ;;  %v3218_v18 = vpack.c.bf16 %v3189_v26, %v3188_v1  ;;  %v3124_v39 = vmul.f32 %v6350_v51, %v6082_v20  ;;  %v3125_v27 = vmul.f32 %v6350_v51, %v6091_v3 }
 0x6fa   : > { %4775 = vmatprep.mubr.msk.bf16.mxu0 %vm599_vm1, %v3216_v43  ;;  %v3190_v61 = vmax.f32 %v3158_v7, 0.0  ;;  %v3191_v54 = vmax.f32 %v3159_v4, 0.0  ;;  %v3126_v8 = vmul.f32 %v6350_v51, %v6113_v44  ;;  %v3127_v46 = vmul.f32 %v6350_v51, %v6133_v22 }
 0x6fb   : > { %4776 = vmatmul.mubr.msk.bf16.vlgmr.msra.gmra.mxu0 %vm599_vm1, %v3217_v58  ;;  %v3192_v21 = vmax.f32 %v3160_v60, 0.0  ;;  %v3193_v5 = vmax.f32 %v3161_v15, 0.0  ;;  %v3162_v31 = vadd.f32 %v6357_v62, %v3124_v39  ;;  %v3163_v49 = vadd.f32 %v6357_v62, %v3125_v27 }
 0x6fc   : > { %4779 = vmatprep.mubr.msk.bf16.mxu0 %vm599_vm1, %v3218_v18  ;;  %v3219_v63 = vpack.c.bf16 %v3191_v54, %v3190_v61  ;;  %v3164_v20 = vadd.f32 %v6357_v62, %v3126_v8  ;;  %v3165_v0 = vadd.f32 %v6357_v62, %v3127_v46  ;;  %v3128_v44 = vmul.f32 %v6350_v51, %v6122_v47 }
 0x6fd   : > { %v3220_v3 = vpack.c.bf16 %v3193_v5, %v3192_v21  ;;  %v3129_v22 = vmul.f32 %v6350_v51, %v6131_v17  ;;  %v3194_v41 = vmax.f32 %v3162_v31, 0.0  ;;  %v3195_v11 = vmax.f32 %v3163_v49, 0.0 }
 0x6fe   : > { %v3130_v14 = vmul.f32 %v6350_v51, %v6151_v42  ;;  %v3131_v12 = vmul.f32 %v6350_v51, %v6169_v13  ;;  %v3196_v36 = vmax.f32 %v3164_v20, 0.0  ;;  %v3197_v40 = vmax.f32 %v3165_v0, 0.0 }
 0x6ff   : > { %v3166_v9 = vadd.f32 %v6357_v62, %v3128_v44  ;;  %v3167_v53 = vadd.f32 %v6357_v62, %v3129_v22  ;;  %v3221_v29 = vpack.c.bf16 %v3195_v11, %v3194_v41  ;;  %v3132_v42 = vmul.f32 %v6350_v51, %v6160_v59 }
 0x700   : > { %v3168_v47 = vadd.f32 %v6357_v62, %v3130_v14  ;;  %v3169_v10 = vadd.f32 %v6357_v62, %v3131_v12  ;;  %v3222_v17 = vpack.c.bf16 %v3197_v40, %v3196_v36  ;;  %v3133_v13 = vmul.f32 %v6350_v51, %v6167_v33 }
 0x701   : > { %v3198_v57 = vmax.f32 %v3166_v9, 0.0  ;;  %v3199_v38 = vmax.f32 %v3167_v53, 0.0  ;;  %v3134_v52 = vmul.f32 %v6350_v51, %v6187_v48  ;;  %v3135_v19 = vmul.f32 %v6350_v51, %v6205_v6 }
 0x702   : > { %v3200_v25 = vmax.f32 %v3168_v47, 0.0  ;;  %v3201_v30 = vmax.f32 %v3169_v10, 0.0  ;;  %v3170_v32 = vadd.f32 %v6357_v62, %v3132_v42  ;;  %v3171_v23 = vadd.f32 %v6357_v62, %v3133_v13 }
 0x703   : > { %4780 = vmatmul.mubr.msk.bf16.gmra.mxu0 %vm599_vm1, %v3219_v63  ;;  %v3223_v1 = vpack.c.bf16 %v3199_v38, %v3198_v57  ;;  %v3172_v59 = vadd.f32 %v6357_v62, %v3134_v52  ;;  %v3173_v26 = vadd.f32 %v6357_v62, %v3135_v19  ;;  %v3136_v48 = vmul.f32 %v6350_v51, %v6196_v55 }
 0x704   : > { %4783 = vmatprep.mubr.msk.bf16.mxu0 %vm599_vm1, %v3220_v3  ;;  %v3224_v33 = vpack.c.bf16 %v3201_v30, %v3200_v25  ;;  %v3137_v6 = vmul.f32 %v6350_v51, %v6203_v50  ;;  %v3202_v43 = vmax.f32 %v3170_v32, 0.0  ;;  %v3203_v58 = vmax.f32 %v3171_v23, 0.0 }
 0x705   : > { %v3138_v7 = vmul.f32 %v6350_v51, %v6222_v28  ;;  %v3139_v4 = vmul.f32 %v6350_v51, %v6238_v35  ;;  %v3204_v60 = vmax.f32 %v3172_v59, 0.0  ;;  %v3205_v15 = vmax.f32 %v3173_v26, 0.0 }
 0x706   : > { %v3174_v18 = vadd.f32 %v6357_v62, %v3136_v48  ;;  %v3175_v39 = vadd.f32 %v6357_v62, %v3137_v6  ;;  %v3225_v27 = vpack.c.bf16 %v3203_v58, %v3202_v43  ;;  %v3140_v28 = vmul.f32 %v6350_v51, %v6229_v45 }
 0x707   : > { %v3176_v55 = vadd.f32 %v6357_v62, %v3138_v7  ;;  %v3177_v61 = vadd.f32 %v6357_v62, %v3139_v4  ;;  %v3226_v50 = vpack.c.bf16 %v3205_v15, %v3204_v60  ;;  %v3141_v35 = vmul.f32 %v6350_v51, %v6236_v16 }
 0x708   : > { %v3206_v54 = vmax.f32 %v3174_v18, 0.0  ;;  %v3207_v8 = vmax.f32 %v3175_v39, 0.0  ;;  %v3142_v46 = vmul.f32 %v6350_v51, %v6254_v37  ;;  %v3143_v21 = vmul.f32 %v6350_v51, %v6270_v2 }
 0x709   : > { %v3208_v5 = vmax.f32 %v3176_v55, 0.0  ;;  %v3209_v31 = vmax.f32 %v3177_v61, 0.0  ;;  %v3178_v49 = vadd.f32 %v6357_v62, %v3140_v28  ;;  %v3179_v63 = vadd.f32 %v6357_v62, %v3141_v35 }
 0x70a   : > { %v3227_v20 = vpack.c.bf16 %v3207_v8, %v3206_v54  ;;  %v3180_v45 = vadd.f32 %v6357_v62, %v3142_v46  ;;  %v3181_v0 = vadd.f32 %v6357_v62, %v3143_v21  ;;  %v3144_v37 = vmul.f32 %v6350_v51, %v6261_v56 }
 0x70b   : > { %4784 = vmatmul.mubr.msk.bf16.gmra.mxu0 %vm599_vm1, %v3221_v29  ;;  %v3228_v16 = vpack.c.bf16 %v3209_v31, %v3208_v5  ;;  %v3145_v2 = vmul.f32 %v6350_v51, %v6268_v34  ;;  %v3210_v3 = vmax.f32 %v3178_v49, 0.0  ;;  %v3211_v44 = vmax.f32 %v3179_v63, 0.0  ;;  %v6473_v34 = vpop.f32.mrf.mxu1 }
 0x70c   : > { %4787 = vmatprep.mubr.msk.bf16.mxu0 %vm599_vm1, %v3222_v17  ;;  %v3212_v22 = vmax.f32 %v3180_v45, 0.0  ;;  %v3213_v41 = vmax.f32 %v3181_v0, 0.0  ;;  %v3182_v11 = vadd.f32 %v6357_v62, %v3144_v37  ;;  %7368 = vst [vmem:[#allocation4_spill] sm:$0xff] %v6473_v34  ;;  %v3946_v42 = vsel %vm3448_vm0, %v6473_v34, 0.0 }
 0x70d   : > { %v3183_v14 = vadd.f32 %v6357_v62, %v3145_v2  ;;  %v3229_v12 = vpack.c.bf16 %v3211_v44, %v3210_v3  ;;  %v6475_v51 = vpop.f32.mrf.mxu1 }
 0x70e   : > { %v3230_v36 = vpack.c.bf16 %v3213_v41, %v3212_v22  ;;  %v3214_v40 = vmax.f32 %v3182_v11, 0.0  ;;  %7369 = vst [vmem:[#allocation5_spill] sm:$0xff] %v6475_v51  ;;  %v3943_v62 = vsel %vm3448_vm0, %v6475_v51, 0.0 }
 0x70f   : > { %v3215_v9 = vmax.f32 %v3183_v14, 0.0  ;;  %v6477_v53 = vpop.f32.mrf.mxu1 }
 0x710   : > { %7370 = vst [vmem:[#allocation6_spill] sm:$0xff] %v6477_v53  ;;  %v3948_v38 = vsel %vm3448_vm0, %v6477_v53, 0.0 }
 0x711   : > { %v3231_v56 = vpack.c.bf16 %v3215_v9, %v3214_v40  ;;  %v6479_v29 = vpop.f32.mrf.mxu1 }
 0x712   : > { %7371 = vst [vmem:[#allocation7_spill] sm:$0xff] %v6479_v29  ;;  %v3944_v47 = vsel %vm3448_vm0, %v6479_v29, 0.0 }
 0x713   : > { %4788 = vmatmul.mubr.msk.bf16.gmra.mxu0 %vm599_vm1, %v3223_v1  ;;  %v6485_v10 = vpop.f32.mrf.mxu1  ;;  %v3945_v17 = vadd.f32 %v3944_v47, %v3943_v62 }
 0x714   : > { %4791 = vmatprep.mubr.msk.bf16.mxu0 %vm599_vm1, %v3224_v33  ;;  %7372 = vst [vmem:[#allocation8_spill] sm:$0xff] %v6485_v10  ;;  %v3954_v43 = vsel %vm3448_vm0, %v6485_v10, 0.0 }
 0x715   : > { %v6489_v13 = vpop.f32.mrf.mxu1  ;;  %v3947_v57 = vadd.f32 %v3946_v42, %v3945_v17 }
 0x716   : > { %7373 = vst [vmem:[#allocation9_spill] sm:$0xff] %v6489_v13  ;;  %v3950_v25 = vsel %vm3448_vm0, %v6489_v13, 0.0 }
 0x717   : > { %v6493_v52 = vpop.f32.mrf.mxu1  ;;  %v3949_v19 = vadd.f32 %v3948_v38, %v3947_v57 }
 0x718   : > { %7374 = vst [vmem:[#allocation10_spill] sm:$0xff] %v6493_v52  ;;  %v3956_v49 = vsel %vm3448_vm0, %v6493_v52, 0.0 }
 0x719   : > { %v6499_v32 = vpop.f32.mrf.mxu1  ;;  %v3951_v1 = vadd.f32 %v3950_v25, %v3949_v19 }
 0x71a   : > { %7375 = vst [vmem:[#allocation11_spill] sm:$0xff] %v6499_v32  ;;  %v3952_v59 = vsel %vm3448_vm0, %v6499_v32, 0.0 }
 0x71b   : > { %4792 = vmatmul.mubr.msk.bf16.gmra.mxu0 %vm599_vm1, %v3225_v27  ;;  %v6507_v33 = vpop.f32.mrf.mxu1  ;;  %v3953_v58 = vadd.f32 %v3952_v59, %v3951_v1 }
 0x71c   : > { %4795 = vmatprep.mubr.msk.bf16.mxu0 %vm599_vm1, %v3226_v50  ;;  %7376 = vst [vmem:[#allocation12_spill] sm:$0xff] %v6507_v33 }
 0x71d   : > { %v6525_v27 = vpop.f32.mrf.mxu1  ;;  %v3955_v46 = vadd.f32 %v3954_v43, %v3953_v58 }
 0x71e   : > { %7377 = vst [vmem:[#allocation13_spill] sm:$0xff] %v6525_v27  ;;  %v3958_v41 = vsel %vm3448_vm0, %v6525_v27, 0.0 }
 0x71f   : > { %v6544_v0 = vpop.f32.mrf.mxu1  ;;  %v3957_v22 = vadd.f32 %v3956_v49, %v3955_v46 }
 0x720   : > { %7378 = vst [vmem:[#allocation14_spill] sm:$0xff] %v6544_v0 }
 0x721   : > { %v6562_v62 = vpop.f32.mrf.mxu1  ;;  %v3959_v25 = vadd.f32 %v3958_v41, %v3957_v22 }
 0x722   : > { %7379 = vst [vmem:[#allocation18_spill] sm:$0xff] %v6562_v62  ;;  %v3960_v43 = vsel %vm3448_vm0, %v6562_v62, 0.0 }
 0x723   : > { %4796 = vmatmul.mubr.msk.bf16.gmra.mxu0 %vm599_vm1, %v3227_v20  ;;  %v3961_v46 = vadd.f32 %v3960_v43, %v3959_v25 }
 0x724   : > { %4799 = vmatprep.mubr.msk.bf16.mxu0 %vm599_vm1, %v3228_v16 }
 0x72b   : > { %4800 = vmatmul.mubr.msk.bf16.gmra.mxu0 %vm599_vm1, %v3229_v12 }
 0x72c   : > { %4803 = vmatprep.mubr.msk.bf16.mxu0 %vm599_vm1, %v3230_v36 }
 0x733   : > { %4804 = vmatmul.mubr.msk.bf16.gmra.mxu0 %vm599_vm1, %v3231_v56  ;;  %vm3619_vm1 = vcmask 57344  }
 0x7bb   : > { %v6497_v30 = vpop.f32.mrf.mxu0 }
 0x7bc   : > { %v3520_v7 = vmul.f32 %v6497_v30, %v6497_v30  ;;  %v3452_v55 = vsel %vm3448_vm0, %v6497_v30, 0.0 }
 0x7bd   : > { %v6501_v23 = vpop.f32.mrf.mxu0 }
 0x7be   : > { %v3518_v48 = vmul.f32 %v6501_v23, %v6501_v23  ;;  %v3449_v4 = vsel %vm3448_vm0, %v6501_v23, 0.0  ;;  %v3553_v21 = vsel %vm3448_vm0, %v3520_v7, 0.0 }
 0x7bf   : > { %v6505_v26 = vpop.f32.mrf.mxu0 }
 0x7c0   : > { %v3550_v61 = vsel %vm3448_vm0, %v3518_v48, 0.0  ;;  %v3521_v50 = vmul.f32 %v6505_v26, %v6505_v26  ;;  %v3454_v5 = vsel %vm3448_vm0, %v6505_v26, 0.0 }
 0x7c1   : > { %v6511_v6 = vpop.f32.mrf.mxu0 }
 0x7c2   : > { %v3450_v60 = vsel %vm3448_vm0, %v6511_v6, 0.0  ;;  %v3519_v15 = vmul.f32 %v6511_v6, %v6511_v6  ;;  %v3555_v16 = vsel %vm3448_vm0, %v3521_v50, 0.0 }
 0x7c3   : > { %v3451_v18 = vadd.f32 %v3450_v60, %v3449_v4  ;;  %v6523_v39 = vpop.f32.mrf.mxu0  ;;  %v4012_v60 = vmul.f32 %v6475_v51, %v6475_v51 }
 0x7c4   : > { %v3551_v28 = vsel %vm3448_vm0, %v3519_v15, 0.0  ;;  %v3524_v11 = vmul.f32 %v6523_v39, %v6523_v39  ;;  %v3460_v47 = vsel %vm3448_vm0, %v6523_v39, 0.0  ;;  %v6582_v15 = vpop.f32.mrf.mxu1 }
 0x7c5   : > { %v3453_v35 = vadd.f32 %v3452_v55, %v3451_v18  ;;  %v3552_v54 = vadd.f32 %v3551_v28, %v3550_v61  ;;  %v6533_v8 = vpop.f32.mrf.mxu0  ;;  %7380 = vst [vmem:[#allocation15_spill] sm:$0xff] %v6582_v15  ;;  %v4013_v61 = vmul.f32 %v6479_v29, %v6479_v29 }
 0x7c6   : > { %v3522_v31 = vmul.f32 %v6533_v8, %v6533_v8  ;;  %v3456_v37 = vsel %vm3448_vm0, %v6533_v8, 0.0  ;;  %v3561_v1 = vsel %vm3448_vm0, %v3524_v11, 0.0 }
 0x7c7   : > { %v3554_v63 = vadd.f32 %v3553_v21, %v3552_v54  ;;  %v3455_v20 = vadd.f32 %v3454_v5, %v3453_v35  ;;  %v6542_v45 = vpop.f32.mrf.mxu0  ;;  %v3962_v54 = vsel %vm3448_vm0, %v6507_v33, 0.0 }
 0x7c8   : > { %v3557_v14 = vsel %vm3448_vm0, %v3522_v31, 0.0  ;;  %v3525_v17 = vmul.f32 %v6542_v45, %v6542_v45  ;;  %v3462_v59 = vsel %vm3448_vm0, %v6542_v45, 0.0 }
 0x7c9   : > { %v3457_v2 = vadd.f32 %v3456_v37, %v3455_v20  ;;  %v3556_v3 = vadd.f32 %v3555_v16, %v3554_v63  ;;  %v6549_v44 = vpop.f32.mrf.mxu0  ;;  %v4014_v37 = vmul.f32 %v6473_v34, %v6473_v34 }
 0x7ca   : > { %v3458_v12 = vsel %vm3448_vm0, %v6549_v44, 0.0  ;;  %v3523_v36 = vmul.f32 %v6549_v44, %v6549_v44  ;;  %v3563_v18 = vsel %vm3448_vm0, %v3525_v17, 0.0 }
 0x7cb   : > { %v3558_v40 = vadd.f32 %v3557_v14, %v3556_v3  ;;  %v3459_v9 = vadd.f32 %v3458_v12, %v3457_v2  ;;  %v6560_v56 = vpop.f32.mrf.mxu0  ;;  %v4044_v2 = vsel %vm3448_vm0, %v4012_v60, 0.0  ;;  %v6605_v3 = vpop.f32.mrf.mxu1  ;;  %v4045_v14 = vsel %vm3448_vm0, %v4013_v61, 0.0 }
 0x7cc   : > { %v3559_v42 = vsel %vm3448_vm0, %v3523_v36, 0.0  ;;  %v3528_v21 = vmul.f32 %v6560_v56, %v6560_v56  ;;  %7381 = vst [vmem:[#allocation16_spill] sm:$0xff] %v6605_v3  ;;  %v3468_v22 = vsel %vm3448_vm0, %v6560_v56, 0.0  ;;  %v4047_v60 = vsel %vm3448_vm0, %v4014_v37, 0.0 }
 0x7cd   : > { %v3461_v57 = vadd.f32 %v3460_v47, %v3459_v9  ;;  %v3560_v38 = vadd.f32 %v3559_v42, %v3558_v40  ;;  %v6569_v19 = vpop.f32.mrf.mxu0  ;;  %v3963_v9 = vadd.f32 %v3962_v54, %v3961_v46  ;;  %v6626_v43 = vpop.f32.mrf.mxu1 }
 0x7ce   : > { %v3526_v48 = vmul.f32 %v6569_v19, %v6569_v19  ;;  %v3464_v55 = vsel %vm3448_vm0, %v6569_v19, 0.0  ;;  %v3569_v47 = vsel %vm3448_vm0, %v3528_v21, 0.0 }
 0x7cf   : > { %v3562_v58 = vadd.f32 %v3561_v1, %v3560_v38  ;;  %v3463_v7 = vadd.f32 %v3462_v59, %v3461_v57  ;;  %v6578_v4 = vpop.f32.mrf.mxu0  ;;  %v3964_v57 = vsel %vm3448_vm0, %v6544_v0, 0.0  ;;  %v4015_v59 = vmul.f32 %v6477_v53, %v6477_v53 }
 0x7d0   : > { %v3565_v5 = vsel %vm3448_vm0, %v3526_v48, 0.0  ;;  %v3529_v41 = vmul.f32 %v6578_v4, %v6578_v4  ;;  %v3470_v17 = vsel %vm3448_vm0, %v6578_v4, 0.0  ;;  %v4046_v48 = vadd.f32 %v4045_v14, %v4044_v2  ;;  %v6646_v2 = vpop.f32.mrf.mxu1 }
 0x7d1   : > { %v3465_v50 = vadd.f32 %v3464_v55, %v3463_v7  ;;  %v3564_v28 = vadd.f32 %v3563_v18, %v3562_v58  ;;  %v6589_v35 = vpop.f32.mrf.mxu0  ;;  %7382 = vst [vmem:[#allocation19_spill] sm:$0xff] %v6646_v2  ;;  %v4016_v14 = vmul.f32 %v6489_v13, %v6489_v13 }
 0x7d2   : > { %v3466_v31 = vsel %vm3448_vm0, %v6589_v35, 0.0  ;;  %v3527_v49 = vmul.f32 %v6589_v35, %v6589_v35  ;;  %v3571_v58 = vsel %vm3448_vm0, %v3529_v41, 0.0  ;;  %v4048_v37 = vadd.f32 %v4047_v60, %v4046_v48 }
 0x7d3   : > { %v3566_v63 = vadd.f32 %v3565_v5, %v3564_v28  ;;  %v3467_v20 = vadd.f32 %v3466_v31, %v3465_v50  ;;  %v6600_v16 = vpop.f32.mrf.mxu0  ;;  %v3965_v50 = vadd.f32 %v3964_v57, %v3963_v9  ;;  %v3966_v28 = vsel %vm3448_vm0, %v6605_v3, 0.0 }
 0x7d4   : > { %v3567_v11 = vsel %vm3448_vm0, %v3527_v49, 0.0  ;;  %v3532_v54 = vmul.f32 %v6600_v16, %v6600_v16 }
 0x7d5   : > { %v3469_v12 = vadd.f32 %v3468_v22, %v3467_v20  ;;  %v3568_v36 = vadd.f32 %v3567_v11, %v3566_v63  ;;  %v6613_v40 = vpop.f32.mrf.mxu0  ;;  %v4049_v20 = vsel %vm3448_vm0, %v4015_v59, 0.0  ;;  %v3476_v22 = vsel %vm3448_vm0, %v6600_v16, 0.0 }
 0x7d6   : > { %v3530_v42 = vmul.f32 %v6613_v40, %v6613_v40  ;;  %v3472_v7 = vsel %vm3448_vm0, %v6613_v40, 0.0 }
 0x7d7   : > { %v3570_v38 = vadd.f32 %v3569_v47, %v3568_v36  ;;  %v3471_v25 = vadd.f32 %v3470_v17, %v3469_v12  ;;  %v6622_v1 = vpop.f32.mrf.mxu0  ;;  %v3967_v47 = vadd.f32 %v3966_v28, %v3965_v50  ;;  %v3577_v17 = vsel %vm3448_vm0, %v3532_v54, 0.0 }
 0x7d8   : > { %v3573_v46 = vsel %vm3448_vm0, %v3530_v42, 0.0  ;;  %v3533_v41 = vmul.f32 %v6622_v1, %v6622_v1  ;;  %v3478_v42 = vsel %vm3448_vm0, %v6622_v1, 0.0  ;;  %v4017_v50 = vmul.f32 %v6499_v32, %v6499_v32 }
 0x7d9   : > { %v3473_v18 = vadd.f32 %v3472_v7, %v3471_v25  ;;  %v3572_v55 = vadd.f32 %v3571_v58, %v3570_v38  ;;  %v6632_v61 = vpop.f32.mrf.mxu0  ;;  %v3968_v38 = vsel %vm3448_vm0, %v6646_v2, 0.0  ;;  %v4050_v58 = vadd.f32 %v4049_v20, %v4048_v37  ;;  %v6666_v7 = vpop.f32.mrf.mxu1 }
 0x7da   : > { %v3474_v21 = vsel %vm3448_vm0, %v6632_v61, 0.0  ;;  %v3531_v5 = vmul.f32 %v6632_v61, %v6632_v61  ;;  %v3579_v60 = vsel %vm3448_vm0, %v3533_v41, 0.0 }
 0x7db   : > { %v3574_v31 = vadd.f32 %v3573_v46, %v3572_v55  ;;  %v3475_v49 = vadd.f32 %v3474_v21, %v3473_v18  ;;  %v6643_v63 = vpop.f32.mrf.mxu0  ;;  %v4051_v55 = vsel %vm3448_vm0, %v4016_v14, 0.0  ;;  %v3970_v21 = vsel %vm3448_vm0, %v6582_v15, 0.0 }
 0x7dc   : > { %v3575_v11 = vsel %vm3448_vm0, %v3531_v5, 0.0  ;;  %v3969_v5 = vadd.f32 %v3968_v38, %v3967_v47  ;;  %v4018_v14 = vmul.f32 %v6485_v10, %v6485_v10  ;;  %v3484_v47 = vsel %vm3448_vm0, %v6643_v63, 0.0 }
 0x7dd   : > { %v3477_v12 = vadd.f32 %v3476_v22, %v3475_v49  ;;  %v3576_v36 = vadd.f32 %v3575_v11, %v3574_v31  ;;  %v6655_v9 = vpop.f32.mrf.mxu0  ;;  %v3536_v31 = vmul.f32 %v6643_v63, %v6643_v63 }
 0x7de   : > { %v3534_v57 = vmul.f32 %v6655_v9, %v6655_v9  ;;  %v3480_v18 = vsel %vm3448_vm0, %v6655_v9, 0.0 }
 0x7df   : > { %v3578_v25 = vadd.f32 %v3577_v17, %v3576_v36  ;;  %v3479_v59 = vadd.f32 %v3478_v42, %v3477_v12  ;;  %v6664_v48 = vpop.f32.mrf.mxu0  ;;  %v4052_v12 = vadd.f32 %v4051_v55, %v4050_v58  ;;  %v6689_v36 = vpop.f32.mrf.mxu1 }
 0x7e0   : > { %v3581_v49 = vsel %vm3448_vm0, %v3534_v57, 0.0  ;;  %v3537_v17 = vmul.f32 %v6664_v48, %v6664_v48  ;;  %v4053_v57 = vsel %vm3448_vm0, %v4017_v50, 0.0  ;;  %v3486_v58 = vsel %vm3448_vm0, %v6664_v48, 0.0 }
 0x7e1   : > { %v3481_v28 = vadd.f32 %v3480_v18, %v3479_v59  ;;  %v3580_v54 = vadd.f32 %v3579_v60, %v3578_v25  ;;  %v6674_v46 = vpop.f32.mrf.mxu0  ;;  %v3971_v60 = vadd.f32 %v3970_v21, %v3969_v5  ;;  %v3585_v18 = vsel %vm3448_vm0, %v3536_v31, 0.0  ;;  %v6710_v21 = vpop.f32.mrf.mxu1 }
 0x7e2   : > { %v3482_v20 = vsel %vm3448_vm0, %v6674_v46, 0.0  ;;  %v3535_v37 = vmul.f32 %v6674_v46, %v6674_v46  ;;  %v4019_v50 = vmul.f32 %v6493_v52, %v6493_v52  ;;  %v3587_v5 = vsel %vm3448_vm0, %v3537_v17, 0.0 }
 0x7e3   : > { %v3582_v22 = vadd.f32 %v3581_v49, %v3580_v54  ;;  %v3483_v41 = vadd.f32 %v3482_v20, %v3481_v28  ;;  %v6685_v11 = vpop.f32.mrf.mxu0  ;;  %v3972_v28 = vsel %vm3448_vm0, %v6626_v43, 0.0  ;;  %v4020_v52 = vmul.f32 %v6525_v27, %v6525_v27 }
 0x7e4   : > { %v3583_v42 = vsel %vm3448_vm0, %v3535_v37, 0.0  ;;  %v4054_v37 = vadd.f32 %v4053_v57, %v4052_v12  ;;  %v3540_v12 = vmul.f32 %v6685_v11, %v6685_v11 }
 0x7e5   : > { %v3485_v38 = vadd.f32 %v3484_v47, %v3483_v41  ;;  %v3584_v25 = vadd.f32 %v3583_v42, %v3582_v22  ;;  %v6697_v59 = vpop.f32.mrf.mxu0  ;;  %v4055_v22 = vsel %vm3448_vm0, %v4018_v14, 0.0 }
 0x7e6   : > { %v3538_v55 = vmul.f32 %v6697_v59, %v6697_v59  ;;  %v3488_v31 = vsel %vm3448_vm0, %v6697_v59, 0.0 }
 0x7e7   : > { %v3586_v54 = vadd.f32 %v3585_v18, %v3584_v25  ;;  %v3487_v49 = vadd.f32 %v3486_v58, %v3485_v38  ;;  %v6706_v20 = vpop.f32.mrf.mxu0  ;;  %v3973_v38 = vadd.f32 %v3972_v28, %v3971_v60  ;;  %v3974_v25 = vsel %vm3448_vm0, %v6689_v36, 0.0 }
 0x7e8   : > { %v3589_v57 = vsel %vm3448_vm0, %v3538_v55, 0.0  ;;  %v4057_v60 = vsel %vm3448_vm0, %v4019_v50, 0.0  ;;  %v4056_v28 = vadd.f32 %v4055_v22, %v4054_v37  ;;  %v3541_v55 = vmul.f32 %v6706_v20, %v6706_v20 }
 0x7e9   : > { %v3489_v41 = vadd.f32 %v3488_v31, %v3487_v49  ;;  %v3588_v47 = vadd.f32 %v3587_v5, %v3586_v54  ;;  %v6716_v42 = vpop.f32.mrf.mxu0  ;;  %v6730_v49 = vpop.f32.mrf.mxu1  ;;  %v3492_v5 = vsel %vm3448_vm0, %v6685_v11, 0.0  ;;  %v3593_v50 = vsel %vm3448_vm0, %v3540_v12, 0.0 }
 0x7ea   : > { %v3490_v17 = vsel %vm3448_vm0, %v6716_v42, 0.0  ;;  %v3539_v18 = vmul.f32 %v6716_v42, %v6716_v42  ;;  %v3494_v37 = vsel %vm3448_vm0, %v6706_v20, 0.0  ;;  %v3976_v10 = vsel %vm3448_vm0, %v6730_v49, 0.0 }
 0x7eb   : > { %v3590_v14 = vadd.f32 %v3589_v57, %v3588_v47  ;;  %v3491_v58 = vadd.f32 %v3490_v17, %v3489_v41  ;;  %v6727_v54 = vpop.f32.mrf.mxu0  ;;  %v3975_v17 = vadd.f32 %v3974_v25, %v3973_v38  ;;  %v4059_v25 = vsel %vm3448_vm0, %v4020_v52, 0.0 }
 0x7ec   : > { %v3591_v31 = vsel %vm3448_vm0, %v3539_v18, 0.0  ;;  %v4021_v12 = vmul.f32 %v6562_v62, %v6562_v62 }
 0x7ed   : > { %v3493_v47 = vadd.f32 %v3492_v5, %v3491_v58  ;;  %v3592_v41 = vadd.f32 %v3591_v31, %v3590_v14  ;;  %v6739_v57 = vpop.f32.mrf.mxu0  ;;  %v4058_v58 = vadd.f32 %v4057_v60, %v4056_v28  ;;  %v3595_v14 = vsel %vm3448_vm0, %v3541_v55, 0.0  ;;  %v6756_v5 = vpop.f32.mrf.mxu1 }
 0x7ee   : > { %v3542_v22 = vmul.f32 %v6739_v57, %v6739_v57  ;;  %v3496_v38 = vsel %vm3448_vm0, %v6739_v57, 0.0  ;;  %7384 = vst [vmem:[#allocation20_spill] sm:$0xff] %v6756_v5  ;;  %v3977_v60 = vadd.f32 %v3976_v10, %v3975_v17  ;;  %v3544_v28 = vmul.f32 %v6727_v54, %v6727_v54 }
 0x7ef   : > { %v3594_v18 = vadd.f32 %v3593_v50, %v3592_v41  ;;  %v3495_v32 = vadd.f32 %v3494_v37, %v3493_v47  ;;  %v6748_v13 = vpop.f32.mrf.mxu0  ;;  %v3978_v47 = vsel %vm3448_vm0, %v6666_v7, 0.0  ;;  %v3500_v10 = vsel %vm3448_vm0, %v6727_v54, 0.0  ;;  %v6779_v62 = vpop.f32.mrf.mxu1 }
 0x7f0   : > { %7383 = vst [vmem:[#allocation21_spill] sm:$0xff] %v6748_v13  ;;  %v3597_v55 = vsel %vm3448_vm0, %v3542_v22, 0.0  ;;  %v3545_v17 = vmul.f32 %v6748_v13, %v6748_v13 }
 0x7f1   : > { %v3497_v31 = vadd.f32 %v3496_v38, %v3495_v32  ;;  %v3596_v27 = vadd.f32 %v3595_v14, %v3594_v18  ;;  %v6758_v53 = vpop.f32.mrf.mxu0  ;;  %v4022_v18 = vmul.f32 %v6507_v33, %v6507_v33  ;;  %v4060_v14 = vadd.f32 %v4059_v25, %v4058_v58 }
 0x7f2   : > { %v3498_v52 = vsel %vm3448_vm0, %v6758_v53, 0.0  ;;  %v3543_v41 = vmul.f32 %v6758_v53, %v6758_v53  ;;  %v4061_v38 = vsel %vm3448_vm0, %v4021_v12, 0.0  ;;  %v3979_v58 = vadd.f32 %v3978_v47, %v3977_v60 }
 0x7f3   : > { %v3598_v50 = vadd.f32 %v3597_v55, %v3596_v27  ;;  %v3499_v32 = vadd.f32 %v3498_v52, %v3497_v31  ;;  %v6769_v37 = vpop.f32.mrf.mxu0  ;;  %v4023_v52 = vmul.f32 %v6544_v0, %v6544_v0  ;;  %v3601_v25 = vsel %vm3448_vm0, %v3544_v28, 0.0  ;;  %v6798_v28 = vpop.f32.mrf.mxu1 }
 0x7f4   : > { %7385 = vst [vmem:[#allocation17_spill] sm:$0xff] %v6769_v37  ;;  %v3599_v22 = vsel %vm3448_vm0, %v3543_v41, 0.0  ;;  %v3502_v33 = vsel %vm3448_vm0, %v6748_v13, 0.0  ;;  %v3980_v12 = vsel %vm3448_vm0, %v6710_v21, 0.0  ;;  %v4063_v60 = vsel %vm3448_vm0, %v4022_v18, 0.0 }
 0x7f5   : > { %v3501_v27 = vadd.f32 %v3500_v10, %v3499_v32  ;;  %v3600_v31 = vadd.f32 %v3599_v22, %v3598_v50  ;;  %v6781_v55 = vpop.f32.mrf.mxu0  ;;  %v4062_v10 = vadd.f32 %v4061_v38, %v4060_v14  ;;  %v3603_v22 = vsel %vm3448_vm0, %v3545_v17, 0.0 }
 0x7f6   : > { %v3546_v41 = vmul.f32 %v6781_v55, %v6781_v55  ;;  %v3504_v47 = vsel %vm3448_vm0, %v6781_v55, 0.0  ;;  %v4065_v13 = vsel %vm3448_vm0, %v4023_v52, 0.0  ;;  %v3508_v52 = vsel %vm3448_vm0, %v6769_v37, 0.0 }
 0x7f7   : > { %v3602_v34 = vadd.f32 %v3601_v25, %v3600_v31  ;;  %v3503_v32 = vadd.f32 %v3502_v33, %v3501_v27  ;;  %v6792_v50 = vpop.f32.mrf.mxu0  ;;  %v3981_v31 = vadd.f32 %v3980_v12, %v3979_v58  ;;  %v3548_v33 = vmul.f32 %v6769_v37, %v6769_v37 }
 0x7f8   : > { %7386 = vst [vmem:[#allocation22_spill] sm:$0xff] %v6792_v50  ;;  %v3605_v14 = vsel %vm3448_vm0, %v3546_v41, 0.0  ;;  %v4064_v25 = vadd.f32 %v4063_v60, %v4062_v10  ;;  %v3549_v58 = vmul.f32 %v6792_v50, %v6792_v50  ;;  %v4024_v12 = vmul.f32 %v6605_v3, %v6605_v3 }
 0x7f9   : > { %v3505_v0 = vadd.f32 %v3504_v47, %v3503_v32  ;;  %v3604_v29 = vadd.f32 %v3603_v22, %v3602_v34  ;;  %v6800_v51 = vpop.f32.mrf.mxu0  ;;  %v3982_v34 = vsel %vm3448_vm0, %v6779_v62, 0.0  ;;  %v6819_v32 = vpop.f32.mrf.mxu1  ;;  %v3510_v10 = vsel %vm3448_vm0, %v6792_v50, 0.0 }
 0x7fa   : > { %v3506_v17 = vsel %vm3448_vm0, %v6800_v51, 0.0  ;;  %v3547_v18 = vmul.f32 %v6800_v51, %v6800_v51  ;;  %v3983_v47 = vadd.f32 %v3982_v34, %v3981_v31  ;;  %v3984_v37 = vsel %vm3448_vm0, %v6819_v32, 0.0 }
 0x7fb   : > { %v3606_v38 = vadd.f32 %v3605_v14, %v3604_v29  ;;  %v3507_v27 = vadd.f32 %v3506_v17, %v3505_v0  ;;  %v3609_v0 = vsel %vm3448_vm0, %v3548_v33, 0.0  ;;  %v4066_v17 = vadd.f32 %v4065_v13, %v4064_v25 }
 0x7fc   : > { %v3607_v41 = vsel %vm3448_vm0, %v3547_v18, 0.0  ;;  %v3611_v18 = vsel %vm3448_vm0, %v3549_v58, 0.0  ;;  %v4067_v3 = vsel %vm3448_vm0, %v4024_v12, 0.0  ;;  %v3986_v13 = vsel %vm3448_vm0, %v6756_v5, 0.0 }
 0x7fd   : > { %v3509_v22 = vadd.f32 %v3508_v52, %v3507_v27  ;;  %v3608_v29 = vadd.f32 %v3607_v41, %v3606_v38  ;;  %v4025_v27 = vmul.f32 %v6646_v2, %v6646_v2  ;;  %v6830_v38 = vpop.f32.mrf.mxu1  ;;  %v3985_v41 = vadd.f32 %v3984_v37, %v3983_v47 }
 0x7fe   : > { %v4068_v34 = vadd.f32 %v4067_v3, %v4066_v17  ;;  %v4026_v25 = vmul.f32 %v6582_v15, %v6582_v15  ;;  %v3988_v37 = vsel %vm3448_vm0, %v6798_v28, 0.0  ;;  %v4027_v47 = vmul.f32 %v6626_v43, %v6626_v43 }
 0x7ff   : > { %v3511_v60 = vadd.f32 %v3510_v10, %v3509_v22  ;;  %v3610_v14 = vadd.f32 %v3609_v0, %v3608_v29  ;;  %v4069_v58 = vsel %vm3448_vm0, %v4025_v27, 0.0  ;;  %v6837_v12 = vpop.f32.mrf.mxu1  ;;  %v3987_v0 = vadd.f32 %v3986_v13, %v3985_v41 }
 0x800   : > { %v4071_v3 = vsel %vm3448_vm0, %v4026_v25, 0.0  ;;  %v4073_v41 = vsel %vm3448_vm0, %v4027_v47, 0.0 }
 0x801   : > { %v3512_v33 = vrot.slane %v3511_v60, 4  ;;  %v3612_v52 = vadd.f32 %v3611_v18, %v3610_v14  ;;  %v4070_v14 = vadd.f32 %v4069_v58, %v4068_v34  ;;  %v3989_v27 = vadd.f32 %v3988_v37, %v3987_v0 }
 0x802   : > { %v3994_v37 = vsel %vm3448_vm0, %v6830_v38, 0.0 }
 0x803   : > { %v3513_v50 = vadd.f32 %v3512_v33, %v3511_v60  ;;  %v3613_v31 = vrot.slane %v3612_v52, 4  ;;  %v6844_v60 = vpop.f32.mrf.mxu1 }
 0x805   : > { %v3514_v22 = vrot.slane %v3513_v50, 2  ;;  %v3614_v29 = vadd.f32 %v3613_v31, %v3612_v52  ;;  %v4072_v52 = vadd.f32 %v4071_v3, %v4070_v14  ;;  %v4028_v31 = vmul.f32 %v6689_v36, %v6689_v36  ;;  %v6851_v34 = vpop.f32.mrf.mxu1 }
 0x806   : > { %v3992_v58 = vsel %vm3448_vm0, %v6851_v34, 0.0 }
 0x807   : > { %v3515_v10 = vadd.f32 %v3514_v22, %v3513_v50  ;;  %v3615_v2 = vrot.slane %v3614_v29, 2  ;;  %v3990_v50 = vsel %vm3448_vm0, %v6837_v12, 0.0  ;;  %v4075_v22 = vsel %vm3448_vm0, %v4028_v31, 0.0  ;;  %v6860_v0 = vpop.f32.mrf.mxu1 }
 0x808   : > { %v3991_v25 = vadd.f32 %v3990_v50, %v3989_v27  ;;  %7387 = vst [vmem:[#allocation23_spill] sm:$0xff] %v6860_v0  ;;  %v3996_v27 = vsel %vm3448_vm0, %v6844_v60, 0.0  ;;  %v4031_v50 = vmul.f32 %v6710_v21, %v6710_v21 }
 0x809   : > { %v3516_v17 = vrot.slane %v3515_v10, 1  ;;  %v3616_v18 = vadd.f32 %v3615_v2, %v3614_v29  ;;  %v4074_v2 = vadd.f32 %v4073_v41, %v4072_v52  ;;  %v4029_v29 = vmul.f32 %v6730_v49, %v6730_v49  ;;  %v6867_v47 = vpop.f32.mrf.mxu1 }
 0x80a   : > { %7388 = vst [vmem:[#allocation24_spill] sm:$0xff] %v6867_v47 }
 0x80b   : > { %v3517_v33 = vadd.f32 %v3516_v17, %v3515_v10  ;;  %v3617_v15 = vrot.slane %v3616_v18, 1  ;;  %v3993_v10 = vadd.f32 %v3992_v58, %v3991_v25  ;;  %v4076_v14 = vadd.f32 %v4075_v22, %v4074_v2  ;;  %v6874_v41 = vpop.f32.mrf.mxu1 }
 0x80c   : > { %v4077_v3 = vsel %vm3448_vm0, %v4029_v29, 0.0  ;;  %7389 = vst [vmem:[#allocation25_spill] sm:$0xff] %v6874_v41  ;;  %v3998_v2 = vsel %vm3448_vm0, %v6867_v47, 0.0  ;;  %v4081_v58 = vsel %vm3448_vm0, %v4031_v50, 0.0  ;;  %v4032_v22 = vmul.f32 %v6779_v62, %v6779_v62 }
 0x80d   : > { %3632 = vrot.lane.b32.xlu1 %v3517_v33, %s4941_s19  ;;  %v3618_v13 = vadd.f32 %v3617_v15, %v3616_v18  ;;  %v4030_v15 = vmul.f32 %v6666_v7, %v6666_v7  ;;  %v3995_v17 = vadd.f32 %v3994_v37, %v3993_v10  ;;  %v4078_v18 = vadd.f32 %v4077_v3, %v4076_v14  ;;  %v6881_v29 = vpop.f32.mrf.mxu1 }
 0x80e   : > { %7390 = vst [vmem:[#allocation26_spill] sm:$0xff] %v6881_v29  ;;  %v4000_v37 = vsel %vm3448_vm0, %v6881_v29, 0.0  ;;  %v4033_v3 = vmul.f32 %v6819_v32, %v6819_v32 }
 0x80f   : > { %3661 = vrot.lane.b32.xlu0 %v3618_v13, %s4941_s19  ;;  %v4079_v52 = vsel %vm3448_vm0, %v4030_v15, 0.0  ;;  %v3997_v31 = vadd.f32 %v3996_v27, %v3995_v17  ;;  %v4083_v15 = vsel %vm3448_vm0, %v4032_v22, 0.0  ;;  %v4002_v27 = vsel %vm3448_vm0, %v6860_v0, 0.0 }
 0x810   : > { %v4080_v25 = vadd.f32 %v4079_v52, %v4078_v18  ;;  %v4034_v52 = vmul.f32 %v6756_v5, %v6756_v5  ;;  %v4085_v50 = vsel %vm3448_vm0, %v4033_v3, 0.0  ;;  %v4035_v22 = vmul.f32 %v6798_v28, %v6798_v28 }
 0x811   : > { %v3999_v10 = vadd.f32 %v3998_v2, %v3997_v31  ;;  %v4004_v2 = vsel %vm3448_vm0, %v6874_v41, 0.0 }
 0x812   : > { %v4082_v14 = vadd.f32 %v4081_v58, %v4080_v25  ;;  %v4087_v58 = vsel %vm3448_vm0, %v4034_v52, 0.0 }
 0x813   : > { %v4001_v17 = vadd.f32 %v4000_v37, %v3999_v10  ;;  %v4089_v37 = vsel %vm3448_vm0, %v4035_v22, 0.0 }
 0x814   : > { %v4084_v18 = vadd.f32 %v4083_v15, %v4082_v14  ;;  %v4036_v15 = vmul.f32 %v6837_v12, %v6837_v12 }
 0x815   : > { %v4003_v31 = vadd.f32 %v4002_v27, %v4001_v17  ;;  %v3620_v17 = vsel %vm3619_vm1, %v3517_v33, 0.0  ;;  %v4037_v27 = vmul.f32 %v6851_v34, %v6851_v34 }
 0x816   : > { %v4086_v25 = vadd.f32 %v4085_v50, %v4084_v18  ;;  %v4091_v18 = vsel %vm3448_vm0, %v4036_v15, 0.0 }
 0x817   : > { %v4005_v10 = vadd.f32 %v4004_v2, %v4003_v31  ;;  %v3646_v31 = vsel %vm3619_vm1, %v3618_v13, 0.0  ;;  %v4093_v2 = vsel %vm3448_vm0, %v4037_v27, 0.0  ;;  %v4040_v13 = vmul.f32 %v6867_v47, %v6867_v47 }
 0x818   : > { %v4088_v14 = vadd.f32 %v4087_v58, %v4086_v25  ;;  %v4038_v25 = vmul.f32 %v6830_v38, %v6830_v38 }
 0x819   : > { %v4006_v5 = vrot.slane %v4005_v10, 4 }
 0x81a   : > { %v4090_v3 = vadd.f32 %v4089_v37, %v4088_v14  ;;  %v4095_v33 = vsel %vm3448_vm0, %v4038_v25, 0.0  ;;  %v4039_v14 = vmul.f32 %v6844_v60, %v6844_v60 }
 0x81b   : > { %v4007_v52 = vadd.f32 %v4006_v5, %v4005_v10 }
 0x81c   : > { %v4092_v50 = vadd.f32 %v4091_v18, %v4090_v3  ;;  %v4097_v5 = vsel %vm3448_vm0, %v4039_v14, 0.0  ;;  %v4041_v18 = vmul.f32 %v6881_v29, %v6881_v29 }
 0x81d   : > { %v4008_v58 = vrot.slane %v4007_v52, 2 }
 0x81e   : > { %v4094_v22 = vadd.f32 %v4093_v2, %v4092_v50 }
 0x81f   : > { %v4009_v37 = vadd.f32 %v4008_v58, %v4007_v52  ;;  %v4101_v52 = vsel %vm3448_vm0, %v4041_v18, 0.0  ;;  %v4043_v58 = vmul.f32 %v6874_v41, %v6874_v41 }
 0x820   : > { %v4096_v15 = vadd.f32 %v4095_v33, %v4094_v22 }
 0x821   : > { %v4010_v10 = vrot.slane %v4009_v37, 1  ;;  %v4105_v33 = vsel %vm3448_vm0, %v4043_v58, 0.0 }
 0x822   : > { %v4098_v3 = vadd.f32 %v4097_v5, %v4096_v15 }
 0x823   : > { %v4011_v27 = vadd.f32 %v4010_v10, %v4009_v37 }
 0x831   : > { %3621 = vadd.xlane.f32.xlu1 %v3620_v17  ;;  %v4099_v17 = vsel %vm3448_vm0, %v4040_v13, 0.0 }
 0x832   : > { %v4100_v50 = vadd.f32 %v4099_v17, %v4098_v3  ;;  %v4113_v3 = vsel %vm3619_vm1, %v4011_v27, 0.0 }
 0x834   : > { %v4102_v25 = vadd.f32 %v4101_v52, %v4100_v50 }
 0x835   : > { %3647 = vadd.xlane.f32.xlu1 %v3646_v31  ;;  %v4042_v31 = vmul.f32 %v6860_v0, %v6860_v0 }
 0x837   : > { %v4103_v2 = vsel %vm3448_vm0, %v4042_v31, 0.0 }
 0x838   : > { %v4104_v22 = vadd.f32 %v4103_v2, %v4102_v25 }
 0x83a   : > { %v4106_v14 = vadd.f32 %v4105_v33, %v4104_v22 }
 0x83c   : > { %v4107_v15 = vrot.slane %v4106_v14, 4 }
 0x83e   : > { %v4108_v37 = vadd.f32 %v4107_v15, %v4106_v14 }
 0x840   : > { %v4109_v5 = vrot.slane %v4108_v37, 2 }
 0x842   : > { %v4110_v13 = vadd.f32 %v4109_v5, %v4108_v37 }
 0x844   : > { %v4111_v10 = vrot.slane %v4110_v13, 1 }
 0x846   : > { %4125 = vrot.lane.b32.xlu1 %v4011_v27, %s4941_s19  ;;  %v4112_v17 = vadd.f32 %v4111_v10, %v4110_v13 }
 0x848   : > { %v4139_v18 = vsel %vm3619_vm1, %v4112_v17, 0.0 }
 0x86a   : > { %4114 = vadd.xlane.f32.xlu1 %v4113_v3 }
 0x86e   : > { %4140 = vadd.xlane.f32.xlu1 %v4139_v18 }
 0x87f   : > { %v3633_v50 = vpop.permute.xlu1 %3632 }
 0x880   : > { %v3635_v31 = vsel %vm3619_vm1, %v3633_v50, 0.0 }
 0x881   : > { %v3662_v52 = vpop.permute.xlu0 %3661  ;;  %3636 = vadd.xlane.f32.xlu0 %v3635_v31 }
 0x882   : > { %v3664_v25 = vsel %vm3619_vm1, %v3662_v52, 0.0 }
 0x885   : > { %3665 = vadd.xlane.f32.xlu0 %v3664_v25 }
 0x89b   : > { %4154 = vrot.lane.b32.xlu0 %v4112_v17, %s4941_s19 }
 0x8ba   : > { %v3622_v2 = vpop.xlane.xlu1 %3621 }
 0x8bb   : > { %v3623_v58 = vrot.slane %v3622_v2, 4 }
 0x8bd   : > { %v3624_v22 = vadd.f32 %v3623_v58, %v3622_v2 }
 0x8be   : > { %v3648_v33 = vpop.xlane.xlu1 %3647 }
 0x8bf   : > { %v3625_v27 = vrot.slane %v3624_v22, 2  ;;  %v3649_v10 = vrot.slane %v3648_v33, 4 }
 0x8c1   : > { %v3626_v14 = vadd.f32 %v3625_v27, %v3624_v22  ;;  %v3650_v3 = vadd.f32 %v3649_v10, %v3648_v33 }
 0x8c2   : > { %v4126_v15 = vpop.permute.xlu1 %4125 }
 0x8c3   : > { %v3627_v37 = vrot.slane %v3626_v14, 1  ;;  %v4128_v5 = vsel %vm3619_vm1, %v4126_v15, 0.0  ;;  %v3651_v18 = vrot.slane %v3650_v3, 2 }
 0x8c4   : > { %4129 = vadd.xlane.f32.xlu0 %v4128_v5 }
 0x8c5   : > { %v3628_v13 = vadd.f32 %v3627_v37, %v3626_v14  ;;  %v3652_v25 = vadd.f32 %v3651_v18, %v3650_v3 }
 0x8c7   : > { %4871 = vpush %v3628_v13  ;;  %v3653_v27 = vrot.slane %v3652_v25, 1 }
 0x8c9   : > { %v3654_v33 = vadd.f32 %v3653_v27, %v3652_v25 }
 0x8f8   : > { %s4872_s17 = spop %4871 }
 0x8f9   : > { %s6933_s24 = smul.f32 0.00048828125, %s4872_s17 }
 0x8fb   : > { %s3657_s26 = smul.f32 %s6933_s24, %s6933_s24 }
 0x90a   : > { %v3637_v50 = vpop.xlane.xlu0 %3636 }
 0x90b   : > { %v3638_v31 = vrot.slane %v3637_v50, 4 }
 0x90d   : > { %v3639_v52 = vadd.f32 %v3638_v31, %v3637_v50 }
 0x90e   : > { %v3666_v17 = vpop.xlane.xlu0 %3665 }
 0x90f   : > { %v3640_v41 = vrot.slane %v3639_v52, 2  ;;  %v3667_v2 = vrot.slane %v3666_v17, 4 }
 0x911   : > { %v3668_v58 = vadd.f32 %v3667_v2, %v3666_v17  ;;  %v3641_v0 = vadd.f32 %v3640_v41, %v3639_v52  ;;  %v4115_v41 = vpop.xlane.xlu1 %4114 }
 0x912   : > { %v4155_v22 = vpop.permute.xlu0 %4154  ;;  %v4116_v18 = vrot.slane %v4115_v41, 4 }
 0x913   : > { %v3669_v29 = vrot.slane %v3668_v58, 2  ;;  %v4157_v15 = vsel %vm3619_vm1, %v4155_v22, 0.0  ;;  %v3642_v5 = vrot.slane %v3641_v0, 1 }
 0x914   : > { %4158 = vadd.xlane.f32.xlu0 %v4157_v15  ;;  %v4117_v17 = vadd.f32 %v4116_v18, %v4115_v41 }
 0x915   : > { %v3643_v14 = vadd.f32 %v3642_v5, %v3641_v0  ;;  %v3670_v37 = vadd.f32 %v3669_v29, %v3668_v58  ;;  %v4141_v29 = vpop.xlane.xlu1 %4140 }
 0x916   : > { %v4142_v50 = vrot.slane %v4141_v29, 4  ;;  %v4118_v22 = vrot.slane %v4117_v17, 2 }
 0x917   : > { %4873 = vpush %v3643_v14  ;;  %v3671_v13 = vrot.slane %v3670_v37, 1 }
 0x918   : > { %4875 = vpush %v3654_v33  ;;  %v4143_v25 = vadd.f32 %v4142_v50, %v4141_v29  ;;  %v4119_v5 = vadd.f32 %v4118_v22, %v4117_v17  ;;  %v3445_v29 = vld [vmem:[%s7257_s10] sm:$0x1] }
 0x919   : > { %v3672_v10 = vadd.f32 %v3671_v13, %v3670_v37  ;;  %v3446_v50 = vld [vmem:[%s7258_s11] sm:$0x1] }
 0x91a   : > { %v4144_v27 = vrot.slane %v4143_v25, 2  ;;  %v4120_v13 = vrot.slane %v4119_v5, 1 }
 0x91b   : > { %4877 = vpush %v3672_v10 }
 0x91c   : > { %v4145_v14 = vadd.f32 %v4144_v27, %v4143_v25 }
 0x91e   : > { %v4146_v10 = vrot.slane %v4145_v14, 1 }
 0x920   : > { %v4147_v41 = vadd.f32 %v4146_v10, %v4145_v14 }
 0x948   : > { %s4874_s20 = spop %4873 }
 0x949   : > { %s6937_s2 = smul.f32 0.00048828125, %s4874_s20  ;;  %s4876_s21 = spop %4875 }
 0x94a   : > { %s3656_s23 = smul.f32 0.00048828125, %s4876_s21 }
 0x94b   : > { %s3675_s30 = smul.f32 %s6937_s2, %s6937_s2 }
 0x94c   : > { %s3658_s22 = ssub.f32 %s3656_s23, %s3657_s26  ;;  %s4878_s27 = spop %4877 }
 0x94d   : > { %s3674_s28 = smul.f32 0.00048828125, %s4878_s27  ;;  %v4130_v0 = vpop.xlane.xlu0 %4129 }
 0x94e   : > { %s3659_s1 = smax.f32 %s4937_s29, %s3658_s22  ;;  %v4131_v3 = vrot.slane %v4130_v0, 4 }
 0x94f   : > { %s3678_s18 = sadd.f32 1e-05, %s3659_s1 }
 0x950   : > { %s3676_s0 = ssub.f32 %s3674_s28, %s3675_s30  ;;  %v4132_v52 = vadd.f32 %v4131_v3, %v4130_v0  ;;  %v4121_v0 = vadd.f32 %v4120_v13, %v4119_v5 }
 0x951   : > { %v3679_v31 = vstv %s3678_s18 }
 0x952   : > { %4920 = vrsqrt.f32 %v3679_v31  ;;  %s3677_s19 = smax.f32 %s4937_s29, %s3676_s0  ;;  %v4133_v58 = vrot.slane %v4132_v52, 2 }
 0x953   : > { %s3682_s17 = sadd.f32 1e-05, %s3677_s19 }
 0x954   : > { %v4134_v15 = vadd.f32 %v4133_v58, %v4132_v52 }
 0x955   : > { %v3683_v2 = vstv %s3682_s17 }
 0x956   : > { %4922 = vrsqrt.f32 %v3683_v2  ;;  %v4135_v37 = vrot.slane %v4134_v15, 1 }
 0x958   : > { %v4136_v31 = vadd.f32 %v4135_v37, %v4134_v15 }
 0x95f   : > { %v4921_v33 = vpop.eup %4920 }
 0x960   : > { %4879 = vpush %v4921_v33 }
 0x963   : > { %v4923_v47 = vpop.eup %4922 }
 0x964   : > { %4881 = vpush %v4923_v47  ;;  %v3447_v47 = vld [vmem:[%s7259_s12] sm:$0x1] }
 0x965   : > { %4883 = vpush %v4121_v0 }
 0x966   : > { %4885 = vpush %v4136_v31 }
 0x967   : > { %4887 = vpush %v4147_v41 }
 0x991   : > { %s4880_s26 = spop %4879 }
 0x992   : > { %s3691_s20 = smul.f32 %s4880_s26, %s6933_s24  ;;  %v3686_v3 = vstv %s4880_s26 }
 0x993   : > { %v3687_v25 = vmul.f32 %v3686_v3, %v3445_v29 }
 0x994   : > { %v3692_v18 = vstv %s3691_s20 }
 0x995   : > { %v3693_v52 = vmul.f32 %v3692_v18, %v3445_v29  ;;  %s4882_s28 = spop %4881 }
 0x996   : > { %v3688_v17 = vstv %s4882_s28  ;;  %s3695_s18 = smul.f32 %s4882_s28, %s6937_s2  ;;  %s4884_s0 = spop %4883 }
 0x997   : > { %v3689_v2 = vmul.f32 %v3688_v17, %v3446_v50  ;;  %s6954_s24 = smul.f32 0.00048828125, %s4884_s0  ;;  %s6956_s19 = spop %4885  ;;  %v3694_v22 = vsub.f32 %v3447_v47, %v3693_v52  ;;  %v7392_v47 = vld [vmem:[#allocation17_spill] sm:$0xff]  ;;  %v7393_v17 = vld [vmem:[#allocation22_spill] sm:$0xff] }
 0x998   : > { %v3696_v58 = vstv %s3695_s18  ;;  %s4888_s17 = spop %4887  ;;  %s4138_s22 = smul.f32 0.00048828125, %s6956_s19 }
 0x999   : > { %v3690_v27 = vadd.f32 %v3689_v2, %v3687_v25  ;;  %v3697_v15 = vmul.f32 %v3696_v58, %v3446_v50  ;;  %s4150_s26 = smul.f32 %s6954_s24, %s6954_s24 }
 0x99a   : > { %s4149_s20 = smul.f32 0.00048828125, %s4888_s17 }
 0x99b   : > { %v3698_v5 = vsub.f32 %v3694_v22, %v3697_v15  ;;  %v3703_v14 = vrot.slane %v3690_v27, %v7361_v24  ;;  %s4168_s27 = smul.f32 %s4138_s22, %s4138_s22 }
 0x99c   : > { %s4151_s2 = ssub.f32 %s4149_s20, %s4150_s26 }
 0x99d   : > { %v3705_v37 = vmul.f32 %v3703_v14, %v6501_v23  ;;  %v3706_v33 = vmul.f32 %v3703_v14, %v6511_v6  ;;  %v3707_v13 = vmul.f32 %v6497_v30, %v3703_v14  ;;  %v3708_v10 = vmul.f32 %v6505_v26, %v3703_v14 }
 0x99e   : > { %v3709_v31 = vmul.f32 %v3703_v14, %v6533_v8  ;;  %v3710_v0 = vmul.f32 %v3703_v14, %v6549_v44  ;;  %v3711_v41 = vmul.f32 %v6523_v39, %v3703_v14  ;;  %v3712_v29 = vmul.f32 %v6542_v45, %v3703_v14  ;;  %s4152_s21 = smax.f32 %s4937_s29, %s4151_s2 }
 0x99f   : > { %v3713_v3 = vmul.f32 %v3703_v14, %v6569_v19  ;;  %v3714_v23 = vmul.f32 %v3703_v14, %v6589_v35  ;;  %v3715_v6 = vmul.f32 %v6560_v56, %v3703_v14  ;;  %v3716_v30 = vmul.f32 %v6578_v4, %v3703_v14  ;;  %s4171_s23 = sadd.f32 1e-05, %s4152_s21 }
 0x9a0   : > { %v3717_v26 = vmul.f32 %v3703_v14, %v6613_v40  ;;  %v3718_v8 = vmul.f32 %v3703_v14, %v6632_v61  ;;  %v3719_v44 = vmul.f32 %v6600_v16, %v3703_v14  ;;  %v3720_v39 = vmul.f32 %v6622_v1, %v3703_v14  ;;  %v4159_v16 = vpop.xlane.xlu0 %4158 }
 0x9a1   : > { %v3721_v45 = vmul.f32 %v3703_v14, %v6655_v9  ;;  %v3722_v18 = vmul.f32 %v3703_v14, %v6674_v46  ;;  %v3723_v19 = vmul.f32 %v6643_v63, %v3703_v14  ;;  %v3724_v35 = vmul.f32 %v6664_v48, %v3703_v14  ;;  %v7391_v46 = vld [vmem:[#allocation21_spill] sm:$0xff] }
 0x9a2   : > { %v3725_v56 = vmul.f32 %v3703_v14, %v6697_v59  ;;  %v3726_v4 = vmul.f32 %v3703_v14, %v6716_v42  ;;  %v3727_v40 = vmul.f32 %v6685_v11, %v3703_v14  ;;  %v3728_v61 = vmul.f32 %v6706_v20, %v3703_v14 }
 0x9a3   : > { %v3729_v1 = vmul.f32 %v3703_v14, %v6739_v57  ;;  %v3730_v50 = vmul.f32 %v3703_v14, %v6758_v53  ;;  %v3731_v9 = vmul.f32 %v6727_v54, %v3703_v14  ;;  %v3732_v52 = vmul.f32 %v7391_v46, %v3703_v14 }
 0x9a4   : > { %v3733_v63 = vmul.f32 %v3703_v14, %v6781_v55  ;;  %v3734_v48 = vmul.f32 %v3703_v14, %v6800_v51  ;;  %v3741_v59 = vrot.slane %v3698_v5, %v7361_v24  ;;  %v4172_v42 = vstv %s4171_s23 }
 0x9a5   : > { %v3735_v11 = vmul.f32 %v7392_v47, %v3703_v14  ;;  %v3736_v20 = vmul.f32 %v7393_v17, %v3703_v14  ;;  %4924 = vrsqrt.f32 %v4172_v42  ;;  %v4160_v25 = vrot.slane %v4159_v16, 4 }
 0x9a6   : > { %v6995_v57 = vadd.f32 %v3741_v59, %v3705_v37  ;;  %v6997_v53 = vadd.f32 %v3741_v59, %v3706_v33  ;;  %v6999_v54 = vadd.f32 %v3741_v59, %v3707_v13  ;;  %v7001_v2 = vadd.f32 %v3741_v59, %v3708_v10 }
 0x9a7   : > { %v7003_v55 = vadd.f32 %v3741_v59, %v3709_v31  ;;  %v7005_v51 = vadd.f32 %v3741_v59, %v3710_v0  ;;  %v7007_v58 = vadd.f32 %v3741_v59, %v3711_v41  ;;  %v7009_v22 = vadd.f32 %v3741_v59, %v3712_v29 }
 0x9a8   : > { %v7011_v27 = vadd.f32 %v3741_v59, %v3713_v3  ;;  %v7013_v15 = vadd.f32 %v3741_v59, %v3714_v23  ;;  %v7015_v5 = vadd.f32 %v3741_v59, %v3715_v6  ;;  %v7017_v14 = vadd.f32 %v3741_v59, %v3716_v30 }
 0x9a9   : > { %v7019_v37 = vadd.f32 %v3741_v59, %v3717_v26  ;;  %v7021_v33 = vadd.f32 %v3741_v59, %v3718_v8  ;;  %v7023_v13 = vadd.f32 %v3741_v59, %v3719_v44  ;;  %v7025_v10 = vadd.f32 %v3741_v59, %v3720_v39 }
 0x9aa   : > { %7394 = vst [vmem:[#allocation21_spill] sm:$0xff] %v7015_v5  ;;  %7395 = vst [vmem:[#allocation17_spill] sm:$0xff] %v7017_v14  ;;  %v7027_v31 = vadd.f32 %v3741_v59, %v3721_v45  ;;  %v7029_v0 = vadd.f32 %v3741_v59, %v3722_v18  ;;  %v7031_v41 = vadd.f32 %v3741_v59, %v3723_v19 }
 0x9ab   : > { %7396 = vst [vmem:[#allocation22_spill] sm:$0xff] %v7019_v37  ;;  %7397 = vst [vmem:[#allocation27_spill] sm:$0xff] %v7021_v33  ;;  %v7033_v29 = vadd.f32 %v3741_v59, %v3724_v35  ;;  %v7035_v3 = vadd.f32 %v3741_v59, %v3725_v56  ;;  %v7037_v23 = vadd.f32 %v3741_v59, %v3726_v4 }
 0x9ac   : > { %7398 = vst [vmem:[#allocation28_spill] sm:$0xff] %v7023_v13  ;;  %7399 = vst [vmem:[#allocation29_spill] sm:$0xff] %v7025_v10  ;;  %v7039_v6 = vadd.f32 %v3741_v59, %v3727_v40  ;;  %v7041_v30 = vadd.f32 %v3741_v59, %v3728_v61  ;;  %v7043_v26 = vadd.f32 %v3741_v59, %v3729_v1 }
 0x9ad   : > { %7400 = vst [vmem:[#allocation30_spill] sm:$0xff] %v7027_v31  ;;  %7401 = vst [vmem:[#allocation31_spill] sm:$0xff] %v7029_v0  ;;  %v7045_v8 = vadd.f32 %v3741_v59, %v3730_v50  ;;  %v7047_v44 = vadd.f32 %v3741_v59, %v3731_v9  ;;  %v7049_v39 = vadd.f32 %v3741_v59, %v3732_v52 }
 0x9ae   : > { %7402 = vst [vmem:[#allocation32_spill] sm:$0xff] %v7031_v41  ;;  %7403 = vst [vmem:[#allocation33_spill] sm:$0xff] %v7033_v29  ;;  %v7051_v45 = vadd.f32 %v3741_v59, %v3733_v63  ;;  %v7053_v18 = vadd.f32 %v3741_v59, %v3734_v48  ;;  %v7055_v19 = vadd.f32 %v3741_v59, %v3735_v11  ;;  %v3941_v63 = vld [vmem:[%s7262_s15] sm:$0x1]  ;;  %v7435_v29 = vld [vmem:[#allocation25_spill] sm:$0xff] }
 0x9af   : > { %7404 = vst [vmem:[#allocation34_spill] sm:$0xff] %v7035_v3  ;;  %7405 = vst [vmem:[#allocation35_spill] sm:$0xff] %v7037_v23  ;;  %v7057_v35 = vadd.f32 %v3741_v59, %v3736_v20  ;;  %v4161_v56 = vadd.f32 %v4160_v25, %v4159_v16  ;;  %v3940_v16 = vld [vmem:[%s7261_s14] sm:$0x1]  ;;  %v7433_v23 = vld [vmem:[#allocation26_spill] sm:$0xff] }
 0x9b0   : > { %7406 = vst [vmem:[#allocation36_spill] sm:$0xff] %v7039_v6  ;;  %7407 = vst [vmem:[#allocation37_spill] sm:$0xff] %v7041_v30  ;;  %v3942_v20 = vld [vmem:[%s7263_s16] sm:$0x1]  ;;  %v7434_v3 = vld [vmem:[#allocation23_spill] sm:$0xff] }
 0x9b1   : > { %7408 = vst [vmem:[#allocation38_spill] sm:$0xff] %v7043_v26  ;;  %7409 = vst [vmem:[#allocation39_spill] sm:$0xff] %v7045_v8  ;;  %v4162_v4 = vrot.slane %v4161_v56, 2  ;;  %v7429_v8 = vld [vmem:[#allocation19_spill] sm:$0xff]  ;;  %v7431_v30 = vld [vmem:[#allocation20_spill] sm:$0xff] }
 0x9b2   : > { %7410 = vst [vmem:[#allocation40_spill] sm:$0xff] %v7047_v44  ;;  %7411 = vst [vmem:[#allocation41_spill] sm:$0xff] %v7049_v39  ;;  %v4925_v40 = vpop.eup %4924  ;;  %v7422_v39 = vld [vmem:[#allocation8_spill] sm:$0xff]  ;;  %v7430_v26 = vld [vmem:[#allocation15_spill] sm:$0xff] }
 0x9b3   : > { %7412 = vst [vmem:[#allocation42_spill] sm:$0xff] %v7051_v45  ;;  %7413 = vst [vmem:[#allocation43_spill] sm:$0xff] %v7053_v18  ;;  %v4163_v61 = vadd.f32 %v4162_v4, %v4161_v56  ;;  %v7421_v18 = vld [vmem:[#allocation11_spill] sm:$0xff]  ;;  %v7432_v6 = vld [vmem:[#allocation24_spill] sm:$0xff] }
 0x9b4   : > { %7414 = vst [vmem:[#allocation44_spill] sm:$0xff] %v7055_v19  ;;  %7415 = vst [vmem:[#allocation45_spill] sm:$0xff] %v7057_v35  ;;  %v7418_v35 = vld [vmem:[#allocation4_spill] sm:$0xff] }
 0x9b5   : > { %v4164_v1 = vrot.slane %v4163_v61, 1 }
 0x9b7   : > { %v4165_v50 = vadd.f32 %v4164_v1, %v4163_v61  ;;  %v7416_v1 = vld [vmem:[#allocation5_spill] sm:$0xff] }
 0x9b9   : > { %4889 = vpush %v4165_v50 }
 0x9ba   : > { %4891 = vpush %v4925_v40 }
 0x9ea   : > { %s4890_s28 = spop %4889 }
 0x9eb   : > { %s4167_s30 = smul.f32 0.00048828125, %s4890_s28  ;;  %s4892_s17 = spop %4891 }
 0x9ec   : > { %s4184_s26 = smul.f32 %s4892_s17, %s6954_s24  ;;  %v4179_v52 = vstv %s4892_s17  ;;  %s7454_s24 = sshll.u32 %s7462_s25, 8 }
 0x9ed   : > { %s4169_s1 = ssub.f32 %s4167_s30, %s4168_s27  ;;  %v4180_v42 = vmul.f32 %v4179_v52, %v3940_v16  ;;  %v7419_v52 = vld [vmem:[#allocation6_spill] sm:$0xff] }
 0x9ee   : > { %v4185_v48 = vstv %s4184_s26 }
 0x9ef   : > { %s4170_s18 = smax.f32 %s4937_s29, %s4169_s1  ;;  %v4186_v11 = vmul.f32 %v4185_v48, %v3940_v16  ;;  %v7420_v16 = vld [vmem:[#allocation9_spill] sm:$0xff]  ;;  %s7455_s1 = sld [smem:[#allocation49_spill]] }
 0x9f0   : > { %s4175_s0 = sadd.f32 1e-05, %s4170_s18 }
 0x9f1   : > { %v4187_v40 = vsub.f32 %v3942_v20, %v4186_v11  ;;  %v7425_v11 = vld [vmem:[#allocation18_spill] sm:$0xff] }
 0x9f2   : > { %v4176_v9 = vstv %s4175_s0 }
 0x9f3   : > { %4926 = vrsqrt.f32 %v4176_v9  ;;  %v7417_v9 = vld [vmem:[#allocation7_spill] sm:$0xff] }
 0x9f5   : > { %s7154_s18 = scalar_lea.vmem %s7455_s1, %s7454_s24 }
 0xa00   : > { %v4927_v46 = vpop.eup %4926 }
 0xa01   : > { %4893 = vpush %v4927_v46 }
 0xa32   : > { %s4894_s23 = spop %4893 }
 0xa33   : > { %v4181_v59 = vstv %s4894_s23  ;;  %s4188_s29 = smul.f32 %s4894_s23, %s4138_s22 }
 0xa34   : > { %v4182_v47 = vmul.f32 %v4181_v59, %v3941_v63 }
 0xa35   : > { %v4189_v17 = vstv %s4188_s29 }
 0xa36   : > { %v4183_v25 = vadd.f32 %v4182_v47, %v4180_v42  ;;  %v4190_v56 = vmul.f32 %v4189_v17, %v3941_v63  ;;  %v7423_v42 = vld [vmem:[#allocation10_spill] sm:$0xff]  ;;  %v7424_v47 = vld [vmem:[#allocation13_spill] sm:$0xff] }
 0xa38   : > { %v4196_v4 = vrot.slane %v4183_v25, %v7361_v24  ;;  %v4191_v61 = vsub.f32 %v4187_v40, %v4190_v56  ;;  %v7426_v25 = vld [vmem:[#allocation12_spill] sm:$0xff]  ;;  %v7427_v40 = vld [vmem:[#allocation14_spill] sm:$0xff] }
 0xa3a   : > { %v4198_v50 = vmul.f32 %v4196_v4, %v7416_v1  ;;  %v4199_v46 = vmul.f32 %v4196_v4, %v7417_v9  ;;  %v4200_v19 = vmul.f32 %v7418_v35, %v4196_v4  ;;  %v4201_v59 = vmul.f32 %v7419_v52, %v4196_v4  ;;  %v7428_v9 = vld [vmem:[#allocation16_spill] sm:$0xff] }
 0xa3b   : > { %v4202_v48 = vmul.f32 %v4196_v4, %v7420_v16  ;;  %v4203_v45 = vmul.f32 %v4196_v4, %v7421_v18  ;;  %v4204_v44 = vmul.f32 %v7422_v39, %v4196_v4  ;;  %v4205_v63 = vmul.f32 %v7423_v42, %v4196_v4 }
 0xa3c   : > { %v4206_v17 = vmul.f32 %v4196_v4, %v7424_v47  ;;  %v4207_v20 = vmul.f32 %v4196_v4, %v7425_v11  ;;  %v4208_v56 = vmul.f32 %v7426_v25, %v4196_v4  ;;  %v4209_v1 = vmul.f32 %v7427_v40, %v4196_v4 }
 0xa3d   : > { %v4210_v35 = vmul.f32 %v4196_v4, %v7428_v9  ;;  %v4211_v52 = vmul.f32 %v4196_v4, %v7429_v8  ;;  %v4212_v16 = vmul.f32 %v7430_v26, %v4196_v4  ;;  %v4213_v18 = vmul.f32 %v6626_v43, %v4196_v4 }
 0xa3e   : > { %v4214_v39 = vmul.f32 %v4196_v4, %v6689_v36  ;;  %v4215_v42 = vmul.f32 %v4196_v4, %v6730_v49  ;;  %v4216_v47 = vmul.f32 %v6666_v7, %v4196_v4  ;;  %v4217_v11 = vmul.f32 %v6710_v21, %v4196_v4 }
 0xa3f   : > { %v4218_v25 = vmul.f32 %v4196_v4, %v6779_v62  ;;  %v4219_v40 = vmul.f32 %v4196_v4, %v6819_v32  ;;  %v4220_v9 = vmul.f32 %v7431_v30, %v4196_v4  ;;  %v4221_v8 = vmul.f32 %v6798_v28, %v4196_v4 }
 0xa40   : > { %v4222_v26 = vmul.f32 %v4196_v4, %v6837_v12  ;;  %v4223_v43 = vmul.f32 %v4196_v4, %v6851_v34  ;;  %v4224_v36 = vmul.f32 %v6830_v38, %v4196_v4  ;;  %v4225_v49 = vmul.f32 %v6844_v60, %v4196_v4 }
 0xa41   : > { %v4234_v7 = vrot.slane %v4191_v61, %v7361_v24  ;;  %v4226_v21 = vmul.f32 %v4196_v4, %v7432_v6  ;;  %v4227_v62 = vmul.f32 %v4196_v4, %v7433_v23  ;;  %v4228_v32 = vmul.f32 %v7434_v3, %v4196_v4 }
 0xa42   : > { %v4229_v30 = vmul.f32 %v7435_v29, %v4196_v4 }
 0xa43   : > { %v4236_v41 = vadd.f32 %v4234_v7, %v4198_v50  ;;  %v4237_v28 = vadd.f32 %v4234_v7, %v4199_v46  ;;  %v4238_v0 = vadd.f32 %v4234_v7, %v4200_v19  ;;  %v4239_v12 = vadd.f32 %v4234_v7, %v4201_v59 }
 0xa44   : > { %v4240_v31 = vadd.f32 %v4234_v7, %v4202_v48  ;;  %v4241_v34 = vadd.f32 %v4234_v7, %v4203_v45  ;;  %v4242_v10 = vadd.f32 %v4234_v7, %v4204_v44  ;;  %v4243_v38 = vadd.f32 %v4234_v7, %v4205_v63 }
 0xa45   : > { %v4244_v13 = vadd.f32 %v4234_v7, %v4206_v17  ;;  %v4245_v60 = vadd.f32 %v4234_v7, %v4207_v20  ;;  %v4246_v33 = vadd.f32 %v4234_v7, %v4208_v56  ;;  %v4247_v24 = vadd.f32 %v4234_v7, %v4209_v1 }
 0xa46   : > { %v4248_v61 = vadd.f32 %v4234_v7, %v4210_v35  ;;  %v4249_v6 = vadd.f32 %v4234_v7, %v4211_v52  ;;  %v4250_v37 = vadd.f32 %v4234_v7, %v4212_v16  ;;  %v4251_v23 = vadd.f32 %v4234_v7, %v4213_v18 }
 0xa47   : > { %v4252_v14 = vadd.f32 %v4234_v7, %v4214_v39  ;;  %v4253_v3 = vadd.f32 %v4234_v7, %v4215_v42  ;;  %v4254_v5 = vadd.f32 %v4234_v7, %v4216_v47  ;;  %v4255_v29 = vadd.f32 %v4234_v7, %v4217_v11 }
 0xa48   : > { %v4256_v4 = vadd.f32 %v4234_v7, %v4218_v25  ;;  %v4257_v50 = vadd.f32 %v4234_v7, %v4219_v40  ;;  %v4258_v19 = vadd.f32 %v4234_v7, %v4220_v9  ;;  %v4259_v46 = vadd.f32 %v4234_v7, %v4221_v8  ;;  %v7436_v40 = vld [vmem:[#allocation21_spill] sm:$0xff]  ;;  %v7438_v9 = vld [vmem:[#allocation22_spill] sm:$0xff] }
 0xa49   : > { %v4260_v59 = vadd.f32 %v4234_v7, %v4222_v26  ;;  %v4261_v45 = vadd.f32 %v4234_v7, %v4223_v43  ;;  %v4262_v44 = vadd.f32 %v4234_v7, %v4224_v36  ;;  %v4263_v48 = vadd.f32 %v4234_v7, %v4225_v49  ;;  %v7447_v49 = vld [vmem:[#allocation35_spill] sm:$0xff] }
 0xa4a   : > { %v4264_v63 = vadd.f32 %v4234_v7, %v4226_v21  ;;  %v4265_v17 = vadd.f32 %v4234_v7, %v4227_v62  ;;  %v4266_v20 = vadd.f32 %v4234_v7, %v4228_v32  ;;  %v4267_v56 = vadd.f32 %v4234_v7, %v4229_v30  ;;  %v7448_v21 = vld [vmem:[#allocation36_spill] sm:$0xff]  ;;  %v7450_v30 = vld [vmem:[#allocation38_spill] sm:$0xff] }
 0xa4b   : > { %v4268_v1 = vadd.f32 %v4236_v41, %v6995_v57  ;;  %v4269_v35 = vadd.f32 %v4237_v28, %v6997_v53  ;;  %v4270_v52 = vadd.f32 %v4238_v0, %v6999_v54  ;;  %v4271_v16 = vadd.f32 %v4239_v12, %v7001_v2  ;;  %v7437_v41 = vld [vmem:[#allocation17_spill] sm:$0xff]  ;;  %v7439_v0 = vld [vmem:[#allocation27_spill] sm:$0xff] }
 0xa4c   : > { %v4272_v18 = vadd.f32 %v4240_v31, %v7003_v55  ;;  %v4273_v39 = vadd.f32 %v4241_v34, %v7005_v51  ;;  %v4274_v42 = vadd.f32 %v4242_v10, %v7007_v58  ;;  %v4275_v47 = vadd.f32 %v4243_v38, %v7009_v22  ;;  %v7440_v55 = vld [vmem:[#allocation28_spill] sm:$0xff]  ;;  %v7441_v51 = vld [vmem:[#allocation29_spill] sm:$0xff]  ;;  %v7442_v58 = vld [vmem:[#allocation30_spill] sm:$0xff] }
 0xa4d   : > { %v4276_v11 = vadd.f32 %v4244_v13, %v7011_v27  ;;  %v4277_v25 = vadd.f32 %v4245_v60, %v7013_v15  ;;  %v4278_v57 = vadd.f32 %v4246_v33, %v7436_v40  ;;  %v4279_v53 = vadd.f32 %v4247_v24, %v7437_v41  ;;  %v7443_v22 = vld [vmem:[#allocation31_spill] sm:$0xff]  ;;  %v7444_v27 = vld [vmem:[#allocation32_spill] sm:$0xff]  ;;  %v7445_v15 = vld [vmem:[#allocation33_spill] sm:$0xff] }
 0xa4e   : > { %v4280_v54 = vadd.f32 %v4248_v61, %v7438_v9  ;;  %v4281_v2 = vadd.f32 %v4249_v6, %v7439_v0  ;;  %v4282_v31 = vadd.f32 %v4250_v37, %v7440_v55  ;;  %v4283_v8 = vadd.f32 %v4251_v23, %v7441_v51  ;;  %v7446_v33 = vld [vmem:[#allocation34_spill] sm:$0xff]  ;;  %v7449_v37 = vld [vmem:[#allocation37_spill] sm:$0xff]  ;;  %v7451_v28 = vld [vmem:[#allocation39_spill] sm:$0xff] }
 0xa4f   : > { %v4284_v10 = vadd.f32 %v4252_v14, %v7442_v58  ;;  %v4285_v26 = vadd.f32 %v4253_v3, %v7443_v22  ;;  %v4286_v13 = vadd.f32 %v4254_v5, %v7444_v27  ;;  %v4287_v43 = vadd.f32 %v4255_v29, %v7445_v15  ;;  %v7452_v5 = vld [vmem:[#allocation40_spill] sm:$0xff]  ;;  %v7453_v38 = vld [vmem:[#allocation41_spill] sm:$0xff]  ;;  %v7456_v24 = vld [vmem:[#allocation42_spill] sm:$0xff] }
 0xa50   : > { %v7126_v36 = vadd.f32 %v4256_v4, %v7446_v33  ;;  %v7129_v7 = vadd.f32 %v4257_v50, %v7447_v49  ;;  %v7132_v62 = vadd.f32 %v4258_v19, %v7448_v21  ;;  %v7135_v32 = vadd.f32 %v4259_v46, %v7449_v37  ;;  %v7457_v6 = vld [vmem:[#allocation43_spill] sm:$0xff]  ;;  %v7458_v3 = vld [vmem:[#allocation44_spill] sm:$0xff]  ;;  %v7459_v4 = vld [vmem:[#allocation45_spill] sm:$0xff] }
 0xa51   : > { %v7138_v14 = vadd.f32 %v4260_v59, %v7450_v30  ;;  %v7141_v12 = vadd.f32 %v4261_v45, %v7451_v28  ;;  %v7144_v34 = vadd.f32 %v4262_v44, %v7452_v5  ;;  %v7147_v60 = vadd.f32 %v4263_v48, %v7453_v38 }
 0xa52   : > { %v7157_v61 = vadd.f32 %v4264_v63, %v7456_v24  ;;  %v7160_v23 = vadd.f32 %v4265_v17, %v7457_v6  ;;  %v7163_v29 = vadd.f32 %v4266_v20, %v7458_v3  ;;  %v7166_v50 = vadd.f32 %v4267_v56, %v7459_v4 }
 0xa53   : > { %v4300_v19 = vmax.f32 %v4268_v1, 0.0  ;;  %v4301_v46 = vmax.f32 %v4269_v35, 0.0  ;;  %v4302_v59 = vmax.f32 %v4270_v52, 0.0  ;;  %v4303_v45 = vmax.f32 %v4271_v16, 0.0 }
 0xa54   : > { %v4304_v44 = vmax.f32 %v4272_v18, 0.0  ;;  %v4305_v48 = vmax.f32 %v4273_v39, 0.0  ;;  %v4306_v63 = vmax.f32 %v4274_v42, 0.0  ;;  %v4307_v17 = vmax.f32 %v4275_v47, 0.0 }
 0xa55   : > { %v4308_v40 = vmax.f32 %v4276_v11, 0.0  ;;  %v4309_v20 = vmax.f32 %v4277_v25, 0.0  ;;  %v4310_v41 = vmax.f32 %v4278_v57, 0.0  ;;  %v4311_v9 = vmax.f32 %v4279_v53, 0.0  ;;  %4332 = vst.msk [vmem:[%s7154_s18] sm:$0xff] %vm3448_vm0, %v4300_v19  ;;  %4333 = vst.msk [vmem:[%s7154_s18 + $0x8] sm:$0xff] %vm3448_vm0, %v4301_v46 }
 0xa56   : > { %4334 = vst.msk [vmem:[%s7154_s18 + $0x10] sm:$0xff] %vm3448_vm0, %v4302_v59  ;;  %4335 = vst.msk [vmem:[%s7154_s18 + $0x18] sm:$0xff] %vm3448_vm0, %v4303_v45  ;;  %v4312_v56 = vmax.f32 %v4280_v54, 0.0  ;;  %v4313_v1 = vmax.f32 %v4281_v2, 0.0  ;;  %v4314_v35 = vmax.f32 %v4282_v31, 0.0  ;;  %v4315_v52 = vmax.f32 %v4283_v8, 0.0 }
 0xa57   : > { %4336 = vst.msk [vmem:[%s7154_s18 + $0x20] sm:$0xff] %vm3448_vm0, %v4304_v44  ;;  %4337 = vst.msk [vmem:[%s7154_s18 + $0x28] sm:$0xff] %vm3448_vm0, %v4305_v48  ;;  %v4316_v16 = vmax.f32 %v4284_v10, 0.0  ;;  %v4317_v18 = vmax.f32 %v4285_v26, 0.0  ;;  %v4318_v39 = vmax.f32 %v4286_v13, 0.0  ;;  %v4319_v42 = vmax.f32 %v4287_v43, 0.0 }
 0xa58   : > { %4338 = vst.msk [vmem:[%s7154_s18 + $0x30] sm:$0xff] %vm3448_vm0, %v4306_v63  ;;  %4339 = vst.msk [vmem:[%s7154_s18 + $0x38] sm:$0xff] %vm3448_vm0, %v4307_v17  ;;  %v4320_v47 = vmax.f32 %v7126_v36, 0.0  ;;  %v4321_v11 = vmax.f32 %v7129_v7, 0.0  ;;  %v4322_v25 = vmax.f32 %v7132_v62, 0.0  ;;  %v4323_v57 = vmax.f32 %v7135_v32, 0.0 }
 0xa59   : > { %4340 = vst.msk [vmem:[%s7154_s18 + $0x40] sm:$0xff] %vm3448_vm0, %v4308_v40  ;;  %4341 = vst.msk [vmem:[%s7154_s18 + $0x48] sm:$0xff] %vm3448_vm0, %v4309_v20  ;;  %v4324_v53 = vmax.f32 %v7138_v14, 0.0  ;;  %v4325_v54 = vmax.f32 %v7141_v12, 0.0  ;;  %v4326_v0 = vmax.f32 %v7144_v34, 0.0  ;;  %v4327_v2 = vmax.f32 %v7147_v60, 0.0 }
 0xa5a   : > { %4342 = vst.msk [vmem:[%s7154_s18 + $0x50] sm:$0xff] %vm3448_vm0, %v4310_v41  ;;  %4343 = vst.msk [vmem:[%s7154_s18 + $0x58] sm:$0xff] %vm3448_vm0, %v4311_v9  ;;  %v4328_v55 = vmax.f32 %v7157_v61, 0.0  ;;  %v4329_v31 = vmax.f32 %v7160_v23, 0.0  ;;  %v4330_v51 = vmax.f32 %v7163_v29, 0.0  ;;  %v4331_v8 = vmax.f32 %v7166_v50, 0.0 }
 0xa5b   : > { %4344 = vst.msk [vmem:[%s7154_s18 + $0x60] sm:$0xff] %vm3448_vm0, %v4312_v56  ;;  %4345 = vst.msk [vmem:[%s7154_s18 + $0x68] sm:$0xff] %vm3448_vm0, %v4313_v1 }
 0xa5c   : > { %4346 = vst.msk [vmem:[%s7154_s18 + $0x70] sm:$0xff] %vm3448_vm0, %v4314_v35  ;;  %4347 = vst.msk [vmem:[%s7154_s18 + $0x78] sm:$0xff] %vm3448_vm0, %v4315_v52 }
 0xa5d   : > { %4348 = vst.msk [vmem:[%s7154_s18 + $0x80] sm:$0xff] %vm3448_vm0, %v4316_v16  ;;  %4349 = vst.msk [vmem:[%s7154_s18 + $0x88] sm:$0xff] %vm3448_vm0, %v4317_v18 }
 0xa5e   : > { %4350 = vst.msk [vmem:[%s7154_s18 + $0x90] sm:$0xff] %vm3448_vm0, %v4318_v39  ;;  %4351 = vst.msk [vmem:[%s7154_s18 + $0x98] sm:$0xff] %vm3448_vm0, %v4319_v42 }
 0xa5f   : > { %4352 = vst.msk [vmem:[%s7154_s18 + $0xa0] sm:$0xff] %vm3448_vm0, %v4320_v47  ;;  %4353 = vst.msk [vmem:[%s7154_s18 + $0xa8] sm:$0xff] %vm3448_vm0, %v4321_v11 }
 0xa60   : > { %4354 = vst.msk [vmem:[%s7154_s18 + $0xb0] sm:$0xff] %vm3448_vm0, %v4322_v25  ;;  %4355 = vst.msk [vmem:[%s7154_s18 + $0xb8] sm:$0xff] %vm3448_vm0, %v4323_v57 }
 0xa61   : > { %4356 = vst.msk [vmem:[%s7154_s18 + $0xc0] sm:$0xff] %vm3448_vm0, %v4324_v53  ;;  %4357 = vst.msk [vmem:[%s7154_s18 + $0xc8] sm:$0xff] %vm3448_vm0, %v4325_v54 }
 0xa62   : > { %4358 = vst.msk [vmem:[%s7154_s18 + $0xd0] sm:$0xff] %vm3448_vm0, %v4326_v0  ;;  %4359 = vst.msk [vmem:[%s7154_s18 + $0xd8] sm:$0xff] %vm3448_vm0, %v4327_v2 }
 0xa63   : > { %4360 = vst.msk [vmem:[%s7154_s18 + $0xe0] sm:$0xff] %vm3448_vm0, %v4328_v55  ;;  %4361 = vst.msk [vmem:[%s7154_s18 + $0xe8] sm:$0xff] %vm3448_vm0, %v4329_v31 }
 0xa64   : > { %4362 = vst.msk [vmem:[%s7154_s18 + $0xf0] sm:$0xff] %vm3448_vm0, %v4330_v51  ;;  %4363 = vst.msk [vmem:[%s7154_s18 + $0xf8] sm:$0xff] %vm3448_vm0, %v4331_v8 }
 0xa65 PF: > { %s7460_s25 = sld [smem:[#allocation3_spill]] }
 0xa6b   : > { %s27_s24 = sadd.s32 1, %s7460_s25  }
 0xa6c   : > { %p24_p4 = scmp.ge.s32.totalorder %s27_s24, 4  }
 0xa6e   :  { %26 = sbr.rel (!%p24_p4) target bundleno = 5 (0x5), region = 120 }

</bundles_post_ra>
